<compile_context>
chip_gen: v7x
topology: tpu7x:2x2x1
jax: 0.10.0
libtpu: 0.0.40
codegen_flags: <defaults>
</compile_context>

<pallas_src>
import jax
import jax.numpy as jnp
from jax.experimental import pallas as pl
from jax.experimental.pallas import tpu as pltpu

_BN_EPS = 1e-5


def _make_residual_kernel(stride, ho, wo, cin, cout, use_1x1conv):
    s = stride

    def kernel(*refs):
        if use_1x1conv:
            (x_ref, w1_ref, sc1_ref, sh1_ref, w2_ref, sc2_ref, sh2_ref,
             w11_ref, b11_ref, o_ref, ypad_ref) = refs
        else:
            (x_ref, w1_ref, sc1_ref, sh1_ref, w2_ref, sc2_ref, sh2_ref,
             o_ref, ypad_ref) = refs

        # The s*s spatial phases of the zero-padded input, each (hph, wph, cin).
        phases = [x_ref[0, k] for k in range(s * s)]

        # ---- conv1 (3x3, stride s) + BN1 + ReLU ------------------------------
        acc1 = jnp.zeros((ho * wo, cout), jnp.float32)
        center = None  # tap (1,1) == the (strided) unpadded input; reused by shortcut
        for dy in range(3):
            for dx in range(3):
                ph = phases[(dy % s) * s + (dx % s)]
                oy, ox = dy // s, dx // s
                tap = ph[oy:oy + ho, ox:ox + wo, :].astype(jnp.float32)
                tap = tap.reshape(ho * wo, cin)
                if (dy, dx) == (1, 1):
                    center = tap
                acc1 = acc1 + jnp.dot(
                    tap, w1_ref[dy, dx],
                    preferred_element_type=jnp.float32,
                    precision=jax.lax.Precision.HIGHEST)
        y1 = jnp.maximum(acc1 * sc1_ref[...] + sh1_ref[...], 0.0)

        # Stage the zero-padded intermediate in VMEM scratch (fused: no HBM pass).
        ypad_ref[...] = jnp.zeros_like(ypad_ref)
        ypad_ref[pl.ds(1, ho), pl.ds(1, wo), :] = y1.reshape(ho, wo, cout)

        # ---- conv2 (3x3, stride 1) + BN2 + ReLU ------------------------------
        acc2 = jnp.zeros((ho * wo, cout), jnp.float32)
        for dy in range(3):
            for dx in range(3):
                tap2 = ypad_ref[pl.ds(dy, ho), pl.ds(dx, wo), :]
                tap2 = tap2.reshape(ho * wo, cout)
                acc2 = acc2 + jnp.dot(
                    tap2, w2_ref[dy, dx],
                    preferred_element_type=jnp.float32,
                    precision=jax.lax.Precision.HIGHEST)
        y2 = jnp.maximum(acc2 * sc2_ref[...] + sh2_ref[...], 0.0)

        # ---- shortcut (identity or fused 1x1 conv, stride s) + residual add --
        if use_1x1conv:
            shortcut = jnp.dot(
                center, w11_ref[...],
                preferred_element_type=jnp.float32,
                precision=jax.lax.Precision.HIGHEST) + b11_ref[...]
        else:
            shortcut = center  # cin == cout in this case (as in the PyTorch module)

        out = y2 + shortcut
        o_ref[0] = out.reshape(ho, wo, cout).astype(o_ref.dtype)

    return kernel


def residual_forward(x, cfg, p):
    """One Residual block, NHWC in -> NHWC out, via a single fused pallas_call."""
    n, h, w, cin = x.shape
    stride = cfg["stride"]
    use_1x1conv = cfg["use_1x1conv"]
    cout = p["w1"].shape[-1]
    if not use_1x1conv:
        assert cin == cout and stride == 1

    ho = (h - 1) // stride + 1
    wo = (w - 1) // stride + 1

    # Zero-pad spatially by 1 (conv padding) and up to a multiple of `stride`,
    # then decompose into stride x stride phases so the kernel only needs
    # unit-stride static slices.
    hp, wp = h + 2, w + 2
    hp2 = -(-hp // stride) * stride
    wp2 = -(-wp // stride) * stride
    xp = jnp.pad(x, ((0, 0), (1, 1 + hp2 - hp), (1, 1 + wp2 - wp), (0, 0)))
    hph, wph = hp2 // stride, wp2 // stride
    x_ph = xp.reshape(n, hph, stride, wph, stride, cin)
    x_ph = x_ph.transpose(0, 2, 4, 1, 3, 5).reshape(n, stride * stride, hph, wph, cin)

    # Fold eval-mode BatchNorm (and the conv bias) into per-channel scale/shift.
    def fold_bn(gamma, beta, mean, var, conv_bias):
        scale = gamma / jnp.sqrt(var + _BN_EPS)
        shift = beta + scale * (conv_bias - mean)
        return (scale.reshape(1, cout).astype(jnp.float32),
                shift.reshape(1, cout).astype(jnp.float32))

    sc1, sh1 = fold_bn(p["gamma1"], p["beta1"], p["mean1"], p["var1"], p["b1"])
    sc2, sh2 = fold_bn(p["gamma2"], p["beta2"], p["mean2"], p["var2"], p["b2"])

    vec_spec = pl.BlockSpec((1, cout), lambda i: (0, 0))
    in_specs = [
        pl.BlockSpec((1, stride * stride, hph, wph, cin),
                     lambda i: (i, 0, 0, 0, 0)),
        pl.BlockSpec((3, 3, cin, cout), lambda i: (0, 0, 0, 0)),
        vec_spec, vec_spec,
        pl.BlockSpec((3, 3, cout, cout), lambda i: (0, 0, 0, 0)),
        vec_spec, vec_spec,
    ]
    args = [x_ph, p["w1"], sc1, sh1, p["w2"], sc2, sh2]
    if use_1x1conv:
        in_specs += [pl.BlockSpec((cin, cout), lambda i: (0, 0)), vec_spec]
        args += [p["w11"], p["b11"].reshape(1, cout).astype(jnp.float32)]

    flops = 2 * n * ho * wo * 9 * (cin * cout + cout * cout)
    if use_1x1conv:
        flops += 2 * n * ho * wo * cin * cout
    bytes_accessed = 4 * (x_ph.size + p["w1"].size + p["w2"].size
                          + n * ho * wo * cout + 4 * cout)

    kernel = _make_residual_kernel(stride, ho, wo, cin, cout, use_1x1conv)
    out = pl.pallas_call(
        kernel,
        out_shape=jax.ShapeDtypeStruct((n, ho, wo, cout), x.dtype),
        grid_spec=pltpu.PrefetchScalarGridSpec(
            num_scalar_prefetch=0,
            grid=(n,),
            in_specs=in_specs,
            out_specs=pl.BlockSpec((1, ho, wo, cout), lambda i: (i, 0, 0, 0)),
            scratch_shapes=[pltpu.VMEM((ho + 2, wo + 2, cout), jnp.float32)],
        ),
        compiler_params=pltpu.CompilerParams(
            dimension_semantics=("parallel",),
        ),
        cost_estimate=pl.CostEstimate(
            flops=flops, transcendentals=0, bytes_accessed=bytes_accessed),
    )(*args)
    return out


def res_block_forward(x_nchw, block_cfgs, block_params):
    """ResBlock.forward: NCHW in -> NCHW out (layout plumbing around NHWC kernels)."""
    x = jnp.transpose(x_nchw, (0, 2, 3, 1))
    for cfg, p in zip(block_cfgs, block_params):
        x = residual_forward(x, cfg, p)
    return jnp.transpose(x, (0, 3, 1, 2))


# -------------------------- parameters & pure-JAX reference --------------------------

def init_residual_params(key, cin, cout, use_1x1conv):
    ks = jax.random.split(key, 16)

    def conv_w(k, kh, kw, ci, co):
        return (jax.random.normal(k, (kh, kw, ci, co), jnp.float32)
                / jnp.sqrt(kh * kw * ci))

    p = {
        "w1": conv_w(ks[0], 3, 3, cin, cout),
        "b1": 0.1 * jax.random.normal(ks[1], (cout,), jnp.float32),
        "gamma1": 1.0 + 0.1 * jax.random.normal(ks[2], (cout,), jnp.float32),
        "beta1": 0.1 * jax.random.normal(ks[3], (cout,), jnp.float32),
        "mean1": 0.1 * jax.random.normal(ks[4], (cout,), jnp.float32),
        "var1": 1.0 + 0.2 * jax.random.uniform(ks[5], (cout,), jnp.float32),
        "w2": conv_w(ks[6], 3, 3, cout, cout),
        "b2": 0.1 * jax.random.normal(ks[7], (cout,), jnp.float32),
        "gamma2": 1.0 + 0.1 * jax.random.normal(ks[8], (cout,), jnp.float32),
        "beta2": 0.1 * jax.random.normal(ks[9], (cout,), jnp.float32),
        "mean2": 0.1 * jax.random.normal(ks[10], (cout,), jnp.float32),
        "var2": 1.0 + 0.2 * jax.random.uniform(ks[11], (cout,), jnp.float32),
    }
    if use_1x1conv:
        p["w11"] = (jax.random.normal(ks[12], (cin, cout), jnp.float32)
                    / jnp.sqrt(cin))
        p["b11"] = 0.1 * jax.random.normal(ks[13], (cout,), jnp.float32)
    return p


def _ref_residual(x, cfg, p):
    s = cfg["stride"]

    def conv3x3(v, w, b, stride):
        y = jax.lax.conv_general_dilated(
            v, w, (stride, stride), ((1, 1), (1, 1)),
            dimension_numbers=("NHWC", "HWIO", "NHWC"),
            precision=jax.lax.Precision.HIGHEST)
        return y + b

    def bn(v, g, be, m, var):
        return (v - m) * (g / jnp.sqrt(var + _BN_EPS)) + be

    y = jax.nn.relu(bn(conv3x3(x, p["w1"], p["b1"], s),
                       p["gamma1"], p["beta1"], p["mean1"], p["var1"]))
    y = jax.nn.relu(bn(conv3x3(y, p["w2"], p["b2"], 1),
                       p["gamma2"], p["beta2"], p["mean2"], p["var2"]))
    if cfg["use_1x1conv"]:
        w11 = p["w11"].reshape(1, 1, *p["w11"].shape)
        sc = jax.lax.conv_general_dilated(
            x, w11, (s, s), "VALID",
            dimension_numbers=("NHWC", "HWIO", "NHWC"),
            precision=jax.lax.Precision.HIGHEST) + p["b11"]
    else:
        sc = x
    return y + sc


def _ref_res_block(x_nchw, block_cfgs, block_params):
    x = jnp.transpose(x_nchw, (0, 2, 3, 1))
    for cfg, p in zip(block_cfgs, block_params):
        x = _ref_residual(x, cfg, p)
    return jnp.transpose(x, (0, 3, 1, 2))


if __name__ == "__main__":
    key = jax.random.PRNGKey(0)
    kx, kp = jax.random.split(key)

    # ResBlock(in_channel=4, out_channel=8, num_block=2, first_block=False)
    in_channel, out_channel, num_block = 4, 8, 2
    x = jax.random.normal(kx, (2, in_channel, 16, 16), dtype=jnp.float32)

    block_cfgs, block_params = [], []
    pkeys = jax.random.split(kp, num_block)
    for i in range(1, num_block + 1):
        if i == 1:  # first_block=False -> downsampling residual with 1x1 shortcut
            block_cfgs.append({"stride": 2, "use_1x1conv": True})
            block_params.append(
                init_residual_params(pkeys[i - 1], in_channel, out_channel, True))
        else:
            block_cfgs.append({"stride": 1, "use_1x1conv": False})
            block_params.append(
                init_residual_params(pkeys[i - 1], out_channel, out_channel, False))

    out = res_block_forward(x, block_cfgs, block_params)
    out = jax.block_until_ready(out)

    ref = _ref_res_block(x, block_cfgs, block_params)
    assert out.shape == (2, out_channel, 8, 8), out.shape
    err = float(jnp.max(jnp.abs(out - ref)))
    assert jnp.allclose(out, ref, atol=1e-3, rtol=1e-3), f"max |err| = {err}"

    print("KERNEL_OK")
</pallas_src>

<mosaic_0001>
module attributes {stable_mosaic.version = 11 : i64} {
  func.func @kernel(%arg0: i32, %arg1: memref<1x4x9x9x4xf32, #tpu.memory_space<vmem>>, %arg2: memref<3x3x4x8xf32, #tpu.memory_space<vmem>>, %arg3: memref<1x8xf32, #tpu.memory_space<vmem>>, %arg4: memref<1x8xf32, #tpu.memory_space<vmem>>, %arg5: memref<3x3x8x8xf32, #tpu.memory_space<vmem>>, %arg6: memref<1x8xf32, #tpu.memory_space<vmem>>, %arg7: memref<1x8xf32, #tpu.memory_space<vmem>>, %arg8: memref<4x8xf32, #tpu.memory_space<vmem>>, %arg9: memref<1x8xf32, #tpu.memory_space<vmem>>, %arg10: memref<1x8x8x8xf32, #tpu.memory_space<vmem>>, %arg11: memref<10x10x8xf32, #tpu.memory_space<vmem>>) attributes {dimension_semantics = [#tpu.dimension_semantics<parallel>], iteration_bounds = array<i64: 2>, scalar_prefetch = 0 : i64, scratch_operands = 1 : i64, tpu.core_type = #tpu.core_type<tc>, window_params = [{transform_indices = @transform_0, window_bounds = array<i64: 1, 4, 9, 9, 4>}, {pipeline_mode = #tpu.pipeline_mode<synchronous>, transform_indices = @transform_1, window_bounds = array<i64: 3, 3, 4, 8>}, {pipeline_mode = #tpu.pipeline_mode<synchronous>, transform_indices = @transform_2, window_bounds = array<i64: 1, 8>}, {pipeline_mode = #tpu.pipeline_mode<synchronous>, transform_indices = @transform_3, window_bounds = array<i64: 1, 8>}, {pipeline_mode = #tpu.pipeline_mode<synchronous>, transform_indices = @transform_4, window_bounds = array<i64: 3, 3, 8, 8>}, {pipeline_mode = #tpu.pipeline_mode<synchronous>, transform_indices = @transform_5, window_bounds = array<i64: 1, 8>}, {pipeline_mode = #tpu.pipeline_mode<synchronous>, transform_indices = @transform_6, window_bounds = array<i64: 1, 8>}, {pipeline_mode = #tpu.pipeline_mode<synchronous>, transform_indices = @transform_7, window_bounds = array<i64: 4, 8>}, {pipeline_mode = #tpu.pipeline_mode<synchronous>, transform_indices = @transform_8, window_bounds = array<i64: 1, 8>}, {transform_indices = @transform_9, window_bounds = array<i64: 1, 8, 8, 8>}]} {
    %c0 = arith.constant 0 : index
    %c0_0 = arith.constant 0 : index
    %c0_1 = arith.constant 0 : index
    %c0_2 = arith.constant 0 : index
    %c0_3 = arith.constant 0 : index
    %0 = vector.load %arg1[%c0, %c0_0, %c0_1, %c0_2, %c0_3] : memref<1x4x9x9x4xf32, #tpu.memory_space<vmem>>, vector<1x1x9x9x4xf32>
    %1 = vector.shape_cast %0 : vector<1x1x9x9x4xf32> to vector<9x9x4xf32>
    %c0_4 = arith.constant 0 : index
    %c1 = arith.constant 1 : index
    %c0_5 = arith.constant 0 : index
    %c0_6 = arith.constant 0 : index
    %c0_7 = arith.constant 0 : index
    %2 = vector.load %arg1[%c0_4, %c1, %c0_5, %c0_6, %c0_7] : memref<1x4x9x9x4xf32, #tpu.memory_space<vmem>>, vector<1x1x9x9x4xf32>
    %3 = vector.shape_cast %2 : vector<1x1x9x9x4xf32> to vector<9x9x4xf32>
    %c0_8 = arith.constant 0 : index
    %c2 = arith.constant 2 : index
    %c0_9 = arith.constant 0 : index
    %c0_10 = arith.constant 0 : index
    %c0_11 = arith.constant 0 : index
    %4 = vector.load %arg1[%c0_8, %c2, %c0_9, %c0_10, %c0_11] : memref<1x4x9x9x4xf32, #tpu.memory_space<vmem>>, vector<1x1x9x9x4xf32>
    %5 = vector.shape_cast %4 : vector<1x1x9x9x4xf32> to vector<9x9x4xf32>
    %c0_12 = arith.constant 0 : index
    %c3 = arith.constant 3 : index
    %c0_13 = arith.constant 0 : index
    %c0_14 = arith.constant 0 : index
    %c0_15 = arith.constant 0 : index
    %6 = vector.load %arg1[%c0_12, %c3, %c0_13, %c0_14, %c0_15] : memref<1x4x9x9x4xf32, #tpu.memory_space<vmem>>, vector<1x1x9x9x4xf32>
    %7 = vector.shape_cast %6 : vector<1x1x9x9x4xf32> to vector<9x9x4xf32>
    %cst = arith.constant 0.000000e+00 : f32
    %8 = vector.broadcast %cst : f32 to vector<64x8xf32>
    %9 = vector.extract_strided_slice %1 {offsets = [0, 0, 0], sizes = [8, 8, 4], strides = [1, 1, 1]} : vector<9x9x4xf32> to vector<8x8x4xf32>
    %10 = vector.shape_cast %9 : vector<8x8x4xf32> to vector<64x4xf32>
    %c0_16 = arith.constant 0 : index
    %c0_17 = arith.constant 0 : index
    %c0_18 = arith.constant 0 : index
    %c0_19 = arith.constant 0 : index
    %11 = vector.load %arg2[%c0_16, %c0_17, %c0_18, %c0_19] : memref<3x3x4x8xf32, #tpu.memory_space<vmem>>, vector<1x1x4x8xf32>
    %12 = vector.shape_cast %11 : vector<1x1x4x8xf32> to vector<4x8xf32>
    %cst_20 = arith.constant dense<0.000000e+00> : vector<64x8xf32>
    %13 = tpu.matmul %10, %12, %cst_20 {dimension_numbers = #tpu.dot_dimension_numbers<[1], [0], [0], [1], [0, 0, 1, 1], [], []>, precision = #tpu.contract_precision<fp32>} : vector<64x4xf32>, vector<4x8xf32>, vector<64x8xf32> -> vector<64x8xf32>
    %14 = arith.addf %8, %13 : vector<64x8xf32>
    %15 = vector.extract_strided_slice %3 {offsets = [0, 0, 0], sizes = [8, 8, 4], strides = [1, 1, 1]} : vector<9x9x4xf32> to vector<8x8x4xf32>
    %16 = vector.shape_cast %15 : vector<8x8x4xf32> to vector<64x4xf32>
    %c0_21 = arith.constant 0 : index
    %c1_22 = arith.constant 1 : index
    %c0_23 = arith.constant 0 : index
    %c0_24 = arith.constant 0 : index
    %17 = vector.load %arg2[%c0_21, %c1_22, %c0_23, %c0_24] : memref<3x3x4x8xf32, #tpu.memory_space<vmem>>, vector<1x1x4x8xf32>
    %18 = vector.shape_cast %17 : vector<1x1x4x8xf32> to vector<4x8xf32>
    %cst_25 = arith.constant dense<0.000000e+00> : vector<64x8xf32>
    %19 = tpu.matmul %16, %18, %cst_25 {dimension_numbers = #tpu.dot_dimension_numbers<[1], [0], [0], [1], [0, 0, 1, 1], [], []>, precision = #tpu.contract_precision<fp32>} : vector<64x4xf32>, vector<4x8xf32>, vector<64x8xf32> -> vector<64x8xf32>
    %20 = arith.addf %14, %19 : vector<64x8xf32>
    %21 = vector.extract_strided_slice %1 {offsets = [0, 1, 0], sizes = [8, 8, 4], strides = [1, 1, 1]} : vector<9x9x4xf32> to vector<8x8x4xf32>
    %22 = vector.shape_cast %21 : vector<8x8x4xf32> to vector<64x4xf32>
    %c0_26 = arith.constant 0 : index
    %c2_27 = arith.constant 2 : index
    %c0_28 = arith.constant 0 : index
    %c0_29 = arith.constant 0 : index
    %23 = vector.load %arg2[%c0_26, %c2_27, %c0_28, %c0_29] : memref<3x3x4x8xf32, #tpu.memory_space<vmem>>, vector<1x1x4x8xf32>
    %24 = vector.shape_cast %23 : vector<1x1x4x8xf32> to vector<4x8xf32>
    %cst_30 = arith.constant dense<0.000000e+00> : vector<64x8xf32>
    %25 = tpu.matmul %22, %24, %cst_30 {dimension_numbers = #tpu.dot_dimension_numbers<[1], [0], [0], [1], [0, 0, 1, 1], [], []>, precision = #tpu.contract_precision<fp32>} : vector<64x4xf32>, vector<4x8xf32>, vector<64x8xf32> -> vector<64x8xf32>
    %26 = arith.addf %20, %25 : vector<64x8xf32>
    %27 = vector.extract_strided_slice %5 {offsets = [0, 0, 0], sizes = [8, 8, 4], strides = [1, 1, 1]} : vector<9x9x4xf32> to vector<8x8x4xf32>
    %28 = vector.shape_cast %27 : vector<8x8x4xf32> to vector<64x4xf32>
    %c1_31 = arith.constant 1 : index
    %c0_32 = arith.constant 0 : index
    %c0_33 = arith.constant 0 : index
    %c0_34 = arith.constant 0 : index
    %29 = vector.load %arg2[%c1_31, %c0_32, %c0_33, %c0_34] : memref<3x3x4x8xf32, #tpu.memory_space<vmem>>, vector<1x1x4x8xf32>
    %30 = vector.shape_cast %29 : vector<1x1x4x8xf32> to vector<4x8xf32>
    %cst_35 = arith.constant dense<0.000000e+00> : vector<64x8xf32>
    %31 = tpu.matmul %28, %30, %cst_35 {dimension_numbers = #tpu.dot_dimension_numbers<[1], [0], [0], [1], [0, 0, 1, 1], [], []>, precision = #tpu.contract_precision<fp32>} : vector<64x4xf32>, vector<4x8xf32>, vector<64x8xf32> -> vector<64x8xf32>
    %32 = arith.addf %26, %31 : vector<64x8xf32>
    %33 = vector.extract_strided_slice %7 {offsets = [0, 0, 0], sizes = [8, 8, 4], strides = [1, 1, 1]} : vector<9x9x4xf32> to vector<8x8x4xf32>
    %34 = vector.shape_cast %33 : vector<8x8x4xf32> to vector<64x4xf32>
    %c1_36 = arith.constant 1 : index
    %c1_37 = arith.constant 1 : index
    %c0_38 = arith.constant 0 : index
    %c0_39 = arith.constant 0 : index
    %35 = vector.load %arg2[%c1_36, %c1_37, %c0_38, %c0_39] : memref<3x3x4x8xf32, #tpu.memory_space<vmem>>, vector<1x1x4x8xf32>
    %36 = vector.shape_cast %35 : vector<1x1x4x8xf32> to vector<4x8xf32>
    %cst_40 = arith.constant dense<0.000000e+00> : vector<64x8xf32>
    %37 = tpu.matmul %34, %36, %cst_40 {dimension_numbers = #tpu.dot_dimension_numbers<[1], [0], [0], [1], [0, 0, 1, 1], [], []>, precision = #tpu.contract_precision<fp32>} : vector<64x4xf32>, vector<4x8xf32>, vector<64x8xf32> -> vector<64x8xf32>
    %38 = arith.addf %32, %37 : vector<64x8xf32>
    %39 = vector.extract_strided_slice %5 {offsets = [0, 1, 0], sizes = [8, 8, 4], strides = [1, 1, 1]} : vector<9x9x4xf32> to vector<8x8x4xf32>
    %40 = vector.shape_cast %39 : vector<8x8x4xf32> to vector<64x4xf32>
    %c1_41 = arith.constant 1 : index
    %c2_42 = arith.constant 2 : index
    %c0_43 = arith.constant 0 : index
    %c0_44 = arith.constant 0 : index
    %41 = vector.load %arg2[%c1_41, %c2_42, %c0_43, %c0_44] : memref<3x3x4x8xf32, #tpu.memory_space<vmem>>, vector<1x1x4x8xf32>
    %42 = vector.shape_cast %41 : vector<1x1x4x8xf32> to vector<4x8xf32>
    %cst_45 = arith.constant dense<0.000000e+00> : vector<64x8xf32>
    %43 = tpu.matmul %40, %42, %cst_45 {dimension_numbers = #tpu.dot_dimension_numbers<[1], [0], [0], [1], [0, 0, 1, 1], [], []>, precision = #tpu.contract_precision<fp32>} : vector<64x4xf32>, vector<4x8xf32>, vector<64x8xf32> -> vector<64x8xf32>
    %44 = arith.addf %38, %43 : vector<64x8xf32>
    %45 = vector.extract_strided_slice %1 {offsets = [1, 0, 0], sizes = [8, 8, 4], strides = [1, 1, 1]} : vector<9x9x4xf32> to vector<8x8x4xf32>
    %46 = vector.shape_cast %45 : vector<8x8x4xf32> to vector<64x4xf32>
    %c2_46 = arith.constant 2 : index
    %c0_47 = arith.constant 0 : index
    %c0_48 = arith.constant 0 : index
    %c0_49 = arith.constant 0 : index
    %47 = vector.load %arg2[%c2_46, %c0_47, %c0_48, %c0_49] : memref<3x3x4x8xf32, #tpu.memory_space<vmem>>, vector<1x1x4x8xf32>
    %48 = vector.shape_cast %47 : vector<1x1x4x8xf32> to vector<4x8xf32>
    %cst_50 = arith.constant dense<0.000000e+00> : vector<64x8xf32>
    %49 = tpu.matmul %46, %48, %cst_50 {dimension_numbers = #tpu.dot_dimension_numbers<[1], [0], [0], [1], [0, 0, 1, 1], [], []>, precision = #tpu.contract_precision<fp32>} : vector<64x4xf32>, vector<4x8xf32>, vector<64x8xf32> -> vector<64x8xf32>
    %50 = arith.addf %44, %49 : vector<64x8xf32>
    %51 = vector.extract_strided_slice %3 {offsets = [1, 0, 0], sizes = [8, 8, 4], strides = [1, 1, 1]} : vector<9x9x4xf32> to vector<8x8x4xf32>
    %52 = vector.shape_cast %51 : vector<8x8x4xf32> to vector<64x4xf32>
    %c2_51 = arith.constant 2 : index
    %c1_52 = arith.constant 1 : index
    %c0_53 = arith.constant 0 : index
    %c0_54 = arith.constant 0 : index
    %53 = vector.load %arg2[%c2_51, %c1_52, %c0_53, %c0_54] : memref<3x3x4x8xf32, #tpu.memory_space<vmem>>, vector<1x1x4x8xf32>
    %54 = vector.shape_cast %53 : vector<1x1x4x8xf32> to vector<4x8xf32>
    %cst_55 = arith.constant dense<0.000000e+00> : vector<64x8xf32>
    %55 = tpu.matmul %52, %54, %cst_55 {dimension_numbers = #tpu.dot_dimension_numbers<[1], [0], [0], [1], [0, 0, 1, 1], [], []>, precision = #tpu.contract_precision<fp32>} : vector<64x4xf32>, vector<4x8xf32>, vector<64x8xf32> -> vector<64x8xf32>
    %56 = arith.addf %50, %55 : vector<64x8xf32>
    %57 = vector.extract_strided_slice %1 {offsets = [1, 1, 0], sizes = [8, 8, 4], strides = [1, 1, 1]} : vector<9x9x4xf32> to vector<8x8x4xf32>
    %58 = vector.shape_cast %57 : vector<8x8x4xf32> to vector<64x4xf32>
    %c2_56 = arith.constant 2 : index
    %c2_57 = arith.constant 2 : index
    %c0_58 = arith.constant 0 : index
    %c0_59 = arith.constant 0 : index
    %59 = vector.load %arg2[%c2_56, %c2_57, %c0_58, %c0_59] : memref<3x3x4x8xf32, #tpu.memory_space<vmem>>, vector<1x1x4x8xf32>
    %60 = vector.shape_cast %59 : vector<1x1x4x8xf32> to vector<4x8xf32>
    %cst_60 = arith.constant dense<0.000000e+00> : vector<64x8xf32>
    %61 = tpu.matmul %58, %60, %cst_60 {dimension_numbers = #tpu.dot_dimension_numbers<[1], [0], [0], [1], [0, 0, 1, 1], [], []>, precision = #tpu.contract_precision<fp32>} : vector<64x4xf32>, vector<4x8xf32>, vector<64x8xf32> -> vector<64x8xf32>
    %62 = arith.addf %56, %61 : vector<64x8xf32>
    %c0_61 = arith.constant 0 : index
    %c0_62 = arith.constant 0 : index
    %63 = vector.load %arg3[%c0_61, %c0_62] : memref<1x8xf32, #tpu.memory_space<vmem>>, vector<1x8xf32>
    %64 = vector.broadcast %63 : vector<1x8xf32> to vector<64x8xf32>
    %65 = arith.mulf %62, %64 : vector<64x8xf32>
    %c0_63 = arith.constant 0 : index
    %c0_64 = arith.constant 0 : index
    %66 = vector.load %arg4[%c0_63, %c0_64] : memref<1x8xf32, #tpu.memory_space<vmem>>, vector<1x8xf32>
    %67 = vector.broadcast %66 : vector<1x8xf32> to vector<64x8xf32>
    %68 = arith.addf %65, %67 : vector<64x8xf32>
    %cst_65 = arith.constant 0.000000e+00 : f32
    %69 = vector.broadcast %cst_65 : f32 to vector<64x8xf32>
    %70 = arith.maximumf %68, %69 : vector<64x8xf32>
    %cst_66 = arith.constant 0.000000e+00 : f32
    %71 = vector.broadcast %cst_66 : f32 to vector<10x10x8xf32>
    %c0_67 = arith.constant 0 : index
    %c0_68 = arith.constant 0 : index
    %c0_69 = arith.constant 0 : index
    %72 = vector.load %arg11[%c0_67, %c0_68, %c0_69] : memref<10x10x8xf32, #tpu.memory_space<vmem>>, vector<10x10x8xf32>
    tpu.vector_store %arg11[%c0_67, %c0_68, %c0_69], %71 {strides = array<i32>} : memref<10x10x8xf32, #tpu.memory_space<vmem>>, vector<10x10x8xf32>,
    %73 = vector.shape_cast %70 : vector<64x8xf32> to vector<8x8x8xf32>
    %c1_70 = arith.constant 1 : index
    %c1_71 = arith.constant 1 : index
    %c0_72 = arith.constant 0 : index
    %74 = vector.load %arg11[%c1_70, %c1_71, %c0_72] : memref<10x10x8xf32, #tpu.memory_space<vmem>>, vector<8x8x8xf32>
    tpu.vector_store %arg11[%c1_70, %c1_71, %c0_72], %73 {strides = array<i32>} : memref<10x10x8xf32, #tpu.memory_space<vmem>>, vector<8x8x8xf32>,
    %cst_73 = arith.constant 0.000000e+00 : f32
    %75 = vector.broadcast %cst_73 : f32 to vector<64x8xf32>
    %c0_74 = arith.constant 0 : index
    %c0_75 = arith.constant 0 : index
    %c0_76 = arith.constant 0 : index
    %76 = vector.load %arg11[%c0_74, %c0_75, %c0_76] : memref<10x10x8xf32, #tpu.memory_space<vmem>>, vector<8x8x8xf32>
    %77 = vector.shape_cast %76 : vector<8x8x8xf32> to vector<64x8xf32>
    %c0_77 = arith.constant 0 : index
    %c0_78 = arith.constant 0 : index
    %c0_79 = arith.constant 0 : index
    %c0_80 = arith.constant 0 : index
    %78 = vector.load %arg5[%c0_77, %c0_78, %c0_79, %c0_80] : memref<3x3x8x8xf32, #tpu.memory_space<vmem>>, vector<1x1x8x8xf32>
    %79 = vector.shape_cast %78 : vector<1x1x8x8xf32> to vector<8x8xf32>
    %cst_81 = arith.constant dense<0.000000e+00> : vector<64x8xf32>
    %80 = tpu.matmul %77, %79, %cst_81 {dimension_numbers = #tpu.dot_dimension_numbers<[1], [0], [0], [1], [0, 0, 1, 1], [], []>, precision = #tpu.contract_precision<fp32>} : vector<64x8xf32>, vector<8x8xf32>, vector<64x8xf32> -> vector<64x8xf32>
    %81 = arith.addf %75, %80 : vector<64x8xf32>
    %c0_82 = arith.constant 0 : index
    %c1_83 = arith.constant 1 : index
    %c0_84 = arith.constant 0 : index
    %82 = vector.load %arg11[%c0_82, %c1_83, %c0_84] : memref<10x10x8xf32, #tpu.memory_space<vmem>>, vector<8x8x8xf32>
    %83 = vector.shape_cast %82 : vector<8x8x8xf32> to vector<64x8xf32>
    %c0_85 = arith.constant 0 : index
    %c1_86 = arith.constant 1 : index
    %c0_87 = arith.constant 0 : index
    %c0_88 = arith.constant 0 : index
    %84 = vector.load %arg5[%c0_85, %c1_86, %c0_87, %c0_88] : memref<3x3x8x8xf32, #tpu.memory_space<vmem>>, vector<1x1x8x8xf32>
    %85 = vector.shape_cast %84 : vector<1x1x8x8xf32> to vector<8x8xf32>
    %cst_89 = arith.constant dense<0.000000e+00> : vector<64x8xf32>
    %86 = tpu.matmul %83, %85, %cst_89 {dimension_numbers = #tpu.dot_dimension_numbers<[1], [0], [0], [1], [0, 0, 1, 1], [], []>, precision = #tpu.contract_precision<fp32>} : vector<64x8xf32>, vector<8x8xf32>, vector<64x8xf32> -> vector<64x8xf32>
    %87 = arith.addf %81, %86 : vector<64x8xf32>
    %c0_90 = arith.constant 0 : index
    %c2_91 = arith.constant 2 : index
    %c0_92 = arith.constant 0 : index
    %88 = vector.load %arg11[%c0_90, %c2_91, %c0_92] : memref<10x10x8xf32, #tpu.memory_space<vmem>>, vector<8x8x8xf32>
    %89 = vector.shape_cast %88 : vector<8x8x8xf32> to vector<64x8xf32>
    %c0_93 = arith.constant 0 : index
    %c2_94 = arith.constant 2 : index
    %c0_95 = arith.constant 0 : index
    %c0_96 = arith.constant 0 : index
    %90 = vector.load %arg5[%c0_93, %c2_94, %c0_95, %c0_96] : memref<3x3x8x8xf32, #tpu.memory_space<vmem>>, vector<1x1x8x8xf32>
    %91 = vector.shape_cast %90 : vector<1x1x8x8xf32> to vector<8x8xf32>
    %cst_97 = arith.constant dense<0.000000e+00> : vector<64x8xf32>
    %92 = tpu.matmul %89, %91, %cst_97 {dimension_numbers = #tpu.dot_dimension_numbers<[1], [0], [0], [1], [0, 0, 1, 1], [], []>, precision = #tpu.contract_precision<fp32>} : vector<64x8xf32>, vector<8x8xf32>, vector<64x8xf32> -> vector<64x8xf32>
    %93 = arith.addf %87, %92 : vector<64x8xf32>
    %c1_98 = arith.constant 1 : index
    %c0_99 = arith.constant 0 : index
    %c0_100 = arith.constant 0 : index
    %94 = vector.load %arg11[%c1_98, %c0_99, %c0_100] : memref<10x10x8xf32, #tpu.memory_space<vmem>>, vector<8x8x8xf32>
    %95 = vector.shape_cast %94 : vector<8x8x8xf32> to vector<64x8xf32>
    %c1_101 = arith.constant 1 : index
    %c0_102 = arith.constant 0 : index
    %c0_103 = arith.constant 0 : index
    %c0_104 = arith.constant 0 : index
    %96 = vector.load %arg5[%c1_101, %c0_102, %c0_103, %c0_104] : memref<3x3x8x8xf32, #tpu.memory_space<vmem>>, vector<1x1x8x8xf32>
    %97 = vector.shape_cast %96 : vector<1x1x8x8xf32> to vector<8x8xf32>
    %cst_105 = arith.constant dense<0.000000e+00> : vector<64x8xf32>
    %98 = tpu.matmul %95, %97, %cst_105 {dimension_numbers = #tpu.dot_dimension_numbers<[1], [0], [0], [1], [0, 0, 1, 1], [], []>, precision = #tpu.contract_precision<fp32>} : vector<64x8xf32>, vector<8x8xf32>, vector<64x8xf32> -> vector<64x8xf32>
    %99 = arith.addf %93, %98 : vector<64x8xf32>
    %c1_106 = arith.constant 1 : index
    %c1_107 = arith.constant 1 : index
    %c0_108 = arith.constant 0 : index
    %100 = vector.load %arg11[%c1_106, %c1_107, %c0_108] : memref<10x10x8xf32, #tpu.memory_space<vmem>>, vector<8x8x8xf32>
    %101 = vector.shape_cast %100 : vector<8x8x8xf32> to vector<64x8xf32>
    %c1_109 = arith.constant 1 : index
    %c1_110 = arith.constant 1 : index
    %c0_111 = arith.constant 0 : index
    %c0_112 = arith.constant 0 : index
    %102 = vector.load %arg5[%c1_109, %c1_110, %c0_111, %c0_112] : memref<3x3x8x8xf32, #tpu.memory_space<vmem>>, vector<1x1x8x8xf32>
    %103 = vector.shape_cast %102 : vector<1x1x8x8xf32> to vector<8x8xf32>
    %cst_113 = arith.constant dense<0.000000e+00> : vector<64x8xf32>
    %104 = tpu.matmul %101, %103, %cst_113 {dimension_numbers = #tpu.dot_dimension_numbers<[1], [0], [0], [1], [0, 0, 1, 1], [], []>, precision = #tpu.contract_precision<fp32>} : vector<64x8xf32>, vector<8x8xf32>, vector<64x8xf32> -> vector<64x8xf32>
    %105 = arith.addf %99, %104 : vector<64x8xf32>
    %c1_114 = arith.constant 1 : index
    %c2_115 = arith.constant 2 : index
    %c0_116 = arith.constant 0 : index
    %106 = vector.load %arg11[%c1_114, %c2_115, %c0_116] : memref<10x10x8xf32, #tpu.memory_space<vmem>>, vector<8x8x8xf32>
    %107 = vector.shape_cast %106 : vector<8x8x8xf32> to vector<64x8xf32>
    %c1_117 = arith.constant 1 : index
    %c2_118 = arith.constant 2 : index
    %c0_119 = arith.constant 0 : index
    %c0_120 = arith.constant 0 : index
    %108 = vector.load %arg5[%c1_117, %c2_118, %c0_119, %c0_120] : memref<3x3x8x8xf32, #tpu.memory_space<vmem>>, vector<1x1x8x8xf32>
    %109 = vector.shape_cast %108 : vector<1x1x8x8xf32> to vector<8x8xf32>
    %cst_121 = arith.constant dense<0.000000e+00> : vector<64x8xf32>
    %110 = tpu.matmul %107, %109, %cst_121 {dimension_numbers = #tpu.dot_dimension_numbers<[1], [0], [0], [1], [0, 0, 1, 1], [], []>, precision = #tpu.contract_precision<fp32>} : vector<64x8xf32>, vector<8x8xf32>, vector<64x8xf32> -> vector<64x8xf32>
    %111 = arith.addf %105, %110 : vector<64x8xf32>
    %c2_122 = arith.constant 2 : index
    %c0_123 = arith.constant 0 : index
    %c0_124 = arith.constant 0 : index
    %112 = vector.load %arg11[%c2_122, %c0_123, %c0_124] : memref<10x10x8xf32, #tpu.memory_space<vmem>>, vector<8x8x8xf32>
    %113 = vector.shape_cast %112 : vector<8x8x8xf32> to vector<64x8xf32>
    %c2_125 = arith.constant 2 : index
    %c0_126 = arith.constant 0 : index
    %c0_127 = arith.constant 0 : index
    %c0_128 = arith.constant 0 : index
    %114 = vector.load %arg5[%c2_125, %c0_126, %c0_127, %c0_128] : memref<3x3x8x8xf32, #tpu.memory_space<vmem>>, vector<1x1x8x8xf32>
    %115 = vector.shape_cast %114 : vector<1x1x8x8xf32> to vector<8x8xf32>
    %cst_129 = arith.constant dense<0.000000e+00> : vector<64x8xf32>
    %116 = tpu.matmul %113, %115, %cst_129 {dimension_numbers = #tpu.dot_dimension_numbers<[1], [0], [0], [1], [0, 0, 1, 1], [], []>, precision = #tpu.contract_precision<fp32>} : vector<64x8xf32>, vector<8x8xf32>, vector<64x8xf32> -> vector<64x8xf32>
    %117 = arith.addf %111, %116 : vector<64x8xf32>
    %c2_130 = arith.constant 2 : index
    %c1_131 = arith.constant 1 : index
    %c0_132 = arith.constant 0 : index
    %118 = vector.load %arg11[%c2_130, %c1_131, %c0_132] : memref<10x10x8xf32, #tpu.memory_space<vmem>>, vector<8x8x8xf32>
    %119 = vector.shape_cast %118 : vector<8x8x8xf32> to vector<64x8xf32>
    %c2_133 = arith.constant 2 : index
    %c1_134 = arith.constant 1 : index
    %c0_135 = arith.constant 0 : index
    %c0_136 = arith.constant 0 : index
    %120 = vector.load %arg5[%c2_133, %c1_134, %c0_135, %c0_136] : memref<3x3x8x8xf32, #tpu.memory_space<vmem>>, vector<1x1x8x8xf32>
    %121 = vector.shape_cast %120 : vector<1x1x8x8xf32> to vector<8x8xf32>
    %cst_137 = arith.constant dense<0.000000e+00> : vector<64x8xf32>
    %122 = tpu.matmul %119, %121, %cst_137 {dimension_numbers = #tpu.dot_dimension_numbers<[1], [0], [0], [1], [0, 0, 1, 1], [], []>, precision = #tpu.contract_precision<fp32>} : vector<64x8xf32>, vector<8x8xf32>, vector<64x8xf32> -> vector<64x8xf32>
    %123 = arith.addf %117, %122 : vector<64x8xf32>
    %c2_138 = arith.constant 2 : index
    %c2_139 = arith.constant 2 : index
    %c0_140 = arith.constant 0 : index
    %124 = vector.load %arg11[%c2_138, %c2_139, %c0_140] : memref<10x10x8xf32, #tpu.memory_space<vmem>>, vector<8x8x8xf32>
    %125 = vector.shape_cast %124 : vector<8x8x8xf32> to vector<64x8xf32>
    %c2_141 = arith.constant 2 : index
    %c2_142 = arith.constant 2 : index
    %c0_143 = arith.constant 0 : index
    %c0_144 = arith.constant 0 : index
    %126 = vector.load %arg5[%c2_141, %c2_142, %c0_143, %c0_144] : memref<3x3x8x8xf32, #tpu.memory_space<vmem>>, vector<1x1x8x8xf32>
    %127 = vector.shape_cast %126 : vector<1x1x8x8xf32> to vector<8x8xf32>
    %cst_145 = arith.constant dense<0.000000e+00> : vector<64x8xf32>
    %128 = tpu.matmul %125, %127, %cst_145 {dimension_numbers = #tpu.dot_dimension_numbers<[1], [0], [0], [1], [0, 0, 1, 1], [], []>, precision = #tpu.contract_precision<fp32>} : vector<64x8xf32>, vector<8x8xf32>, vector<64x8xf32> -> vector<64x8xf32>
    %129 = arith.addf %123, %128 : vector<64x8xf32>
    %c0_146 = arith.constant 0 : index
    %c0_147 = arith.constant 0 : index
    %130 = vector.load %arg6[%c0_146, %c0_147] : memref<1x8xf32, #tpu.memory_space<vmem>>, vector<1x8xf32>
    %131 = vector.broadcast %130 : vector<1x8xf32> to vector<64x8xf32>
    %132 = arith.mulf %129, %131 : vector<64x8xf32>
    %c0_148 = arith.constant 0 : index
    %c0_149 = arith.constant 0 : index
    %133 = vector.load %arg7[%c0_148, %c0_149] : memref<1x8xf32, #tpu.memory_space<vmem>>, vector<1x8xf32>
    %134 = vector.broadcast %133 : vector<1x8xf32> to vector<64x8xf32>
    %135 = arith.addf %132, %134 : vector<64x8xf32>
    %cst_150 = arith.constant 0.000000e+00 : f32
    %136 = vector.broadcast %cst_150 : f32 to vector<64x8xf32>
    %137 = arith.maximumf %135, %136 : vector<64x8xf32>
    %c0_151 = arith.constant 0 : index
    %c0_152 = arith.constant 0 : index
    %138 = vector.load %arg8[%c0_151, %c0_152] : memref<4x8xf32, #tpu.memory_space<vmem>>, vector<4x8xf32>
    %cst_153 = arith.constant dense<0.000000e+00> : vector<64x8xf32>
    %139 = tpu.matmul %34, %138, %cst_153 {dimension_numbers = #tpu.dot_dimension_numbers<[1], [0], [0], [1], [0, 0, 1, 1], [], []>, precision = #tpu.contract_precision<fp32>} : vector<64x4xf32>, vector<4x8xf32>, vector<64x8xf32> -> vector<64x8xf32>
    %c0_154 = arith.constant 0 : index
    %c0_155 = arith.constant 0 : index
    %140 = vector.load %arg9[%c0_154, %c0_155] : memref<1x8xf32, #tpu.memory_space<vmem>>, vector<1x8xf32>
    %141 = vector.broadcast %140 : vector<1x8xf32> to vector<64x8xf32>
    %142 = arith.addf %139, %141 : vector<64x8xf32>
    %143 = arith.addf %137, %142 : vector<64x8xf32>
    %144 = vector.shape_cast %143 : vector<64x8xf32> to vector<8x8x8xf32>
    %c0_156 = arith.constant 0 : index
    %c0_157 = arith.constant 0 : index
    %c0_158 = arith.constant 0 : index
    %c0_159 = arith.constant 0 : index
    %145 = vector.load %arg10[%c0_156, %c0_157, %c0_158, %c0_159] : memref<1x8x8x8xf32, #tpu.memory_space<vmem>>, vector<1x8x8x8xf32>
    %146 = vector.shape_cast %145 : vector<1x8x8x8xf32> to vector<8x8x8xf32>
    %147 = vector.shape_cast %144 : vector<8x8x8xf32> to vector<1x8x8x8xf32>
    tpu.vector_store %arg10[%c0_156, %c0_157, %c0_158, %c0_159], %147 {strides = array<i32>} : memref<1x8x8x8xf32, #tpu.memory_space<vmem>>, vector<1x8x8x8xf32>,
    return
  }
  func.func @transform_0(%arg0: i32) -> (i32, i32, i32, i32, i32) {
    %c0_i32 = arith.constant 0 : i32
    %c0_i32_0 = arith.constant 0 : i32
    %c0_i32_1 = arith.constant 0 : i32
    %c0_i32_2 = arith.constant 0 : i32
    %c0_i32_3 = arith.constant 0 : i32
    return %arg0, %c0_i32, %c0_i32_0, %c0_i32_1, %c0_i32_2 : i32, i32, i32, i32, i32
  }
  func.func @transform_1(%arg0: i32) -> (i32, i32, i32, i32) {
    %c0_i32 = arith.constant 0 : i32
    %c0_i32_0 = arith.constant 0 : i32
    %c0_i32_1 = arith.constant 0 : i32
    %c0_i32_2 = arith.constant 0 : i32
    %c0_i32_3 = arith.constant 0 : i32
    return %c0_i32, %c0_i32_0, %c0_i32_1, %c0_i32_2 : i32, i32, i32, i32
  }
  func.func @transform_2(%arg0: i32) -> (i32, i32) {
    %c0_i32 = arith.constant 0 : i32
    %c0_i32_0 = arith.constant 0 : i32
    %c0_i32_1 = arith.constant 0 : i32
    return %c0_i32, %c0_i32_0 : i32, i32
  }
  func.func @transform_3(%arg0: i32) -> (i32, i32) {
    %c0_i32 = arith.constant 0 : i32
    %c0_i32_0 = arith.constant 0 : i32
    %c0_i32_1 = arith.constant 0 : i32
    return %c0_i32, %c0_i32_0 : i32, i32
  }
  func.func @transform_4(%arg0: i32) -> (i32, i32, i32, i32) {
    %c0_i32 = arith.constant 0 : i32
    %c0_i32_0 = arith.constant 0 : i32
    %c0_i32_1 = arith.constant 0 : i32
    %c0_i32_2 = arith.constant 0 : i32
    %c0_i32_3 = arith.constant 0 : i32
    return %c0_i32, %c0_i32_0, %c0_i32_1, %c0_i32_2 : i32, i32, i32, i32
  }
  func.func @transform_5(%arg0: i32) -> (i32, i32) {
    %c0_i32 = arith.constant 0 : i32
    %c0_i32_0 = arith.constant 0 : i32
    %c0_i32_1 = arith.constant 0 : i32
    return %c0_i32, %c0_i32_0 : i32, i32
  }
  func.func @transform_6(%arg0: i32) -> (i32, i32) {
    %c0_i32 = arith.constant 0 : i32
    %c0_i32_0 = arith.constant 0 : i32
    %c0_i32_1 = arith.constant 0 : i32
    return %c0_i32, %c0_i32_0 : i32, i32
  }
  func.func @transform_7(%arg0: i32) -> (i32, i32) {
    %c0_i32 = arith.constant 0 : i32
    %c0_i32_0 = arith.constant 0 : i32
    %c0_i32_1 = arith.constant 0 : i32
    return %c0_i32, %c0_i32_0 : i32, i32
  }
  func.func @transform_8(%arg0: i32) -> (i32, i32) {
    %c0_i32 = arith.constant 0 : i32
    %c0_i32_0 = arith.constant 0 : i32
    %c0_i32_1 = arith.constant 0 : i32
    return %c0_i32, %c0_i32_0 : i32, i32
  }
  func.func @transform_9(%arg0: i32) -> (i32, i32, i32, i32) {
    %c0_i32 = arith.constant 0 : i32
    %c0_i32_0 = arith.constant 0 : i32
    %c0_i32_1 = arith.constant 0 : i32
    %c0_i32_2 = arith.constant 0 : i32
    return %arg0, %c0_i32, %c0_i32_0, %c0_i32_1 : i32, i32, i32, i32
  }
}

</mosaic_0001>

<bundles_post_ra>
// kernel: tpu_custom_call.1
= control target key start
LH: loop header
LB: loop body
LE: loop exit
PB: predicated region body
PF: predicated region fallthrough
CT: control target
= control target key end

     0   :  { %14 = vsyncpa [#allocation4], 0  ;;  %s21763_s0 = inlined_call_operand.vmem [shape: f32[2,4,9,9,4], index: 0, kind: input, shape index: {}]   ;;  %s21764_s1 = inlined_call_operand.vmem [shape: f32[3,3,4,8], index: 1, kind: input, shape index: {}]   ;;  %s21765_s2 = inlined_call_operand.vmem [shape: f32[1,8], index: 2, kind: input, shape index: {}]   ;;  %s21766_s3 = inlined_call_operand.vmem [shape: f32[1,8], index: 3, kind: input, shape index: {}]   ;;  %s21767_s4 = inlined_call_operand.vmem [shape: f32[3,3,8,8], index: 4, kind: input, shape index: {}]   ;;  %s21768_s5 = inlined_call_operand.vmem [shape: f32[1,8], index: 5, kind: input, shape index: {}]   ;;  %s21769_s6 = inlined_call_operand.vmem [shape: f32[1,8], index: 6, kind: input, shape index: {}]   ;;  %s21770_s7 = inlined_call_operand.vmem [shape: f32[4,8], index: 7, kind: input, shape index: {}]   ;;  %s21771_s8 = inlined_call_operand.vmem [shape: f32[1,8], index: 8, kind: input, shape index: {}]   ;;  %s21772_s9 = inlined_call_operand.hbm [shape: f32[2,8,8,8], index: 9, kind: output, shape index: {}]  }
   0x1   :  { %16 = vsyncpa [#allocation4 + $0x1], 0  ;;  %s19202_s30 = smov 0   ;;  %s19204_s10 = smov 0  }
   0x2   :  { %s19206_s11 = smov 0   ;;  %s19208_s12 = smov 0  }
   0x3 LB: > { %s19223_s13 = sadd.s32 4294967295, %s19146_s12   ;;  %s15457_s14 = sadd.s32 4294967294, %s19146_s12   ;;  %s19146_s12 = sphi %s19208_s12, %s22214_s12   ;;  %s19142_s11 = sphi %s19206_s11, %s22213_s11   ;;  %s19138_s10 = sphi %s19204_s10, %s22212_s10   ;;  %s19134_s30 = sphi %s19202_s30, %s22211_s30  }
   0x4   : > { %s19227_s15 = sadd.s32 1, %s19146_s12   ;;  %s223_s16 = sadd.s32 1, %s19142_s11 }
   0x5   : > { %s220_s17 = ssub.s32 %s19146_s12, %s19227_s15  ;;  %p233_p0 = scmp.ne.s32.totalorder %s19142_s11, %s19138_s10 }
   0x6   : > { %p221_p1 = scmp.eq.s32.totalorder %s220_s17, 0  ;;  %p234_p2 = scmp.eq.s32.totalorder %s19223_s13, 1 }
   0x7   : > { %p239_p3 = scmp.ne.s32.totalorder %s19138_s10, %s19134_s30  ;;  %p240_p4 = scmp.eq.s32.totalorder %s15457_s14, 1 }
   0x8   : > { %s19238_s18 = scalar_select %p221_p1, %s19142_s11, %s223_s16  }
   0x9   : > { %p19240_p5 = por %p234_p2, %p233_p0  ;;  %p19244_p6 = por %p240_p4, %p239_p3 }
   0xa   : > { %p15460_p7 = scmp.ge.s32.totalorder %s19146_s12, 1  ;;  %p290_p8 = scmp.lt.s32.totalorder %s19146_s12, 3 }
   0xc   : > { %p291_p9 = pnand %p15460_p7, %p290_p8 }
   0xe   : > { %294 = sbr.rel (%p291_p9) target bundleno = 2173 (0x87d), region = 56 }
  0x15   : > { %v15496_v0 = vld [vmem:[%s21764_s1 + $0x4] sm:$0xf]  ;;  %vm413_vm0 = vcmask 1043456   ;;  %p326_p10 = scmp.lt.s32.totalorder %s19223_s13, 1  ;;  %vm388_vm1 = vcmask 31744   ;;  %vm1946_vm2 = vcmask 1046528  }
  0x16   : > { %v415_v1 = vsel %vm413_vm0, %v15496_v0, 0  ;;  %v385_v45 = vld [vmem:[%s21764_s1] sm:$0xf]  ;;  %vm7453_vm3 = vcmask 64512   ;;  %vm7455_vm4 = vcmask 58368   ;;  %s323_s22 = sand.u32 1, %s19138_s10  }
  0x17   : > { %v19255_v2 = vand.u32 4294901760, %v415_v1  ;;  %s327_s23 = scalar_select %p326_p10, %s19223_s13, 1  ;;  %v1189_v46 = vsel %vm413_vm0, %v385_v45, 0 }
  0x18   : > { %v19368_v47 = vand.u32 4294901760, %v1189_v46  ;;  %s15461_s28 = sshll.u32 %s323_s22, 6  ;;  %s15522_s14 = sshll.u32 %s19223_s13, 10 }
  0x19   : > { %16591 = vmatprep.subr.mxu0 %v19255_v2  ;;  %s19041_s24 = smul.u32 576, %s327_s23  ;;  %v19260_v3 = vsub.f32 %v415_v1, %v19255_v2  ;;  %16549 = vmatprep.subr.mxu1 %v19255_v2  ;;  %s21693_s29 = scalar_lea.vmem [#allocation3], %s15461_s28 }
  0x1a   : > { %16592 = vmatpush3.msra.mxu0 %v19255_v2  ;;  %16550 = vmatpush3.msra.mxu1 %v19255_v2  ;;  %v19378_v49 = vsub.f32 %v1189_v46, %v19368_v47  ;;  %s15395_s16 = sshll.u32 %s21693_s29, 4  ;;  %s21712_s21 = scalar_lea.hbm %s21772_s9, %s15522_s14  ;;  %s21714_s16 = int_to_ptr.vmem [resolvable:$true] %s15395_s16 }
  0x1b   : > { %21953 = vst [vmem:[#allocation6_spill] sm:$0xff] %v19260_v3  ;;  %s19268_s27 = scalar_lea.vmem %s21763_s0, %s19041_s24  ;;  %v19271_v4 = vand.u32 4294901760, %v19260_v3  ;;  %s21722_s13 = scalar_lea.sflag [#allocation4], %s323_s22 }
  0x1c   : > { %v15463_v5 = vld [vmem:[%s19268_s27 + $0x90] sm:$0xff]  ;;  %v15464_v6 = vld [vmem:[%s19268_s27 + $0xa0] sm:$0xff]  ;;  %v19385_v51 = vand.u32 4294901760, %v19378_v49  ;;  %s19084_s23 = scalar_lea.vmem %s21714_s16, 1024  ;;  %s19149_s24 = smov [#allocation3]  }
  0x1d   : > { %21954 = vst [vmem:[#allocation7_spill] sm:$0xff] %v19271_v4  ;;  %v15465_v7 = vld [vmem:[%s19268_s27 + $0xb0] sm:$0xff]  ;;  %v390_v8 = vsel %vm388_vm1, %v15463_v5, 0  ;;  %16605 = vmatprep.subr.mxu0 %v19271_v4  ;;  %v393_v9 = vsel %vm388_vm1, %v15464_v6, 0  ;;  %v15466_v11 = vld [vmem:[%s19268_s27 + $0xc0] sm:$0xff]  ;;  %p19085_p11 = scmp.ne.s32.totalorder %s21714_s16, %s19084_s23  ;;  %s19088_s25 = sshll.u32 %s19149_s24, 4  ;;  %s19089_s25 = int_to_ptr.vmem [resolvable:$false] %s19088_s25 }
  0x1e   : > { %v396_v10 = vsel %vm388_vm1, %v15465_v7, 0  ;;  %v15467_v12 = vld [vmem:[%s19268_s27 + $0xd0] sm:$0xff]  ;;  %v15468_v13 = vld [vmem:[%s19268_s27 + $0xe0] sm:$0xff]  ;;  %v19283_v14 = vand.u32 4294901760, %v390_v8  ;;  %v19285_v15 = vand.u32 4294901760, %v393_v9  ;;  %v399_v17 = vsel %vm388_vm1, %v15466_v11, 0  ;;  %p19091_p0 = scmp.lt.s32.totalorder %s21714_s16, %s19089_s25 }
  0x1f   : > { %v19287_v16 = vand.u32 4294901760, %v396_v10  ;;  %v15469_v18 = vld [vmem:[%s19268_s27 + $0xf0] sm:$0xff]  ;;  %v15470_v19 = vld [vmem:[%s19268_s27 + $0x100] sm:$0xff]  ;;  %v19292_v20 = vand.u32 4294901760, %v399_v17  ;;  %v402_v21 = vsel %vm388_vm1, %v15467_v12, 0  ;;  %v405_v22 = vsel %vm388_vm1, %v15468_v13, 0  ;;  %p19086_p12 = pnand %p19085_p11, %p19240_p5 }
  0x20   : > { %21955 = vst [vmem:[#allocation8_spill] sm:$0xff] %v19283_v14  ;;  %21956 = vst [vmem:[#allocation9_spill] sm:$0xff] %v19285_v15  ;;  %v408_v23 = vsel %vm388_vm1, %v15469_v18, 0  ;;  %v19298_v24 = vsub.f32 %v390_v8, %v19283_v14  ;;  %v19301_v25 = vsub.f32 %v393_v9, %v19285_v15  ;;  %v19306_v27 = vand.u32 4294901760, %v402_v21  ;;  %v19375_v48 = vld [vmem:[%s19268_s27] sm:$0xff]  ;;  %v19388_v52 = vld [vmem:[%s19268_s27 + $0x10] sm:$0xff] }
  0x21   : > { %21957 = vst [vmem:[#allocation10_spill] sm:$0xff] %v19287_v16  ;;  %21958 = vst [vmem:[#allocation11_spill] sm:$0xff] %v19292_v20  ;;  %v19304_v26 = vsub.f32 %v396_v10, %v19287_v16  ;;  %v19309_v28 = vsub.f32 %v399_v17, %v19292_v20  ;;  %v19311_v29 = vand.u32 4294901760, %v405_v22  ;;  %v19313_v30 = vand.u32 4294901760, %v408_v23  ;;  %v19391_v53 = vld [vmem:[%s19268_s27 + $0x20] sm:$0xff]  ;;  %v19404_v58 = vld [vmem:[%s19268_s27 + $0x30] sm:$0xff]  ;;  %p19087_p13 = pneg %p19086_p12 }
  0x22   : > { %21959 = vst [vmem:[#allocation12_spill] sm:$0xff] %v19298_v24  ;;  %21960 = vst [vmem:[#allocation13_spill] sm:$0xff] %v19301_v25  ;;  %v411_v31 = vsel %vm388_vm1, %v15470_v19, 0  ;;  %v21773_v32 = vand.u32 4294901760, %v19298_v24  ;;  %v19318_v33 = vand.u32 4294901760, %v19301_v25  ;;  %v19324_v35 = vsub.f32 %v402_v21, %v19306_v27  ;;  %v19407_v59 = vld [vmem:[%s19268_s27 + $0x40] sm:$0xff] }
  0x23   : > { %21961 = vst [vmem:[#allocation14_spill] sm:$0xff] %v19304_v26  ;;  %21962 = vst [vmem:[#allocation15_spill] sm:$0xff] %v19306_v27  ;;  %v19321_v34 = vand.u32 4294901760, %v19304_v26  ;;  %v19330_v36 = vand.u32 4294901760, %v19309_v28  ;;  %v19333_v37 = vsub.f32 %v405_v22, %v19311_v29  ;;  %v19335_v38 = vand.u32 4294901760, %v411_v31  ;;  %v19426_v5 = vld [vmem:[%s19268_s27 + $0x60] sm:$0xff] }
  0x24   : > { %21963 = vst [vmem:[#allocation16_spill] sm:$0xff] %v19309_v28  ;;  %21964 = vst [vmem:[#allocation17_spill] sm:$0xff] %v19311_v29  ;;  %16593 = vmatprep.mubr.f32.mxu0 %v21773_v32  ;;  %v19340_v39 = vand.u32 4294901760, %v19324_v35  ;;  %v19343_v40 = vsub.f32 %v408_v23, %v19313_v30  ;;  %v1165_v50 = vsel %vm388_vm1, %v19375_v48, 0  ;;  %v1168_v55 = vsel %vm388_vm1, %v19388_v52, 0  ;;  %v19447_v13 = vld [vmem:[%s19268_s27 + $0x70] sm:$0xff] }
  0x25   : > { %21965 = vst [vmem:[#allocation18_spill] sm:$0xff] %v19313_v30  ;;  %21966 = vst [vmem:[#allocation19_spill] sm:$0xff] %v19318_v33  ;;  %16594 = vmatmul.mubr.f32.vlgmr.msra.gmra.mrb[0].mxu0 %v19318_v33  ;;  %v19348_v41 = vand.u32 4294901760, %v19333_v37  ;;  %v19351_v42 = vsub.f32 %v411_v31, %v19335_v38  ;;  %v19394_v54 = vand.u32 4294901760, %v1165_v50  ;;  %v1341_v56 = vsub.f32 %v19378_v49, %v19385_v51  ;;  %s19090_s26 = scalar_lea.vmem %s19089_s25, 2048 }
  0x26   : > { %21967 = vst [vmem:[#allocation20_spill] sm:$0xff] %v19321_v34  ;;  %21968 = vst [vmem:[#allocation21_spill] sm:$0xff] %v19324_v35  ;;  %16606 = vmatpush3.msra.mxu0 %v19271_v4  ;;  %16596 = vmatprep.mubr.f32.mxu0 %v19321_v34  ;;  %v19355_v43 = vand.u32 4294901760, %v19343_v40  ;;  %v1171_v57 = vsel %vm388_vm1, %v19391_v53, 0  ;;  %v19413_v61 = vand.u32 4294901760, %v1168_v55  ;;  %v1174_v63 = vsel %vm388_vm1, %v19404_v58, 0  ;;  %p19092_p1 = scmp.lt.s32.totalorder %s19090_s26, %s19084_s23 }
  0x27   : > { %21969 = vst [vmem:[#allocation22_spill] sm:$0xff] %v19330_v36  ;;  %21970 = vst [vmem:[#allocation23_spill] sm:$0xff] %v19333_v37  ;;  %16619 = vmatprep.subr.mxu0 %v19255_v2  ;;  %v19359_v44 = vand.u32 4294901760, %v19351_v42  ;;  %v19411_v60 = vsub.f32 %v1165_v50, %v19394_v54  ;;  %v19416_v62 = vand.u32 4294901760, %v1171_v57  ;;  %v1342_v0 = vand.u32 4294901760, %v1341_v56 }
  0x28   : > { %21971 = vst [vmem:[#allocation24_spill] sm:$0xff] %v19335_v38  ;;  %21972 = vst [vmem:[#allocation25_spill] sm:$0xff] %v19340_v39  ;;  %v1177_v1 = vsel %vm388_vm1, %v19407_v59, 0  ;;  %v19431_v7 = vsub.f32 %v1168_v55, %v19413_v61  ;;  %v19433_v8 = vand.u32 4294901760, %v1174_v63  ;;  %v1183_v12 = vsel %vm388_vm1, %v19426_v5, 0  ;;  %p19093_p2 = por %p19092_p1, %p19091_p0 }
  0x29   : > { %21973 = vst [vmem:[#allocation26_spill] sm:$0xff] %v19343_v40  ;;  %16597 = vmatmul.mubr.f32.gmra.mrb[2].mxu0 %v19330_v36  ;;  %21974 = vst [vmem:[#allocation27_spill] sm:$0xff] %v19348_v41  ;;  %v21774_v6 = vand.u32 4294901760, %v19411_v60  ;;  %v19438_v9 = vsub.f32 %v1171_v57, %v19416_v62  ;;  %v19440_v10 = vand.u32 4294901760, %v1177_v1  ;;  %v19468_v31 = vand.u32 4294901760, %v1183_v12 }
  0x2a   : > { %21975 = vst [vmem:[#allocation28_spill] sm:$0xff] %v19351_v42  ;;  %16599 = vmatprep.mubr.f32.mxu0 %v19340_v39  ;;  %21976 = vst [vmem:[#allocation29_spill] sm:$0xff] %v19355_v43  ;;  %v19454_v18 = vand.u32 4294901760, %v19431_v7  ;;  %v19457_v19 = vsub.f32 %v1174_v63, %v19433_v8  ;;  %v1186_v45 = vsel %vm388_vm1, %v19447_v13, 0  ;;  %v1953_v3 = vrot.slane %v19391_v53, 1  ;;  %p19094_p3 = pnand %p19093_p2, %p19087_p13 }
  0x2b   : > { %21977 = vst [vmem:[#allocation30_spill] sm:$0xff] %v19359_v44  ;;  %v1260_v17 = vsub.f32 %v19411_v60, %v21774_v6  ;;  %v19463_v22 = vand.u32 4294901760, %v19438_v9  ;;  %v19466_v23 = vsub.f32 %v1177_v1, %v19440_v10  ;;  %v19481_v56 = vand.u32 4294901760, %v1186_v45  ;;  %v338_v42 = vld [vmem:[%s19268_s27 + $0x38] sm:$0x1] }
  0x2c   : > { %21978 = vst [vmem:[#allocation31_spill] sm:$0xff] %v19454_v18  ;;  %v1270_v46 = vsub.f32 %v19431_v7, %v19454_v18  ;;  %v19476_v50 = vand.u32 4294901760, %v19457_v19  ;;  %v19490_v32 = vsub.f32 %v1183_v12, %v19468_v31  ;;  %v1959_v53 = vrot.slane %v19407_v59, 1  ;;  %v342_v40 = vld [vmem:[%s19268_s27 + $0x58] sm:$0x1] }
  0x2d   : > { %16600 = vmatmul.mubr.f32.gmra.mrb[4].mxu0 %v19348_v41  ;;  %21979 = vst [vmem:[#allocation32_spill] sm:$0xff] %v19463_v22  ;;  %v1261_v57 = vand.u32 4294901760, %v1260_v17  ;;  %v1280_v63 = vsub.f32 %v19438_v9, %v19463_v22  ;;  %v19487_v1 = vand.u32 4294901760, %v19466_v23  ;;  %v19501_v17 = vsub.f32 %v1186_v45, %v19481_v56  ;;  %v346_v41 = vld [vmem:[%s19268_s27 + $0x78] sm:$0x1] }
  0x2e   : > { %16602 = vmatprep.mubr.f32.mxu0 %v19355_v43  ;;  %21980 = vst [vmem:[#allocation33_spill] sm:$0xff] %v19476_v50  ;;  %21983 = vst [vmem:[#allocation36_spill] sm:$0xff] %v19490_v32  ;;  %v19493_v6 = vand.u32 4294901760, %v1270_v46  ;;  %v1968_v35 = vrot.slane %v19447_v13, 1 }
  0x2f   : > { %21982 = vst [vmem:[#allocation35_spill] sm:$0xff] %v19487_v1  ;;  %21985 = vst [vmem:[#allocation38_spill] sm:$0xff] %v19501_v17  ;;  %v1300_v12 = vsub.f32 %v19466_v23, %v19487_v1 }
  0x31   : > { %16603 = vmatmul.mubr.f32.gmra.mrb[6].mxu0 %v19359_v44  ;;  %v19519_v45 = vand.u32 4294901760, %v1300_v12  ;;  %v1947_v12 = vrot.slane %v19375_v48, 1  ;;  %v1956_v44 = vrot.slane %v19404_v58, 1 }
  0x32   : > { %16607 = vmatprep.mubr.f32.mxu0 %v19283_v14 }
  0x35   : > { %16608 = vmatmul.mubr.f32.vlgmr.msra.gmra.mrb[0].mxu0 %v19285_v15 }
  0x36   : > { %16620 = vmatpush3.msra.mxu0 %v19255_v2  ;;  %16610 = vmatprep.mubr.f32.mxu0 %v19287_v16  ;;  %v19423_v2 = vld [vmem:[%s19268_s27 + $0x50] sm:$0xff] }
  0x37   : > { %16633 = vmatprep.subr.mxu0 %v19368_v47  ;;  %v1180_v11 = vsel %vm388_vm1, %v19423_v2, 0  ;;  %v1962_v58 = vrot.slane %v19423_v2, 1 }
  0x38   : > { %v19459_v21 = vand.u32 4294901760, %v1180_v11 }
  0x39   : > { %16611 = vmatmul.mubr.f32.gmra.mrb[2].mxu0 %v19292_v20 }
  0x3a   : > { %16613 = vmatprep.mubr.f32.mxu0 %v19306_v27  ;;  %v19479_v55 = vsub.f32 %v1180_v11, %v19459_v21  ;;  %v1290_v11 = vsub.f32 %v19457_v19, %v19476_v50 }
  0x3c   : > { %21981 = vst [vmem:[#allocation34_spill] sm:$0xff] %v19479_v55  ;;  %v19511_v46 = vand.u32 4294901760, %v1290_v11 }
  0x3d   : > { %16614 = vmatmul.mubr.f32.gmra.mrb[4].mxu0 %v19311_v29 }
  0x3e   : > { %16616 = vmatprep.mubr.f32.mxu0 %v19313_v30 }
  0x41   : > { %16617 = vmatmul.mubr.f32.gmra.mrb[6].mxu0 %v19335_v38 }
  0x42   : > { %16621 = vmatprep.mubr.f32.mxu0 %v19283_v14 }
  0x45   : > { %16622 = vmatmul.mubr.f32.vlgmr.msra.gmra.mrb[0].mxu0 %v19285_v15  ;;  %v336_v15 = vld [vmem:[%s19268_s27 + $0x28] sm:$0x1] }
  0x46   : > { %16634 = vmatpush3.msra.mxu0 %v19368_v47  ;;  %16624 = vmatprep.mubr.f32.mxu0 %v19287_v16  ;;  %v1954_v4 = vrot.slane %v336_v15, 1 }
  0x47   : > { %16647 = vmatprep.subr.mxu0 %v1342_v0 }
  0x48   : > { %v1955_v15 = vsel %vm1946_vm2, %v1953_v3, %v1954_v4  ;;  %v1963_v4 = vrot.slane %v342_v40, 1 }
  0x49   : > { %16625 = vmatmul.mubr.f32.gmra.mrb[2].mxu0 %v19292_v20  ;;  %v19516_v20 = vand.u32 4294901760, %v19501_v17  ;;  %v1977_v59 = vsel %vm388_vm1, %v1955_v15, 0 }
  0x4a   : > { %16627 = vmatprep.mubr.f32.mxu0 %v19306_v27  ;;  %v19508_v27 = vand.u32 4294901760, %v19490_v32  ;;  %v19624_v15 = vand.u32 4294901760, %v1977_v59 }
  0x4b   : > { %21987 = vst [vmem:[#allocation40_spill] sm:$0xff] %v19516_v20  ;;  %v1330_v11 = vsub.f32 %v19501_v17, %v19516_v20 }
  0x4c   : > { %21986 = vst [vmem:[#allocation39_spill] sm:$0xff] %v19508_v27  ;;  %21990 = vst [vmem:[#allocation42_spill] sm:$0xff] %v19624_v15 }
  0x4d   : > { %16628 = vmatmul.mubr.f32.gmra.mrb[4].mxu0 %v19311_v29  ;;  %v19498_v29 = vand.u32 4294901760, %v19479_v55 }
  0x4e   : > { %16630 = vmatprep.mubr.f32.mxu0 %v19313_v30  ;;  %v19503_v30 = vand.u32 4294901760, %v1280_v63 }
  0x4f   : > { %21984 = vst [vmem:[#allocation37_spill] sm:$0xff] %v19498_v29 }
  0x51   : > { %16631 = vmatmul.mubr.f32.gmra.mrb[6].mxu0 %v19335_v38  ;;  %v1310_v38 = vsub.f32 %v19479_v55, %v19498_v29 }
  0x52   : > { %16635 = vmatprep.mubr.f32.mxu0 %v1261_v57  ;;  %v1320_v57 = vsub.f32 %v19490_v32, %v19508_v27 }
  0x53   : > { %v19525_v63 = vand.u32 4294901760, %v1310_v38  ;;  %v21988_v38 = vand.u32 4294901760, %v19411_v60 }
  0x54   : > { %v19530_v16 = vand.u32 4294901760, %v1320_v57 }
  0x55   : > { %16636 = vmatmul.mubr.f32.vlgmr.msra.gmra.mrb[0].mxu0 %v19493_v6 }
  0x56   : > { %16648 = vmatpush3.msra.mxu0 %v1342_v0  ;;  %16638 = vmatprep.mubr.f32.mxu0 %v19503_v30  ;;  %v19533_v0 = vand.u32 4294901760, %v1330_v11 }
  0x57   : > { %16661 = vmatprep.subr.mxu0 %v19378_v49 }
  0x59   : > { %16639 = vmatmul.mubr.f32.gmra.mrb[2].mxu0 %v19511_v46 }
  0x5a   : > { %16641 = vmatprep.mubr.f32.mxu0 %v19519_v45 }
  0x5d   : > { %16642 = vmatmul.mubr.f32.gmra.mrb[4].mxu0 %v19525_v63 }
  0x5e   : > { %16644 = vmatprep.mubr.f32.mxu0 %v19530_v16 }
  0x61   : > { %16645 = vmatmul.mubr.f32.gmra.mrb[6].mxu0 %v19533_v0 }
  0x62   : > { %16649 = vmatprep.mubr.f32.mxu0 %v19394_v54 }
  0x65   : > { %16650 = vmatmul.mubr.f32.vlgmr.msra.gmra.mrb[0].mxu0 %v19413_v61 }
  0x66   : > { %16662 = vmatpush3.msra.mxu0 %v19378_v49  ;;  %16652 = vmatprep.mubr.f32.mxu0 %v19416_v62  ;;  %v15497_v49 = vld [vmem:[%s21764_s1 + $0x8] sm:$0xf] }
  0x67   : > { %16675 = vmatprep.subr.mxu0 %v19368_v47 }
  0x69   : > { %16653 = vmatmul.mubr.f32.gmra.mrb[2].mxu0 %v19433_v8 }
  0x6a   : > { %16655 = vmatprep.mubr.f32.mxu0 %v19440_v10 }
  0x6d   : > { %16656 = vmatmul.mubr.f32.gmra.mrb[4].mxu0 %v19459_v21 }
  0x6e   : > { %16658 = vmatprep.mubr.f32.mxu0 %v19468_v31 }
  0x71   : > { %16659 = vmatmul.mubr.f32.gmra.mrb[6].mxu0 %v19481_v56 }
  0x72   : > { %16663 = vmatprep.mubr.f32.mxu0 %v19411_v60  ;;  %v332_v60 = vld [vmem:[%s19268_s27 + $0x8] sm:$0x1] }
  0x73   : > { %v1948_v11 = vrot.slane %v332_v60, 1 }
  0x75   : > { %16664 = vmatmul.mubr.f32.vlgmr.msra.gmra.mrb[0].mxu0 %v19431_v7  ;;  %v1949_v48 = vsel %vm1946_vm2, %v1947_v12, %v1948_v11  ;;  %v1957_v11 = vrot.slane %v338_v42, 1 }
  0x76   : > { %16676 = vmatpush3.msra.mxu0 %v19368_v47  ;;  %16666 = vmatprep.mubr.f32.mxu0 %v19438_v9 }
  0x77   : > { %16689 = vmatprep.subr.mxu0 %v19385_v51  ;;  %v1958_v3 = vsel %vm1946_vm2, %v1956_v44, %v1957_v11  ;;  %v1964_v11 = vsel %vm1946_vm2, %v1962_v58, %v1963_v4 }
  0x78   : > { %v1979_v40 = vsel %vm388_vm1, %v1958_v3, 0 }
  0x79   : > { %16667 = vmatmul.mubr.f32.gmra.mrb[2].mxu0 %v19457_v19 }
  0x7a   : > { %16669 = vmatprep.mubr.f32.mxu0 %v19466_v23 }
  0x7d   : > { %16670 = vmatmul.mubr.f32.gmra.mrb[4].mxu0 %v19479_v55 }
  0x7e   : > { %16672 = vmatprep.mubr.f32.mxu0 %v19490_v32 }
  0x81   : > { %16673 = vmatmul.mubr.f32.gmra.mrb[6].mxu0 %v19501_v17 }
  0x82   : > { %16677 = vmatprep.mubr.f32.mxu0 %v21988_v38  ;;  %v334_v38 = vld [vmem:[%s19268_s27 + $0x18] sm:$0x1] }
  0x83   : > { %v1951_v60 = vrot.slane %v334_v38, 1 }
  0x85   : > { %16678 = vmatmul.mubr.f32.vlgmr.msra.gmra.mrb[0].mxu0 %v19454_v18 }
  0x86   : > { %16690 = vmatpush3.msra.mxu0 %v19385_v51  ;;  %16680 = vmatprep.mubr.f32.mxu0 %v19463_v22  ;;  %v1990_v51 = vsel %vm413_vm0, %v15497_v49, 0  ;;  %v1950_v49 = vrot.slane %v19388_v52, 1  ;;  %v1973_v52 = vsel %vm388_vm1, %v1949_v48, 0  ;;  %v344_v48 = vld [vmem:[%s19268_s27 + $0x68] sm:$0x1] }
  0x87   : > { %16703 = vmatprep.subr.mxu0 %v19368_v47  ;;  %v19575_v57 = vand.u32 4294901760, %v1990_v51  ;;  %v19603_v43 = vand.u32 4294901760, %v1973_v52 }
  0x89   : > { %16681 = vmatmul.mubr.f32.gmra.mrb[2].mxu0 %v19476_v50  ;;  %v19586_v14 = vsub.f32 %v1990_v51, %v19575_v57  ;;  %v1952_v51 = vsel %vm1946_vm2, %v1950_v49, %v1951_v60  ;;  %v1965_v49 = vrot.slane %v19426_v5, 1  ;;  %v19618_v2 = vsub.f32 %v1973_v52, %v19603_v43 }
  0x8a   : > { %16683 = vmatprep.mubr.f32.mxu0 %v19487_v1  ;;  %v1975_v37 = vsel %vm388_vm1, %v1952_v51, 0 }
  0x8b   : > { %v19596_v12 = vand.u32 4294901760, %v19586_v14  ;;  %v19620_v51 = vand.u32 4294901760, %v1975_v37  ;;  %v21807_v52 = vand.u32 4294901760, %v19618_v2 }
  0x8d   : > { %16684 = vmatmul.mubr.f32.gmra.mrb[4].mxu0 %v19498_v29  ;;  %v2142_v42 = vsub.f32 %v19586_v14, %v19596_v12  ;;  %21989 = vst [vmem:[#allocation41_spill] sm:$0xff] %v19620_v51  ;;  %v19633_v13 = vsub.f32 %v1975_v37, %v19620_v51  ;;  %v2061_v37 = vsub.f32 %v19618_v2, %v21807_v52 }
  0x8e   : > { %16686 = vmatprep.mubr.f32.mxu0 %v19508_v27 }
  0x8f   : > { %v2143_v44 = vand.u32 4294901760, %v2142_v42  ;;  %21991 = vst [vmem:[#allocation43_spill] sm:$0xff] %v19633_v13  ;;  %v19652_v4 = vand.u32 4294901760, %v19633_v13 }
  0x91   : > { %16687 = vmatmul.mubr.f32.gmra.mrb[6].mxu0 %v19516_v20  ;;  %21995 = vst [vmem:[#allocation47_spill] sm:$0xff] %v19652_v4 }
  0x92   : > { %16691 = vmatprep.mubr.f32.mxu0 %v19394_v54 }
  0x95   : > { %16692 = vmatmul.mubr.f32.vlgmr.msra.gmra.mrb[0].mxu0 %v19413_v61 }
  0x96   : > { %16704 = vmatpush3.msra.mxu0 %v19368_v47  ;;  %16694 = vmatprep.mubr.f32.mxu0 %v19416_v62  ;;  %v340_v47 = vld [vmem:[%s19268_s27 + $0x48] sm:$0x1] }
  0x97   : > { %16717 = vmatprep.subr.mxu0 %v19575_v57  ;;  %v1960_v38 = vrot.slane %v340_v47, 1  ;;  %v1966_v47 = vrot.slane %v344_v48, 1  ;;  %v19640_v48 = vsub.f32 %v1977_v59, %v19624_v15 }
  0x99   : > { %16695 = vmatmul.mubr.f32.gmra.mrb[2].mxu0 %v19433_v8  ;;  %v1961_v60 = vsel %vm1946_vm2, %v1959_v53, %v1960_v38  ;;  %v1969_v53 = vrot.slane %v346_v41, 1  ;;  %v1967_v38 = vsel %vm1946_vm2, %v1965_v49, %v1966_v47  ;;  %21993 = vst [vmem:[#allocation45_spill] sm:$0xff] %v19640_v48  ;;  %v1983_v41 = vsel %vm388_vm1, %v1964_v11, 0 }
  0x9a   : > { %16697 = vmatprep.mubr.f32.mxu0 %v19440_v10  ;;  %v1981_v5 = vsel %vm388_vm1, %v1961_v60, 0  ;;  %v1985_v42 = vsel %vm388_vm1, %v1967_v38, 0  ;;  %v19657_v49 = vand.u32 4294901760, %v1983_v41  ;;  %v19661_v60 = vand.u32 4294901760, %v19640_v48 }
  0x9b   : > { %v19642_v58 = vand.u32 4294901760, %v1981_v5  ;;  %v1970_v3 = vsel %vm1946_vm2, %v1968_v35, %v1969_v53  ;;  %v19666_v47 = vand.u32 4294901760, %v1985_v42 }
  0x9c   : > { %21997 = vst [vmem:[#allocation49_spill] sm:$0xff] %v19657_v49  ;;  %21998 = vst [vmem:[#allocation50_spill] sm:$0xff] %v19661_v60  ;;  %v1987_v11 = vsel %vm388_vm1, %v1970_v3, 0  ;;  %v19676_v38 = vsub.f32 %v1983_v41, %v19657_v49  ;;  %v2081_v39 = vsub.f32 %v19640_v48, %v19661_v60 }
  0x9d   : > { %16698 = vmatmul.mubr.f32.gmra.mrb[4].mxu0 %v19459_v21  ;;  %21994 = vst [vmem:[#allocation46_spill] sm:$0xff] %v19642_v58  ;;  %v19664_v35 = vsub.f32 %v1981_v5, %v19642_v58  ;;  %22000 = vst [vmem:[#allocation52_spill] sm:$0xff] %v19666_v47  ;;  %v19678_v52 = vand.u32 4294901760, %v1987_v11  ;;  %v2062_v5 = vand.u32 4294901760, %v2061_v37  ;;  %v19687_v28 = vsub.f32 %v1985_v42, %v19666_v47 }
  0x9e   : > { %16700 = vmatprep.mubr.f32.mxu0 %v19468_v31  ;;  %22002 = vst [vmem:[#allocation54_spill] sm:$0xff] %v19676_v38  ;;  %v19695_v24 = vand.u32 4294901760, %v19676_v38  ;;  %v19700_v26 = vand.u32 4294901760, %v2081_v39 }
  0x9f   : > { %21999 = vst [vmem:[#allocation51_spill] sm:$0xff] %v19664_v35  ;;  %22003 = vst [vmem:[#allocation55_spill] sm:$0xff] %v19678_v52  ;;  %v19684_v3 = vand.u32 4294901760, %v19664_v35  ;;  %v19698_v37 = vsub.f32 %v1987_v11, %v19678_v52  ;;  %v19705_v34 = vand.u32 4294901760, %v19687_v28 }
  0xa0   : > { %22005 = vst [vmem:[#allocation57_spill] sm:$0xff] %v19687_v28  ;;  %22007 = vst [vmem:[#allocation59_spill] sm:$0xff] %v19695_v24  ;;  %v2111_v25 = vsub.f32 %v19676_v38, %v19695_v24 }
  0xa1   : > { %16701 = vmatmul.mubr.f32.gmra.mrb[6].mxu0 %v19481_v56  ;;  %22004 = vst [vmem:[#allocation56_spill] sm:$0xff] %v19684_v3  ;;  %22008 = vst [vmem:[#allocation60_spill] sm:$0xff] %v19698_v37  ;;  %v2101_v42 = vsub.f32 %v19664_v35, %v19684_v3  ;;  %v19713_v33 = vand.u32 4294901760, %v19698_v37  ;;  %v2121_v11 = vsub.f32 %v19687_v28, %v19705_v34 }
  0xa2   : > { %16705 = vmatprep.mubr.f32.mxu0 %v19394_v54  ;;  %v19635_v54 = vand.u32 4294901760, %v1979_v40  ;;  %22009 = vst [vmem:[#allocation61_spill] sm:$0xff] %v19700_v26  ;;  %22010 = vst [vmem:[#allocation62_spill] sm:$0xff] %v19705_v34 }
  0xa3   : > { %22012 = vst [vmem:[#allocation64_spill] sm:$0xff] %v19713_v33  ;;  %v19716_v39 = vand.u32 4294901760, %v2101_v42  ;;  %v19777_v42 = vld [vmem:[%s19268_s27 + $0x120] sm:$0xff] }
  0xa4   : > { %21992 = vst [vmem:[#allocation44_spill] sm:$0xff] %v19635_v54  ;;  %v19655_v59 = vsub.f32 %v1979_v40, %v19635_v54  ;;  %v2071_v40 = vsub.f32 %v19633_v13, %v19652_v4 }
  0xa5   : > { %16706 = vmatmul.mubr.f32.vlgmr.msra.gmra.mrb[0].mxu0 %v19413_v61  ;;  %22013 = vst [vmem:[#allocation65_spill] sm:$0xff] %v19716_v39 }
  0xa6   : > { %16718 = vmatpush3.msra.mxu0 %v19575_v57  ;;  %16708 = vmatprep.mubr.f32.mxu0 %v19416_v62  ;;  %21996 = vst [vmem:[#allocation48_spill] sm:$0xff] %v19655_v59  ;;  %v19673_v53 = vand.u32 4294901760, %v19655_v59  ;;  %v19690_v36 = vand.u32 4294901760, %v2071_v40 }
  0xa7   : > { %16731 = vmatprep.subr.mxu0 %v2143_v44 }
  0xa8   : > { %22001 = vst [vmem:[#allocation53_spill] sm:$0xff] %v19673_v53  ;;  %22006 = vst [vmem:[#allocation58_spill] sm:$0xff] %v19690_v36  ;;  %v2091_v41 = vsub.f32 %v19655_v59, %v19673_v53 }
  0xa9   : > { %16709 = vmatmul.mubr.f32.gmra.mrb[2].mxu0 %v19433_v8 }
  0xaa   : > { %16711 = vmatprep.mubr.f32.mxu0 %v19440_v10  ;;  %v19708_v40 = vand.u32 4294901760, %v2091_v41  ;;  %v2131_v41 = vsub.f32 %v19698_v37, %v19713_v33 }
  0xac   : > { %22011 = vst [vmem:[#allocation63_spill] sm:$0xff] %v19708_v40 }
  0xad   : > { %16712 = vmatmul.mubr.f32.gmra.mrb[4].mxu0 %v19459_v21 }
  0xae   : > { %16714 = vmatprep.mubr.f32.mxu0 %v19468_v31 }
  0xb1   : > { %16715 = vmatmul.mubr.f32.gmra.mrb[6].mxu0 %v19481_v56 }
  0xb2   : > { %16719 = vmatprep.mubr.f32.mxu0 %v2062_v5  ;;  %v19722_v5 = vand.u32 4294901760, %v2111_v25  ;;  %v15498_v25 = vld [vmem:[%s21764_s1 + $0xc] sm:$0xf] }
  0xb4   : > { %22014 = vst [vmem:[#allocation66_spill] sm:$0xff] %v19722_v5 }
  0xb5   : > { %16720 = vmatmul.mubr.f32.vlgmr.msra.gmra.mrb[0].mxu0 %v19690_v36  ;;  %v19727_v36 = vand.u32 4294901760, %v2121_v11 }
  0xb6   : > { %16732 = vmatpush3.msra.mxu0 %v2143_v44  ;;  %16722 = vmatprep.mubr.f32.mxu0 %v19700_v26  ;;  %v19730_v44 = vand.u32 4294901760, %v2131_v41  ;;  %v2750_v41 = vsel %vm388_vm1, %v19777_v42, 0 }
  0xb7   : > { %16745 = vmatprep.subr.mxu0 %v19586_v14  ;;  %22015 = vst [vmem:[#allocation67_spill] sm:$0xff] %v19727_v36 }
  0xb8   : > { %22016 = vst [vmem:[#allocation68_spill] sm:$0xff] %v19730_v44 }
  0xb9   : > { %16723 = vmatmul.mubr.f32.gmra.mrb[2].mxu0 %v19708_v40 }
  0xba   : > { %16725 = vmatprep.mubr.f32.mxu0 %v19716_v39 }
  0xbd   : > { %16726 = vmatmul.mubr.f32.gmra.mrb[4].mxu0 %v19722_v5 }
  0xbe   : > { %16728 = vmatprep.mubr.f32.mxu0 %v19727_v36 }
  0xc1   : > { %16729 = vmatmul.mubr.f32.gmra.mrb[6].mxu0 %v19730_v44 }
  0xc2   : > { %16733 = vmatprep.mubr.f32.mxu0 %v19603_v43 }
  0xc5   : > { %16734 = vmatmul.mubr.f32.vlgmr.msra.gmra.mrb[0].mxu0 %v19620_v51 }
  0xc6   : > { %16746 = vmatpush3.msra.mxu0 %v19586_v14  ;;  %16736 = vmatprep.mubr.f32.mxu0 %v19624_v15  ;;  %v22017_v14 = vand.u32 4294901760, %v19618_v2 }
  0xc7   : > { %16759 = vmatprep.subr.mxu0 %v19575_v57 }
  0xc9   : > { %16737 = vmatmul.mubr.f32.gmra.mrb[2].mxu0 %v19635_v54 }
  0xca   : > { %16739 = vmatprep.mubr.f32.mxu0 %v19642_v58 }
  0xcd   : > { %16740 = vmatmul.mubr.f32.gmra.mrb[4].mxu0 %v19657_v49 }
  0xce   : > { %16742 = vmatprep.mubr.f32.mxu0 %v19666_v47 }
  0xd1   : > { %16743 = vmatmul.mubr.f32.gmra.mrb[6].mxu0 %v19678_v52 }
  0xd2   : > { %16747 = vmatprep.mubr.f32.mxu0 %v19618_v2 }
  0xd5   : > { %16748 = vmatmul.mubr.f32.vlgmr.msra.gmra.mrb[0].mxu0 %v19633_v13 }
  0xd6   : > { %16760 = vmatpush3.msra.mxu0 %v19575_v57  ;;  %16750 = vmatprep.mubr.f32.mxu0 %v19640_v48  ;;  %v19828_v48 = vld [vmem:[%s19268_s27 + $0x180] sm:$0xff] }
  0xd7   : > { %16773 = vmatprep.subr.mxu0 %v19596_v12 }
  0xd9   : > { %16751 = vmatmul.mubr.f32.gmra.mrb[2].mxu0 %v19655_v59  ;;  %v19825_v59 = vld [vmem:[%s19268_s27 + $0x170] sm:$0xff] }
  0xda   : > { %16753 = vmatprep.mubr.f32.mxu0 %v19664_v35  ;;  %v2765_v36 = vsel %vm388_vm1, %v19825_v59, 0 }
  0xdb   : > { %v19859_v39 = vand.u32 4294901760, %v2765_v36 }
  0xdd   : > { %16754 = vmatmul.mubr.f32.gmra.mrb[4].mxu0 %v19676_v38 }
  0xde   : > { %16756 = vmatprep.mubr.f32.mxu0 %v19687_v28 }
  0xe1   : > { %16757 = vmatmul.mubr.f32.gmra.mrb[6].mxu0 %v19698_v37 }
  0xe2   : > { %16761 = vmatprep.mubr.f32.mxu0 %v22017_v14  ;;  %v19790_v14 = vld [vmem:[%s19268_s27 + $0x130] sm:$0xff] }
  0xe5   : > { %16762 = vmatmul.mubr.f32.vlgmr.msra.gmra.mrb[0].mxu0 %v19652_v4 }
  0xe6   : > { %16774 = vmatpush3.msra.mxu0 %v19596_v12  ;;  %16764 = vmatprep.mubr.f32.mxu0 %v19661_v60  ;;  %v2774_v12 = vsel %vm413_vm0, %v15498_v25, 0  ;;  %v19793_v25 = vld [vmem:[%s19268_s27 + $0x140] sm:$0xff] }
  0xe7   : > { %16787 = vmatprep.subr.mxu0 %v19575_v57  ;;  %v19770_v2 = vand.u32 4294901760, %v2774_v12 }
  0xe9   : > { %16765 = vmatmul.mubr.f32.gmra.mrb[2].mxu0 %v19673_v53  ;;  %v19780_v11 = vsub.f32 %v2774_v12, %v19770_v2  ;;  %v2753_v12 = vsel %vm388_vm1, %v19790_v14, 0  ;;  %v19809_v53 = vld [vmem:[%s19268_s27 + $0x160] sm:$0xff] }
  0xea   : > { %16767 = vmatprep.mubr.f32.mxu0 %v19684_v3  ;;  %v19806_v3 = vld [vmem:[%s19268_s27 + $0x150] sm:$0xff]  ;;  %v19815_v4 = vand.u32 4294901760, %v2753_v12  ;;  %v2762_v35 = vsel %vm388_vm1, %v19809_v53, 0 }
  0xeb   : > { %v2759_v28 = vsel %vm388_vm1, %v19806_v3, 0  ;;  %v19842_v44 = vand.u32 4294901760, %v2762_v35 }
  0xec   : > { %v19835_v13 = vand.u32 4294901760, %v2759_v28 }
  0xed   : > { %16768 = vmatmul.mubr.f32.gmra.mrb[4].mxu0 %v19695_v24  ;;  %v2756_v24 = vsel %vm388_vm1, %v19793_v25, 0  ;;  %v19864_v26 = vsub.f32 %v2762_v35, %v19842_v44 }
  0xee   : > { %16770 = vmatprep.mubr.f32.mxu0 %v19705_v34  ;;  %v19818_v37 = vand.u32 4294901760, %v2756_v24  ;;  %v19857_v5 = vsub.f32 %v2759_v28, %v19835_v13 }
  0xef   : > { %v2884_v1 = vand.u32 4294901760, %v19864_v26 }
  0xf1   : > { %16771 = vmatmul.mubr.f32.gmra.mrb[6].mxu0 %v19713_v33  ;;  %v19796_v33 = vand.u32 4294901760, %v2750_v41 }
  0xf2   : > { %16775 = vmatprep.mubr.f32.mxu0 %v19603_v43 }
  0xf3   : > { %v19813_v60 = vsub.f32 %v2750_v41, %v19796_v33  ;;  %v2768_v41 = vsel %vm388_vm1, %v19828_v48, 0 }
  0xf4   : > { %v19866_v20 = vand.u32 4294901760, %v2768_v41 }
  0xf5   : > { %16776 = vmatmul.mubr.f32.vlgmr.msra.gmra.mrb[0].mxu0 %v19620_v51 }
  0xf6   : > { %16788 = vmatpush3.msra.mxu0 %v19575_v57  ;;  %16778 = vmatprep.mubr.f32.mxu0 %v19624_v15  ;;  %v19787_v57 = vand.u32 4294901760, %v19780_v11 }
  0xf7   : > { %16801 = vmatprep.subr.mxu0 %v19770_v2 }
  0xf8   : > { %v2926_v34 = vsub.f32 %v19780_v11, %v19787_v57 }
  0xf9   : > { %16779 = vmatmul.mubr.f32.gmra.mrb[2].mxu0 %v19635_v54 }
  0xfa   : > { %16781 = vmatprep.mubr.f32.mxu0 %v19642_v58  ;;  %v2927_v38 = vand.u32 4294901760, %v2926_v34  ;;  %v19840_v34 = vsub.f32 %v2756_v24, %v19818_v37 }
  0xfc   : > { %v21866_v40 = vand.u32 4294901760, %v19840_v34 }
  0xfd   : > { %16782 = vmatmul.mubr.f32.gmra.mrb[4].mxu0 %v19657_v49 }
  0xfe   : > { %16784 = vmatprep.mubr.f32.mxu0 %v19666_v47  ;;  %v2865_v29 = vsub.f32 %v19840_v34, %v21866_v40 }
 0x100   : > { %v2866_v18 = vand.u32 4294901760, %v2865_v29 }
 0x101   : > { %16785 = vmatmul.mubr.f32.gmra.mrb[6].mxu0 %v19678_v52 }
 0x102   : > { %16789 = vmatprep.mubr.f32.mxu0 %v19603_v43  ;;  %v19833_v43 = vsub.f32 %v2753_v12, %v19815_v4  ;;  %v19849_v12 = vld [vmem:[%s19268_s27 + $0x190] sm:$0xff] }
 0x104   : > { %v21859_v24 = vand.u32 4294901760, %v19833_v43 }
 0x105   : > { %16790 = vmatmul.mubr.f32.vlgmr.msra.gmra.mrb[0].mxu0 %v19620_v51  ;;  %v22018_v51 = vand.u32 4294901760, %v19813_v60 }
 0x106   : > { %16802 = vmatpush3.msra.mxu0 %v19770_v2  ;;  %16792 = vmatprep.mubr.f32.mxu0 %v19624_v15  ;;  %v2855_v28 = vsub.f32 %v19833_v43, %v21859_v24 }
 0x107   : > { %16815 = vmatprep.subr.mxu0 %v2927_v38  ;;  %v2845_v15 = vsub.f32 %v19813_v60, %v22018_v51  ;;  %v2874_v51 = vand.u32 4294901760, %v19857_v5 }
 0x108   : > { %v2856_v24 = vand.u32 4294901760, %v2855_v28 }
 0x109   : > { %16793 = vmatmul.mubr.f32.gmra.mrb[2].mxu0 %v19635_v54  ;;  %v2771_v54 = vsel %vm388_vm1, %v19849_v12, 0  ;;  %v2846_v35 = vand.u32 4294901760, %v2845_v15  ;;  %v2875_v50 = vsub.f32 %v19857_v5, %v2874_v51  ;;  %v2885_v15 = vsub.f32 %v19864_v26, %v2884_v1 }
 0x10a   : > { %16795 = vmatprep.mubr.f32.mxu0 %v19642_v58  ;;  %v2893_v58 = vsub.f32 %v2765_v36, %v19859_v39  ;;  %v19876_v27 = vand.u32 4294901760, %v2771_v54 }
 0x10b   : > { %v2876_v17 = vand.u32 4294901760, %v2875_v50  ;;  %v22020_v50 = vand.u32 4294901760, %v19833_v43 }
 0x10c   : > { %v2894_v22 = vand.u32 4294901760, %v2893_v58  ;;  %v2913_v36 = vsub.f32 %v2771_v54, %v19876_v27 }
 0x10d   : > { %16796 = vmatmul.mubr.f32.gmra.mrb[4].mxu0 %v19657_v49  ;;  %v2903_v49 = vsub.f32 %v2768_v41, %v19866_v20  ;;  %v2886_v41 = vand.u32 4294901760, %v2885_v15  ;;  %v15494_v15 = vld [vmem:[%s19268_s27 + $0x210] sm:$0xff] }
 0x10e   : > { %16798 = vmatprep.mubr.f32.mxu0 %v19666_v47  ;;  %v2895_v40 = vsub.f32 %v2893_v58, %v2894_v22  ;;  %v2914_v32 = vand.u32 4294901760, %v2913_v36 }
 0x10f   : > { %v2904_v47 = vand.u32 4294901760, %v2903_v49 }
 0x110   : > { %v2896_v28 = vand.u32 4294901760, %v2895_v40 }
 0x111   : > { %16799 = vmatmul.mubr.f32.gmra.mrb[6].mxu0 %v19678_v52  ;;  %v2905_v55 = vsub.f32 %v2903_v49, %v2904_v47  ;;  %v2915_v52 = vsub.f32 %v2913_v36, %v2914_v32 }
 0x112   : > { %16803 = vmatprep.mubr.f32.mxu0 %v2846_v35 }
 0x113   : > { %v2906_v54 = vand.u32 4294901760, %v2905_v55  ;;  %v2916_v29 = vand.u32 4294901760, %v2915_v52  ;;  %v22021_v55 = vand.u32 4294901760, %v19840_v34 }
 0x115   : > { %16804 = vmatmul.mubr.f32.vlgmr.msra.gmra.mrb[0].mxu0 %v2856_v24 }
 0x116   : > { %16816 = vmatpush3.msra.mxu0 %v2927_v38  ;;  %16806 = vmatprep.mubr.f32.mxu0 %v2866_v18  ;;  %v22019_v18 = vand.u32 4294901760, %v19813_v60 }
 0x117   : > { %16829 = vmatprep.subr.mxu0 %v19780_v11 }
 0x119   : > { %16807 = vmatmul.mubr.f32.gmra.mrb[2].mxu0 %v2876_v17 }
 0x11a   : > { %16809 = vmatprep.mubr.f32.mxu0 %v2886_v41 }
 0x11d   : > { %16810 = vmatmul.mubr.f32.gmra.mrb[4].mxu0 %v2896_v28 }
 0x11e   : > { %16812 = vmatprep.mubr.f32.mxu0 %v2906_v54 }
 0x121   : > { %16813 = vmatmul.mubr.f32.gmra.mrb[6].mxu0 %v2916_v29 }
 0x122   : > { %16817 = vmatprep.mubr.f32.mxu0 %v19796_v33 }
 0x125   : > { %16818 = vmatmul.mubr.f32.vlgmr.msra.gmra.mrb[0].mxu0 %v19815_v4 }
 0x126   : > { %16830 = vmatpush3.msra.mxu0 %v19780_v11  ;;  %16820 = vmatprep.mubr.f32.mxu0 %v19818_v37  ;;  %v15492_v11 = vld [vmem:[%s19268_s27 + $0x1f0] sm:$0xff] }
 0x127   : > { %16843 = vmatprep.subr.mxu0 %v19770_v2  ;;  %v3546_v35 = vsel %vm388_vm1, %v15492_v11, 0 }
 0x128   : > { %v19974_v29 = vand.u32 4294901760, %v3546_v35 }
 0x129   : > { %16821 = vmatmul.mubr.f32.gmra.mrb[2].mxu0 %v19835_v13 }
 0x12a   : > { %16823 = vmatprep.mubr.f32.mxu0 %v19842_v44  ;;  %22030 = vst [vmem:[#allocation77_spill] sm:$0xff] %v19974_v29 }
 0x12d   : > { %16824 = vmatmul.mubr.f32.gmra.mrb[4].mxu0 %v19859_v39 }
 0x12e   : > { %16826 = vmatprep.mubr.f32.mxu0 %v19866_v20 }
 0x131   : > { %16827 = vmatmul.mubr.f32.gmra.mrb[6].mxu0 %v19876_v27 }
 0x132   : > { %16831 = vmatprep.mubr.f32.mxu0 %v19813_v60  ;;  %v15490_v60 = vld [vmem:[%s19268_s27 + $0x1d0] sm:$0xff] }
 0x135   : > { %16832 = vmatmul.mubr.f32.vlgmr.msra.gmra.mrb[0].mxu0 %v19833_v43 }
 0x136   : > { %16844 = vmatpush3.msra.mxu0 %v19770_v2  ;;  %16834 = vmatprep.mubr.f32.mxu0 %v19840_v34 }
 0x137   : > { %16857 = vmatprep.subr.mxu0 %v19787_v57 }
 0x139   : > { %16835 = vmatmul.mubr.f32.gmra.mrb[2].mxu0 %v19857_v5  ;;  %v3540_v5 = vsel %vm388_vm1, %v15490_v60, 0 }
 0x13a   : > { %16837 = vmatprep.mubr.f32.mxu0 %v19864_v26  ;;  %v15499_v26 = vld [vmem:[%s21764_s1 + $0x10] sm:$0xf]  ;;  %v19954_v34 = vand.u32 4294901760, %v3540_v5 }
 0x13b   : > { %v3558_v17 = vsel %vm413_vm0, %v15499_v26, 0 }
 0x13c   : > { %v19919_v52 = vand.u32 4294901760, %v3558_v17  ;;  %22025 = vst [vmem:[#allocation72_spill] sm:$0xff] %v19954_v34 }
 0x13d   : > { %16838 = vmatmul.mubr.f32.gmra.mrb[4].mxu0 %v2893_v58 }
 0x13e   : > { %16840 = vmatprep.mubr.f32.mxu0 %v2903_v49  ;;  %v15489_v49 = vld [vmem:[%s19268_s27 + $0x1c0] sm:$0xff] }
 0x13f   : > { %v3537_v38 = vsel %vm388_vm1, %v15489_v49, 0 }
 0x140   : > { %v19951_v43 = vand.u32 4294901760, %v3537_v38 }
 0x141   : > { %16841 = vmatmul.mubr.f32.gmra.mrb[6].mxu0 %v2913_v36  ;;  %v15493_v36 = vld [vmem:[%s19268_s27 + $0x200] sm:$0xff] }
 0x142   : > { %16845 = vmatprep.mubr.f32.mxu0 %v22019_v18  ;;  %22024 = vst [vmem:[#allocation71_spill] sm:$0xff] %v19951_v43  ;;  %v19965_v28 = vsub.f32 %v3537_v38, %v19951_v43  ;;  %v3549_v18 = vsel %vm388_vm1, %v15493_v36, 0 }
 0x144   : > { %22027 = vst [vmem:[#allocation74_spill] sm:$0xff] %v19965_v28  ;;  %v19983_v26 = vand.u32 4294901760, %v19965_v28 }
 0x145   : > { %16846 = vmatmul.mubr.f32.vlgmr.msra.gmra.mrb[0].mxu0 %v22020_v50  ;;  %v15495_v50 = vld [vmem:[%s19268_s27 + $0x220] sm:$0xff] }
 0x146   : > { %16858 = vmatpush3.msra.mxu0 %v19787_v57  ;;  %16848 = vmatprep.mubr.f32.mxu0 %v22021_v55  ;;  %22031 = vst [vmem:[#allocation78_spill] sm:$0xff] %v19983_v26  ;;  %v3555_v49 = vsel %vm388_vm1, %v15495_v50, 0  ;;  %v3639_v60 = vsub.f32 %v19965_v28, %v19983_v26 }
 0x147   : > { %16871 = vmatprep.subr.mxu0 %v19770_v2 }
 0x149   : > { %16849 = vmatmul.mubr.f32.gmra.mrb[2].mxu0 %v2874_v51 }
 0x14a   : > { %16851 = vmatprep.mubr.f32.mxu0 %v2884_v1  ;;  %v19927_v1 = vsub.f32 %v3558_v17, %v19919_v52  ;;  %v19988_v17 = vand.u32 4294901760, %v3549_v18 }
 0x14c   : > { %v19933_v58 = vand.u32 4294901760, %v19927_v1  ;;  %22033 = vst [vmem:[#allocation80_spill] sm:$0xff] %v19988_v17 }
 0x14d   : > { %16852 = vmatmul.mubr.f32.gmra.mrb[4].mxu0 %v2894_v22  ;;  %v15488_v22 = vld [vmem:[%s19268_s27 + $0x1b0] sm:$0xff] }
 0x14e   : > { %16854 = vmatprep.mubr.f32.mxu0 %v2904_v47  ;;  %v3710_v40 = vsub.f32 %v19927_v1, %v19933_v58 }
 0x150   : > { %v3711_v51 = vand.u32 4294901760, %v3710_v40  ;;  %v20009_v40 = vand.u32 4294901760, %v3555_v49 }
 0x151   : > { %16855 = vmatmul.mubr.f32.gmra.mrb[6].mxu0 %v2914_v32  ;;  %v3534_v32 = vsel %vm388_vm1, %v15488_v22, 0 }
 0x152   : > { %16859 = vmatprep.mubr.f32.mxu0 %v19796_v33  ;;  %v19938_v47 = vand.u32 4294901760, %v3534_v32  ;;  %22039 = vst [vmem:[#allocation86_spill] sm:$0xff] %v20009_v40  ;;  %v20031_v36 = vsub.f32 %v3555_v49, %v20009_v40 }
 0x154   : > { %22022 = vst [vmem:[#allocation69_spill] sm:$0xff] %v19938_v47  ;;  %v19949_v57 = vsub.f32 %v3534_v32, %v19938_v47  ;;  %v19995_v32 = vsub.f32 %v3546_v35, %v19974_v29  ;;  %22044 = vst [vmem:[#allocation91_spill] sm:$0xff] %v20031_v36 }
 0x155   : > { %16860 = vmatmul.mubr.f32.vlgmr.msra.gmra.mrb[0].mxu0 %v19815_v4 }
 0x156   : > { %16872 = vmatpush3.msra.mxu0 %v19770_v2  ;;  %16862 = vmatprep.mubr.f32.mxu0 %v19818_v37  ;;  %v15491_v2 = vld [vmem:[%s19268_s27 + $0x1e0] sm:$0xff]  ;;  %22023 = vst [vmem:[#allocation70_spill] sm:$0xff] %v19949_v57  ;;  %v19962_v41 = vand.u32 4294901760, %v19949_v57  ;;  %22035 = vst [vmem:[#allocation82_spill] sm:$0xff] %v19995_v32 }
 0x157   : > { %16885 = vmatprep.subr.mxu0 %v19919_v52  ;;  %v3543_v24 = vsel %vm388_vm1, %v15491_v2, 0 }
 0x158   : > { %22026 = vst [vmem:[#allocation73_spill] sm:$0xff] %v19962_v41  ;;  %v19967_v54 = vand.u32 4294901760, %v3543_v24  ;;  %v3629_v55 = vsub.f32 %v19949_v57, %v19962_v41 }
 0x159   : > { %16863 = vmatmul.mubr.f32.gmra.mrb[2].mxu0 %v19835_v13 }
 0x15a   : > { %16865 = vmatprep.mubr.f32.mxu0 %v19842_v44  ;;  %22028 = vst [vmem:[#allocation75_spill] sm:$0xff] %v19967_v54 }
 0x15d   : > { %16866 = vmatmul.mubr.f32.gmra.mrb[4].mxu0 %v19859_v39 }
 0x15e   : > { %16868 = vmatprep.mubr.f32.mxu0 %v19866_v20 }
 0x161   : > { %16869 = vmatmul.mubr.f32.gmra.mrb[6].mxu0 %v19876_v27 }
 0x162   : > { %16873 = vmatprep.mubr.f32.mxu0 %v19796_v33  ;;  %v19972_v33 = vsub.f32 %v3540_v5, %v19954_v34  ;;  %v20012_v5 = vand.u32 4294901760, %v3629_v55  ;;  %v20047_v55 = vand.u32 4294901760, %v20031_v36 }
 0x164   : > { %22029 = vst [vmem:[#allocation76_spill] sm:$0xff] %v19972_v33  ;;  %v19992_v22 = vand.u32 4294901760, %v19972_v33  ;;  %22048 = vst [vmem:[#allocation95_spill] sm:$0xff] %v20047_v55 }
 0x165   : > { %16874 = vmatmul.mubr.f32.vlgmr.msra.gmra.mrb[0].mxu0 %v19815_v4  ;;  %v3552_v4 = vsel %vm388_vm1, %v15494_v15, 0 }
 0x166   : > { %16886 = vmatpush3.msra.mxu0 %v19919_v52  ;;  %16876 = vmatprep.mubr.f32.mxu0 %v19818_v37  ;;  %v19986_v37 = vsub.f32 %v3543_v24, %v19967_v54  ;;  %22034 = vst [vmem:[#allocation81_spill] sm:$0xff] %v19992_v22  ;;  %v3649_v2 = vsub.f32 %v19972_v33, %v19992_v22  ;;  %v20023_v24 = vand.u32 4294901760, %v3639_v60 }
 0x167   : > { %16899 = vmatprep.subr.mxu0 %v3711_v51 }
 0x168   : > { %22032 = vst [vmem:[#allocation79_spill] sm:$0xff] %v19986_v37  ;;  %v20004_v38 = vand.u32 4294901760, %v19986_v37  ;;  %22042 = vst [vmem:[#allocation89_spill] sm:$0xff] %v20023_v24  ;;  %v20034_v15 = vand.u32 4294901760, %v3649_v2 }
 0x169   : > { %16877 = vmatmul.mubr.f32.gmra.mrb[2].mxu0 %v19835_v13  ;;  %v19997_v13 = vand.u32 4294901760, %v3552_v4 }
 0x16a   : > { %16879 = vmatprep.mubr.f32.mxu0 %v19842_v44  ;;  %22037 = vst [vmem:[#allocation84_spill] sm:$0xff] %v20004_v38  ;;  %v20007_v44 = vsub.f32 %v3549_v18, %v19988_v17  ;;  %v3659_v35 = vsub.f32 %v19986_v37, %v20004_v38  ;;  %22045 = vst [vmem:[#allocation92_spill] sm:$0xff] %v20034_v15 }
 0x16b   : > { %22036 = vst [vmem:[#allocation83_spill] sm:$0xff] %v19997_v13  ;;  %v20020_v11 = vsub.f32 %v3552_v4, %v19997_v13 }
 0x16c   : > { %22038 = vst [vmem:[#allocation85_spill] sm:$0xff] %v20007_v44  ;;  %v20042_v4 = vand.u32 4294901760, %v3659_v35  ;;  %v3699_v35 = vsub.f32 %v20031_v36, %v20047_v55 }
 0x16d   : > { %16880 = vmatmul.mubr.f32.gmra.mrb[4].mxu0 %v19859_v39  ;;  %v20017_v39 = vand.u32 4294901760, %v19995_v32  ;;  %22041 = vst [vmem:[#allocation88_spill] sm:$0xff] %v20020_v11 }
 0x16e   : > { %16882 = vmatprep.mubr.f32.mxu0 %v19866_v20  ;;  %v20028_v20 = vand.u32 4294901760, %v20007_v44  ;;  %22047 = vst [vmem:[#allocation94_spill] sm:$0xff] %v20042_v4 }
 0x16f   : > { %22040 = vst [vmem:[#allocation87_spill] sm:$0xff] %v20017_v39  ;;  %v3669_v18 = vsub.f32 %v19995_v32, %v20017_v39 }
 0x170   : > { %22043 = vst [vmem:[#allocation90_spill] sm:$0xff] %v20028_v20  ;;  %v3679_v50 = vsub.f32 %v20007_v44, %v20028_v20 }
 0x171   : > { %16883 = vmatmul.mubr.f32.gmra.mrb[6].mxu0 %v19876_v27  ;;  %v20039_v27 = vand.u32 4294901760, %v20020_v11  ;;  %v20050_v49 = vand.u32 4294901760, %v3669_v18 }
 0x172   : > { %16887 = vmatprep.mubr.f32.mxu0 %v20012_v5  ;;  %v20056_v2 = vand.u32 4294901760, %v3679_v50  ;;  %v4323_v50 = vrot.slane %v19777_v42, 1 }
 0x173   : > { %22046 = vst [vmem:[#allocation93_spill] sm:$0xff] %v20039_v27  ;;  %22049 = vst [vmem:[#allocation96_spill] sm:$0xff] %v20050_v49  ;;  %v3689_v60 = vsub.f32 %v20020_v11, %v20039_v27 }
 0x174   : > { %22050 = vst [vmem:[#allocation97_spill] sm:$0xff] %v20056_v2 }
 0x175   : > { %16888 = vmatmul.mubr.f32.vlgmr.msra.gmra.mrb[0].mxu0 %v20023_v24  ;;  %v20061_v24 = vand.u32 4294901760, %v3689_v60 }
 0x176   : > { %16900 = vmatpush3.msra.mxu0 %v3711_v51  ;;  %16890 = vmatprep.mubr.f32.mxu0 %v20034_v15  ;;  %v20064_v51 = vand.u32 4294901760, %v3699_v35 }
 0x177   : > { %16913 = vmatprep.subr.mxu0 %v19927_v1  ;;  %22051 = vst [vmem:[#allocation98_spill] sm:$0xff] %v20061_v24 }
 0x178   : > { %22052 = vst [vmem:[#allocation99_spill] sm:$0xff] %v20064_v51 }
 0x179   : > { %16891 = vmatmul.mubr.f32.gmra.mrb[2].mxu0 %v20042_v4 }
 0x17a   : > { %16893 = vmatprep.mubr.f32.mxu0 %v20050_v49 }
 0x17d   : > { %16894 = vmatmul.mubr.f32.gmra.mrb[4].mxu0 %v20056_v2 }
 0x17e   : > { %16896 = vmatprep.mubr.f32.mxu0 %v20061_v24 }
 0x181   : > { %16897 = vmatmul.mubr.f32.gmra.mrb[6].mxu0 %v20064_v51 }
 0x182   : > { %16901 = vmatprep.mubr.f32.mxu0 %v19938_v47 }
 0x185   : > { %16902 = vmatmul.mubr.f32.vlgmr.msra.gmra.mrb[0].mxu0 %v19951_v43 }
 0x186   : > { %16914 = vmatpush3.msra.mxu0 %v19927_v1  ;;  %16904 = vmatprep.mubr.f32.mxu0 %v19954_v34  ;;  %v15500_v1 = vld [vmem:[%s21764_s1 + $0x14] sm:$0xf] }
 0x187   : > { %16927 = vmatprep.subr.mxu0 %v19919_v52  ;;  %v4366_v18 = vsel %vm413_vm0, %v15500_v1, 0  ;;  %v4326_v1 = vrot.slane %v19790_v14, 1 }
 0x188   : > { %v20105_v60 = vand.u32 4294901760, %v4366_v18 }
 0x189   : > { %16905 = vmatmul.mubr.f32.gmra.mrb[2].mxu0 %v19967_v54 }
 0x18a   : > { %16907 = vmatprep.mubr.f32.mxu0 %v19974_v29  ;;  %v20116_v42 = vsub.f32 %v4366_v18, %v20105_v60 }
 0x18d   : > { %16908 = vmatmul.mubr.f32.gmra.mrb[4].mxu0 %v19988_v17 }
 0x18e   : > { %16910 = vmatprep.mubr.f32.mxu0 %v19997_v13 }
 0x191   : > { %16911 = vmatmul.mubr.f32.gmra.mrb[6].mxu0 %v20009_v40 }
 0x192   : > { %16915 = vmatprep.mubr.f32.mxu0 %v19949_v57 }
 0x195   : > { %16916 = vmatmul.mubr.f32.vlgmr.msra.gmra.mrb[0].mxu0 %v19965_v28 }
 0x196   : > { %16928 = vmatpush3.msra.mxu0 %v19919_v52  ;;  %16918 = vmatprep.mubr.f32.mxu0 %v19972_v33 }
 0x197   : > { %16941 = vmatprep.subr.mxu0 %v19933_v58 }
 0x199   : > { %16919 = vmatmul.mubr.f32.gmra.mrb[2].mxu0 %v19986_v37 }
 0x19a   : > { %16921 = vmatprep.mubr.f32.mxu0 %v19995_v32  ;;  %v4344_v32 = vrot.slane %v19849_v12, 1 }
 0x19d   : > { %16922 = vmatmul.mubr.f32.gmra.mrb[4].mxu0 %v20007_v44  ;;  %v15487_v44 = vld [vmem:[%s19268_s27 + $0x198] sm:$0x1] }
 0x19e   : > { %16924 = vmatprep.mubr.f32.mxu0 %v20020_v11 }
 0x1a1   : > { %16925 = vmatmul.mubr.f32.gmra.mrb[6].mxu0 %v20031_v36 }
 0x1a2   : > { %16929 = vmatprep.mubr.f32.mxu0 %v19962_v41  ;;  %v15483_v41 = vld [vmem:[%s19268_s27 + $0x178] sm:$0x1] }
 0x1a5   : > { %16930 = vmatmul.mubr.f32.vlgmr.msra.gmra.mrb[0].mxu0 %v19983_v26  ;;  %v4332_v26 = vrot.slane %v19806_v3, 1  ;;  %v4338_v3 = vrot.slane %v19825_v59, 1 }
 0x1a6   : > { %16942 = vmatpush3.msra.mxu0 %v19933_v58  ;;  %16932 = vmatprep.mubr.f32.mxu0 %v19992_v22  ;;  %v15473_v58 = vld [vmem:[%s19268_s27 + $0x128] sm:$0x1]  ;;  %v15479_v22 = vld [vmem:[%s19268_s27 + $0x158] sm:$0x1] }
 0x1a7   : > { %16955 = vmatprep.subr.mxu0 %v19919_v52  ;;  %v4324_v35 = vrot.slane %v15473_v58, 1  ;;  %v4329_v58 = vrot.slane %v19793_v25, 1  ;;  %v4335_v25 = vrot.slane %v19809_v53, 1 }
 0x1a9   : > { %16933 = vmatmul.mubr.f32.gmra.mrb[2].mxu0 %v20004_v38 }
 0x1aa   : > { %16935 = vmatprep.mubr.f32.mxu0 %v20017_v39  ;;  %v15477_v39 = vld [vmem:[%s19268_s27 + $0x148] sm:$0x1] }
 0x1ab   : > { %v4330_v38 = vrot.slane %v15477_v39, 1 }
 0x1ad   : > { %16936 = vmatmul.mubr.f32.gmra.mrb[4].mxu0 %v20028_v20  ;;  %v15475_v20 = vld [vmem:[%s19268_s27 + $0x138] sm:$0x1]  ;;  %v4331_v39 = vsel %vm1946_vm2, %v4329_v58, %v4330_v38 }
 0x1ae   : > { %16938 = vmatprep.mubr.f32.mxu0 %v20039_v27  ;;  %v4327_v27 = vrot.slane %v15475_v20, 1  ;;  %v4333_v20 = vrot.slane %v15479_v22, 1  ;;  %v4353_v53 = vsel %vm388_vm1, %v4331_v39, 0 }
 0x1af   : > { %v20154_v39 = vand.u32 4294901760, %v4353_v53 }
 0x1b0   : > { %v4328_v18 = vsel %vm1946_vm2, %v4326_v1, %v4327_v27  ;;  %v4334_v38 = vsel %vm1946_vm2, %v4332_v26, %v4333_v20  ;;  %v4339_v27 = vrot.slane %v15483_v41, 1  ;;  %v4341_v1 = vrot.slane %v19828_v48, 1 }
 0x1b1   : > { %16939 = vmatmul.mubr.f32.gmra.mrb[6].mxu0 %v20047_v55  ;;  %v4325_v55 = vsel %vm1946_vm2, %v4323_v50, %v4324_v35  ;;  %v20126_v50 = vand.u32 4294901760, %v20116_v42  ;;  %v4351_v11 = vsel %vm388_vm1, %v4328_v18, 0  ;;  %v4355_v41 = vsel %vm388_vm1, %v4334_v38, 0 }
 0x1b2   : > { %16943 = vmatprep.mubr.f32.mxu0 %v19938_v47  ;;  %v4349_v14 = vsel %vm388_vm1, %v4325_v55, 0  ;;  %v15485_v55 = vld [vmem:[%s19268_s27 + $0x188] sm:$0x1]  ;;  %v20150_v18 = vand.u32 4294901760, %v4351_v11  ;;  %v4340_v20 = vsel %vm1946_vm2, %v4338_v3, %v4339_v27 }
 0x1b3   : > { %v20133_v36 = vand.u32 4294901760, %v4349_v14  ;;  %v4518_v22 = vsub.f32 %v20116_v42, %v20126_v50 }
 0x1b4   : > { %v20163_v12 = vsub.f32 %v4351_v11, %v20150_v18 }
 0x1b5   : > { %16944 = vmatmul.mubr.f32.vlgmr.msra.gmra.mrb[0].mxu0 %v19951_v43  ;;  %v20148_v59 = vsub.f32 %v4349_v14, %v20133_v36  ;;  %v4519_v48 = vand.u32 4294901760, %v4518_v22  ;;  %v20170_v22 = vsub.f32 %v4353_v53, %v20154_v39 }
 0x1b6   : > { %16956 = vmatpush3.msra.mxu0 %v19919_v52  ;;  %16946 = vmatprep.mubr.f32.mxu0 %v19954_v34  ;;  %v15481_v52 = vld [vmem:[%s19268_s27 + $0x168] sm:$0x1] }
 0x1b7   : > { %16969 = vmatprep.subr.mxu0 %v20105_v60  ;;  %v4336_v35 = vrot.slane %v15481_v52, 1  ;;  %v4342_v52 = vrot.slane %v15485_v55, 1  ;;  %v21884_v14 = vand.u32 4294901760, %v20148_v59  ;;  %v20165_v55 = vand.u32 4294901760, %v4355_v41 }
 0x1b9   : > { %16947 = vmatmul.mubr.f32.gmra.mrb[2].mxu0 %v19967_v54  ;;  %v4337_v58 = vsel %vm1946_vm2, %v4335_v25, %v4336_v35  ;;  %v4345_v25 = vrot.slane %v15487_v44, 1  ;;  %v4343_v35 = vsel %vm1946_vm2, %v4341_v1, %v4342_v52  ;;  %v4359_v44 = vsel %vm388_vm1, %v4340_v20, 0 }
 0x1ba   : > { %16949 = vmatprep.mubr.f32.mxu0 %v19974_v29  ;;  %v4357_v26 = vsel %vm388_vm1, %v4337_v58, 0  ;;  %v4361_v38 = vsel %vm388_vm1, %v4343_v35, 0  ;;  %v4437_v11 = vsub.f32 %v20148_v59, %v21884_v14  ;;  %v21888_v1 = vand.u32 4294901760, %v20163_v12 }
 0x1bb   : > { %v20172_v3 = vand.u32 4294901760, %v4357_v26  ;;  %v4346_v27 = vsel %vm1946_vm2, %v4344_v32, %v4345_v25  ;;  %v20183_v53 = vsub.f32 %v4355_v41, %v20165_v55  ;;  %v20185_v58 = vand.u32 4294901760, %v4359_v44 }
 0x1bc   : > { %v21898_v52 = vand.u32 4294901760, %v20170_v22  ;;  %v20192_v32 = vand.u32 4294901760, %v4361_v38  ;;  %v4363_v25 = vsel %vm388_vm1, %v4346_v27, 0  ;;  %v4447_v41 = vsub.f32 %v20163_v12, %v21888_v1 }
 0x1bd   : > { %16950 = vmatmul.mubr.f32.gmra.mrb[4].mxu0 %v19988_v17  ;;  %v20190_v20 = vsub.f32 %v4357_v26, %v20172_v3  ;;  %v4466_v35 = vand.u32 4294901760, %v20183_v53  ;;  %v4485_v14 = vsub.f32 %v4359_v44, %v20185_v58  ;;  %v20201_v37 = vand.u32 4294901760, %v4363_v25 }
 0x1be   : > { %16952 = vmatprep.mubr.f32.mxu0 %v19997_v13  ;;  %v4438_v26 = vand.u32 4294901760, %v4437_v11  ;;  %v4457_v33 = vsub.f32 %v20170_v22, %v21898_v52  ;;  %v4495_v28 = vsub.f32 %v4361_v38, %v20192_v32  ;;  %v4448_v1 = vand.u32 4294901760, %v4447_v41 }
 0x1bf   : > { %v4476_v27 = vand.u32 4294901760, %v20190_v20  ;;  %v4467_v57 = vsub.f32 %v20183_v53, %v4466_v35  ;;  %v4505_v44 = vsub.f32 %v4363_v25, %v20201_v37 }
 0x1c1   : > { %16953 = vmatmul.mubr.f32.gmra.mrb[6].mxu0 %v20009_v40  ;;  %v4477_v11 = vsub.f32 %v20190_v20, %v4476_v27 }
 0x1c2   : > { %16957 = vmatprep.mubr.f32.mxu0 %v19938_v47 }
 0x1c3   : > { %v4478_v38 = vand.u32 4294901760, %v4477_v11  ;;  %v22072_v11 = vld [vmem:[#allocation22_spill] sm:$0xff] }
 0x1c5   : > { %16958 = vmatmul.mubr.f32.vlgmr.msra.gmra.mrb[0].mxu0 %v19951_v43 }
 0x1c6   : > { %16970 = vmatpush3.msra.mxu0 %v20105_v60  ;;  %16960 = vmatprep.mubr.f32.mxu0 %v19954_v34  ;;  %v4506_v34 = vand.u32 4294901760, %v4505_v44 }
 0x1c7   : > { %16983 = vmatprep.subr.mxu0 %v4519_v48 }
 0x1c9   : > { %16961 = vmatmul.mubr.f32.gmra.mrb[2].mxu0 %v19967_v54  ;;  %v4468_v54 = vand.u32 4294901760, %v4467_v57  ;;  %v22053_v57 = vand.u32 4294901760, %v20148_v59 }
 0x1ca   : > { %16963 = vmatprep.mubr.f32.mxu0 %v19974_v29  ;;  %v4458_v29 = vand.u32 4294901760, %v4457_v33 }
 0x1cd   : > { %16964 = vmatmul.mubr.f32.gmra.mrb[4].mxu0 %v19988_v17  ;;  %v4486_v17 = vand.u32 4294901760, %v4485_v14 }
 0x1ce   : > { %16966 = vmatprep.mubr.f32.mxu0 %v19997_v13  ;;  %v4496_v13 = vand.u32 4294901760, %v4495_v28 }
 0x1cf   : > { %v4487_v52 = vsub.f32 %v4485_v14, %v4486_v17 }
 0x1d0   : > { %v4497_v43 = vsub.f32 %v4495_v28, %v4496_v13 }
 0x1d1   : > { %16967 = vmatmul.mubr.f32.gmra.mrb[6].mxu0 %v20009_v40  ;;  %v4488_v41 = vand.u32 4294901760, %v4487_v52  ;;  %v4507_v40 = vsub.f32 %v4505_v44, %v4506_v34 }
 0x1d2   : > { %16971 = vmatprep.mubr.f32.mxu0 %v4438_v26  ;;  %v4498_v25 = vand.u32 4294901760, %v4497_v43  ;;  %v22054_v43 = vand.u32 4294901760, %v20163_v12 }
 0x1d3   : > { %v4508_v33 = vand.u32 4294901760, %v4507_v40 }
 0x1d5   : > { %16972 = vmatmul.mubr.f32.vlgmr.msra.gmra.mrb[0].mxu0 %v4448_v1 }
 0x1d6   : > { %16984 = vmatpush3.msra.mxu0 %v4519_v48  ;;  %16974 = vmatprep.mubr.f32.mxu0 %v4458_v29 }
 0x1d7   : > { %16997 = vmatprep.subr.mxu0 %v20116_v42 }
 0x1d9   : > { %16975 = vmatmul.mubr.f32.gmra.mrb[2].mxu0 %v4468_v54  ;;  %v22055_v54 = vand.u32 4294901760, %v20170_v22 }
 0x1da   : > { %16977 = vmatprep.mubr.f32.mxu0 %v4478_v38  ;;  %v22073_v38 = vld [vmem:[#allocation16_spill] sm:$0xff] }
 0x1dd   : > { %16978 = vmatmul.mubr.f32.gmra.mrb[4].mxu0 %v4488_v41  ;;  %v516_v41 = vsub.f32 %v22073_v38, %v22072_v11 }
 0x1de   : > { %16980 = vmatprep.mubr.f32.mxu0 %v4498_v25 }
 0x1e1   : > { %16981 = vmatmul.mubr.f32.gmra.mrb[6].mxu0 %v4508_v33 }
 0x1e2   : > { %16985 = vmatprep.mubr.f32.mxu0 %v20133_v36 }
 0x1e5   : > { %16986 = vmatmul.mubr.f32.vlgmr.msra.gmra.mrb[0].mxu0 %v20150_v18 }
 0x1e6   : > { %16998 = vmatpush3.msra.mxu0 %v20116_v42  ;;  %16988 = vmatprep.mubr.f32.mxu0 %v20154_v39  ;;  %v20261_v42 = vld [vmem:[%s19268_s27 + $0x80] sm:$0xff] }
 0x1e7   : > { %17011 = vmatprep.subr.mxu0 %v20105_v60 }
 0x1e9   : > { %16989 = vmatmul.mubr.f32.gmra.mrb[2].mxu0 %v20165_v55 }
 0x1ea   : > { %16991 = vmatprep.mubr.f32.mxu0 %v20172_v3 }
 0x1ed   : > { %16992 = vmatmul.mubr.f32.gmra.mrb[4].mxu0 %v20185_v58 }
 0x1ee   : > { %16994 = vmatprep.mubr.f32.mxu0 %v20192_v32 }
 0x1f1   : > { %16995 = vmatmul.mubr.f32.gmra.mrb[6].mxu0 %v20201_v37 }
 0x1f2   : > { %16999 = vmatprep.mubr.f32.mxu0 %v20148_v59 }
 0x1f5   : > { %17000 = vmatmul.mubr.f32.vlgmr.msra.gmra.mrb[0].mxu0 %v20163_v12 }
 0x1f6   : > { %17012 = vmatpush3.msra.mxu0 %v20105_v60  ;;  %17002 = vmatprep.mubr.f32.mxu0 %v20170_v22  ;;  %v22066_v22 = vld [vmem:[#allocation19_spill] sm:$0xff] }
 0x1f7   : > { %17025 = vmatprep.subr.mxu0 %v20126_v50 }
 0x1f9   : > { %17003 = vmatmul.mubr.f32.gmra.mrb[2].mxu0 %v20183_v53  ;;  %v22068_v53 = vld [vmem:[#allocation20_spill] sm:$0xff] }
 0x1fa   : > { %17005 = vmatprep.mubr.f32.mxu0 %v20190_v20 }
 0x1fd   : > { %17006 = vmatmul.mubr.f32.gmra.mrb[4].mxu0 %v4485_v14 }
 0x1fe   : > { %17008 = vmatprep.mubr.f32.mxu0 %v4495_v28  ;;  %v15501_v28 = vld [vmem:[%s21764_s1 + $0x18] sm:$0xf] }
 0x1ff   : > { %v5129_v29 = vsel %vm413_vm0, %v15501_v28, 0  ;;  %v22076_v28 = vld [vmem:[#allocation27_spill] sm:$0xff] }
 0x200   : > { %v20244_v40 = vand.u32 4294901760, %v5129_v29 }
 0x201   : > { %17009 = vmatmul.mubr.f32.gmra.mrb[6].mxu0 %v4505_v44 }
 0x202   : > { %17013 = vmatprep.mubr.f32.mxu0 %v22053_v57  ;;  %v22074_v57 = vld [vmem:[#allocation25_spill] sm:$0xff] }
 0x205   : > { %17014 = vmatmul.mubr.f32.vlgmr.msra.gmra.mrb[0].mxu0 %v22054_v43  ;;  %v22075_v43 = vld [vmem:[#allocation21_spill] sm:$0xff] }
 0x206   : > { %17026 = vmatpush3.msra.mxu0 %v20126_v50  ;;  %17016 = vmatprep.mubr.f32.mxu0 %v22055_v54  ;;  %v5126_v50 = vsel %vm388_vm1, %v20261_v42, 0  ;;  %v526_v54 = vsub.f32 %v22075_v43, %v22074_v57 }
 0x207   : > { %17039 = vmatprep.subr.mxu0 %v20105_v60 }
 0x209   : > { %17017 = vmatmul.mubr.f32.gmra.mrb[2].mxu0 %v4466_v35 }
 0x20a   : > { %17019 = vmatprep.mubr.f32.mxu0 %v4476_v27 }
 0x20d   : > { %17020 = vmatmul.mubr.f32.gmra.mrb[4].mxu0 %v4486_v17  ;;  %v5279_v17 = vsub.f32 %v5129_v29, %v20244_v40  ;;  %v22077_v29 = vld [vmem:[#allocation23_spill] sm:$0xff] }
 0x20e   : > { %17022 = vmatprep.mubr.f32.mxu0 %v4496_v13 }
 0x211   : > { %17023 = vmatmul.mubr.f32.gmra.mrb[6].mxu0 %v4506_v34  ;;  %v5280_v34 = vand.u32 4294901760, %v5279_v17 }
 0x212   : > { %17027 = vmatprep.mubr.f32.mxu0 %v20133_v36 }
 0x213   : > { %v5281_v13 = vsub.f32 %v5279_v17, %v5280_v34 }
 0x215   : > { %17028 = vmatmul.mubr.f32.vlgmr.msra.gmra.mrb[0].mxu0 %v20150_v18 }
 0x216   : > { %17040 = vmatpush3.msra.mxu0 %v20105_v60  ;;  %17030 = vmatprep.mubr.f32.mxu0 %v20154_v39  ;;  %v5282_v60 = vand.u32 4294901760, %v5281_v13  ;;  %v22079_v13 = vld [vmem:[#allocation26_spill] sm:$0xff] }
 0x217   : > { %17053 = vmatprep.subr.mxu0 %v20244_v40 }
 0x219   : > { %17031 = vmatmul.mubr.f32.gmra.mrb[2].mxu0 %v20165_v55 }
 0x21a   : > { %17033 = vmatprep.mubr.f32.mxu0 %v20172_v3 }
 0x21d   : > { %17034 = vmatmul.mubr.f32.gmra.mrb[4].mxu0 %v20185_v58 }
 0x21e   : > { %17036 = vmatprep.mubr.f32.mxu0 %v20192_v32 }
 0x221   : > { %17037 = vmatmul.mubr.f32.gmra.mrb[6].mxu0 %v20201_v37 }
 0x222   : > { %17041 = vmatprep.mubr.f32.mxu0 %v20133_v36  ;;  %v20268_v36 = vand.u32 4294901760, %v5126_v50 }
 0x224   : > { %v5268_v59 = vsub.f32 %v5126_v50, %v20268_v36  ;;  %v15471_v50 = vld [vmem:[%s19268_s27 + $0x110] sm:$0xff] }
 0x225   : > { %17042 = vmatmul.mubr.f32.vlgmr.msra.gmra.mrb[0].mxu0 %v20150_v18 }
 0x226   : > { %17054 = vmatpush3.msra.mxu0 %v20244_v40  ;;  %17044 = vmatprep.mubr.f32.mxu0 %v20154_v39  ;;  %v5269_v18 = vand.u32 4294901760, %v5268_v59 }
 0x227   : > { %17067 = vmatprep.subr.mxu0 %v5282_v60 }
 0x228   : > { %v5270_v39 = vsub.f32 %v5268_v59, %v5269_v18 }
 0x229   : > { %17045 = vmatmul.mubr.f32.gmra.mrb[2].mxu0 %v20165_v55 }
 0x22a   : > { %17047 = vmatprep.mubr.f32.mxu0 %v20172_v3  ;;  %v5271_v48 = vand.u32 4294901760, %v5270_v39  ;;  %v22067_v3 = vld [vmem:[#allocation13_spill] sm:$0xff]  ;;  %v5889_v39 = vsel %vm388_vm1, %v15471_v50, 0  ;;  %v22106_v50 = vld [vmem:[#allocation43_spill] sm:$0xff] }
 0x22b   : > { %v496_v1 = vsub.f32 %v22067_v3, %v22066_v22 }
 0x22d   : > { %17048 = vmatmul.mubr.f32.gmra.mrb[4].mxu0 %v20185_v58  ;;  %v22069_v58 = vld [vmem:[#allocation14_spill] sm:$0xff]  ;;  %v497_v44 = vand.u32 4294901760, %v496_v1  ;;  %v22091_v1 = vld [vmem:[#allocation24_spill] sm:$0xff] }
 0x22e   : > { %17050 = vmatprep.mubr.f32.mxu0 %v20192_v32  ;;  %v506_v52 = vsub.f32 %v22069_v58, %v22068_v53  ;;  %v22070_v32 = vld [vmem:[#allocation12_spill] sm:$0xff] }
 0x22f   : > { %v22071_v35 = vand.u32 4294901760, %v22070_v32 }
 0x230   : > { %v507_v25 = vand.u32 4294901760, %v506_v52  ;;  %v348_v52 = vld [vmem:[%s19268_s27 + $0x88] sm:$0x1] }
 0x231   : > { %17051 = vmatmul.mubr.f32.gmra.mrb[6].mxu0 %v20201_v37  ;;  %v486_v26 = vsub.f32 %v22070_v32, %v22071_v35 }
 0x232   : > { %17055 = vmatprep.mubr.f32.mxu0 %v19493_v6  ;;  %v22058_v6 = vld [vmem:[#allocation38_spill] sm:$0xff] }
 0x233   : > { %v487_v27 = vand.u32 4294901760, %v486_v26 }
 0x235   : > { %17056 = vmatmul.mubr.f32.vlgmr.msra.gmra.mrb[0].mxu0 %v19503_v30  ;;  %v22057_v30 = vld [vmem:[#allocation36_spill] sm:$0xff]  ;;  %16551 = vmatprep.mubr.f32.mxu1 %v487_v27 }
 0x236   : > { %17068 = vmatpush3.msra.mxu0 %v5282_v60  ;;  %17058 = vmatprep.mubr.f32.mxu0 %v19511_v46  ;;  %v22059_v46 = vld [vmem:[#allocation31_spill] sm:$0xff] }
 0x237   : > { %17081 = vmatprep.subr.mxu0 %v5279_v17  ;;  %16552 = vmatmul.mubr.f32.vlgmr.msra.gmra.mrb[0].mxu1 %v497_v44 }
 0x238   : > { %16554 = vmatprep.mubr.f32.mxu1 %v507_v25 }
 0x239   : > { %17059 = vmatmul.mubr.f32.gmra.mrb[2].mxu0 %v19519_v45  ;;  %v22060_v45 = vld [vmem:[#allocation32_spill] sm:$0xff] }
 0x23a   : > { %17061 = vmatprep.mubr.f32.mxu0 %v19525_v63  ;;  %v15502_v63 = vld [vmem:[%s21764_s1 + $0x1c] sm:$0xf] }
 0x23b   : > { %v5892_v37 = vsel %vm413_vm0, %v15502_v63, 0  ;;  %v22089_v63 = vld [vmem:[#allocation17_spill] sm:$0xff] }
 0x23c   : > { %v20310_v14 = vand.u32 4294901760, %v5892_v37 }
 0x23d   : > { %17062 = vmatmul.mubr.f32.gmra.mrb[4].mxu0 %v19530_v16  ;;  %v22056_v16 = vld [vmem:[#allocation34_spill] sm:$0xff] }
 0x23e   : > { %17064 = vmatprep.mubr.f32.mxu0 %v19533_v0  ;;  %v22065_v0 = vld [vmem:[#allocation40_spill] sm:$0xff]  ;;  %v20317_v12 = vsub.f32 %v5892_v37, %v20310_v14  ;;  %v22090_v37 = vld [vmem:[#allocation18_spill] sm:$0xff] }
 0x240   : > { %v20322_v55 = vand.u32 4294901760, %v20317_v12 }
 0x241   : > { %17065 = vmatmul.mubr.f32.gmra.mrb[6].mxu0 %v5271_v48 }
 0x242   : > { %17069 = vmatprep.mubr.f32.mxu0 %v19413_v61  ;;  %v6044_v20 = vsub.f32 %v20317_v12, %v20322_v55 }
 0x244   : > { %v6045_v33 = vand.u32 4294901760, %v6044_v20 }
 0x245   : > { %17070 = vmatmul.mubr.f32.vlgmr.msra.gmra.mrb[0].mxu0 %v19416_v62 }
 0x246   : > { %17082 = vmatpush3.msra.mxu0 %v5279_v17  ;;  %17072 = vmatprep.mubr.f32.mxu0 %v19433_v8  ;;  %v527_v17 = vand.u32 4294901760, %v526_v54 }
 0x247   : > { %17095 = vmatprep.subr.mxu0 %v20244_v40 }
 0x249   : > { %17073 = vmatmul.mubr.f32.gmra.mrb[2].mxu0 %v19440_v10 }
 0x24a   : > { %17075 = vmatprep.mubr.f32.mxu0 %v19459_v21 }
 0x24d   : > { %17076 = vmatmul.mubr.f32.gmra.mrb[4].mxu0 %v19468_v31 }
 0x24e   : > { %17078 = vmatprep.mubr.f32.mxu0 %v19481_v56 }
 0x251   : > { %17079 = vmatmul.mubr.f32.gmra.mrb[6].mxu0 %v20268_v36 }
 0x252   : > { %17083 = vmatprep.mubr.f32.mxu0 %v19431_v7  ;;  %v22061_v7 = vld [vmem:[#allocation33_spill] sm:$0xff] }
 0x255   : > { %17084 = vmatmul.mubr.f32.vlgmr.msra.gmra.mrb[0].mxu0 %v19438_v9  ;;  %v22062_v9 = vld [vmem:[#allocation35_spill] sm:$0xff] }
 0x256   : > { %17096 = vmatpush3.msra.mxu0 %v20244_v40  ;;  %17086 = vmatprep.mubr.f32.mxu0 %v19457_v19  ;;  %v22063_v19 = vld [vmem:[#allocation37_spill] sm:$0xff] }
 0x257   : > { %17109 = vmatprep.subr.mxu0 %v5280_v34 }
 0x259   : > { %17087 = vmatmul.mubr.f32.gmra.mrb[2].mxu0 %v19466_v23  ;;  %v22064_v23 = vld [vmem:[#allocation39_spill] sm:$0xff] }
 0x25a   : > { %17089 = vmatprep.mubr.f32.mxu0 %v22056_v16  ;;  %v20355_v16 = vand.u32 4294901760, %v5889_v39 }
 0x25d   : > { %17090 = vmatmul.mubr.f32.gmra.mrb[4].mxu0 %v22057_v30 }
 0x25e   : > { %17092 = vmatprep.mubr.f32.mxu0 %v22058_v6  ;;  %v22083_v6 = vld [vmem:[#allocation6_spill] sm:$0xff] }
 0x261   : > { %17093 = vmatmul.mubr.f32.gmra.mrb[6].mxu0 %v5268_v59  ;;  %v22080_v59 = vld [vmem:[#allocation30_spill] sm:$0xff] }
 0x262   : > { %17097 = vmatprep.mubr.f32.mxu0 %v22059_v46 }
 0x265   : > { %17098 = vmatmul.mubr.f32.vlgmr.msra.gmra.mrb[0].mxu0 %v22060_v45  ;;  %v20362_v45 = vsub.f32 %v5889_v39, %v20355_v16  ;;  %v22111_v39 = vld [vmem:[#allocation57_spill] sm:$0xff] }
 0x266   : > { %17110 = vmatpush3.msra.mxu0 %v5280_v34  ;;  %17100 = vmatprep.mubr.f32.mxu0 %v22061_v7  ;;  %v22078_v34 = vld [vmem:[#allocation29_spill] sm:$0xff]  ;;  %v22084_v7 = vld [vmem:[#allocation8_spill] sm:$0xff] }
 0x267   : > { %17123 = vmatprep.subr.mxu0 %v20244_v40  ;;  %v546_v60 = vsub.f32 %v22079_v13, %v22078_v34 }
 0x269   : > { %17101 = vmatmul.mubr.f32.gmra.mrb[2].mxu0 %v22062_v9  ;;  %v547_v48 = vand.u32 4294901760, %v546_v60  ;;  %v22086_v9 = vld [vmem:[#allocation10_spill] sm:$0xff]  ;;  %v22105_v60 = vld [vmem:[#allocation55_spill] sm:$0xff] }
 0x26a   : > { %17103 = vmatprep.mubr.f32.mxu0 %v22063_v19 }
 0x26d   : > { %17104 = vmatmul.mubr.f32.gmra.mrb[4].mxu0 %v22064_v23  ;;  %v22088_v23 = vld [vmem:[#allocation15_spill] sm:$0xff] }
 0x26e   : > { %17106 = vmatprep.mubr.f32.mxu0 %v22065_v0 }
 0x271   : > { %17107 = vmatmul.mubr.f32.gmra.mrb[6].mxu0 %v5269_v18  ;;  %v22081_v18 = vld [vmem:[#allocation28_spill] sm:$0xff] }
 0x272   : > { %17111 = vmatprep.mubr.f32.mxu0 %v19413_v61 }
 0x275   : > { %17112 = vmatmul.mubr.f32.vlgmr.msra.gmra.mrb[0].mxu0 %v19416_v62 }
 0x276   : > { %17124 = vmatpush3.msra.mxu0 %v20244_v40  ;;  %17114 = vmatprep.mubr.f32.mxu0 %v19433_v8  ;;  %v536_v40 = vsub.f32 %v22077_v29, %v22076_v28 }
 0x277   : > { %17137 = vmatprep.subr.mxu0 %v20310_v14 }
 0x279   : > { %17115 = vmatmul.mubr.f32.gmra.mrb[2].mxu0 %v19440_v10 }
 0x27a   : > { %17117 = vmatprep.mubr.f32.mxu0 %v19459_v21 }
 0x27d   : > { %17118 = vmatmul.mubr.f32.gmra.mrb[4].mxu0 %v19468_v31 }
 0x27e   : > { %17120 = vmatprep.mubr.f32.mxu0 %v19481_v56 }
 0x281   : > { %17121 = vmatmul.mubr.f32.gmra.mrb[6].mxu0 %v20268_v36 }
 0x282   : > { %17125 = vmatprep.mubr.f32.mxu0 %v19413_v61  ;;  %v517_v61 = vand.u32 4294901760, %v516_v41  ;;  %v22094_v41 = vld [vmem:[#allocation63_spill] sm:$0xff] }
 0x284   : > { %16555 = vmatmul.mubr.f32.gmra.mrb[2].mxu1 %v517_v61 }
 0x285   : > { %17126 = vmatmul.mubr.f32.vlgmr.msra.gmra.mrb[0].mxu0 %v19416_v62  ;;  %16557 = vmatprep.mubr.f32.mxu1 %v527_v17  ;;  %v537_v62 = vand.u32 4294901760, %v536_v40  ;;  %v22101_v40 = vld [vmem:[#allocation44_spill] sm:$0xff] }
 0x286   : > { %17138 = vmatpush3.msra.mxu0 %v20310_v14  ;;  %17128 = vmatprep.mubr.f32.mxu0 %v19433_v8  ;;  %v556_v8 = vsub.f32 %v22081_v18, %v22080_v59 }
 0x287   : > { %17151 = vmatprep.subr.mxu0 %v6045_v33 }
 0x288   : > { %16558 = vmatmul.mubr.f32.gmra.mrb[4].mxu1 %v537_v62  ;;  %v557_v30 = vand.u32 4294901760, %v556_v8  ;;  %v22110_v8 = vld [vmem:[#allocation54_spill] sm:$0xff] }
 0x289   : > { %17129 = vmatmul.mubr.f32.gmra.mrb[2].mxu0 %v19440_v10  ;;  %16560 = vmatprep.mubr.f32.mxu1 %v547_v48  ;;  %v22082_v10 = vld [vmem:[#allocation7_spill] sm:$0xff] }
 0x28a   : > { %17131 = vmatprep.mubr.f32.mxu0 %v19459_v21  ;;  %v567_v46 = vsub.f32 %v22083_v6, %v22082_v10  ;;  %v22115_v10 = vld [vmem:[#allocation53_spill] sm:$0xff] }
 0x28c   : > { %16561 = vmatmul.mubr.f32.gmra.mrb[6].mxu1 %v557_v30  ;;  %v568_v21 = vand.u32 4294901760, %v567_v46  ;;  %v22117_v46 = vld [vmem:[#allocation59_spill] sm:$0xff] }
 0x28d   : > { %17132 = vmatmul.mubr.f32.gmra.mrb[4].mxu0 %v19468_v31  ;;  %16565 = vmatprep.mubr.f32.mxu1 %v22084_v7  ;;  %v22085_v31 = vld [vmem:[#allocation9_spill] sm:$0xff] }
 0x28e   : > { %17134 = vmatprep.mubr.f32.mxu0 %v19481_v56  ;;  %16563 = vmatprep.subr.mxu1 %v568_v21  ;;  %v6032_v56 = vand.u32 4294901760, %v20362_v45 }
 0x28f   : > { %16564 = vmatpush3.msra.mxu1 %v568_v21  ;;  %v22118_v21 = vld [vmem:[#allocation62_spill] sm:$0xff] }
 0x290   : > { %16566 = vmatmul.mubr.f32.vlgmr.msra.gmra.mrb[0].mxu1 %v22085_v31  ;;  %16577 = vmatprep.subr.mxu1 %v22083_v6  ;;  %v6033_v19 = vsub.f32 %v20362_v45, %v6032_v56 }
 0x291   : > { %17135 = vmatmul.mubr.f32.gmra.mrb[6].mxu0 %v20268_v36  ;;  %16568 = vmatprep.mubr.f32.mxu1 %v22086_v9  ;;  %v22087_v36 = vld [vmem:[#allocation11_spill] sm:$0xff] }
 0x292   : > { %17139 = vmatprep.mubr.f32.mxu0 %v497_v44  ;;  %16578 = vmatpush3.msra.mxu1 %v22083_v6  ;;  %v6034_v0 = vand.u32 4294901760, %v6033_v19  ;;  %v22092_v44 = vld [vmem:[#allocation58_spill] sm:$0xff]  ;;  %v22116_v6 = vld [vmem:[#allocation56_spill] sm:$0xff] }
 0x294   : > { %16569 = vmatmul.mubr.f32.gmra.mrb[2].mxu1 %v22087_v36 }
 0x295   : > { %17140 = vmatmul.mubr.f32.vlgmr.msra.gmra.mrb[0].mxu0 %v507_v25  ;;  %16571 = vmatprep.mubr.f32.mxu1 %v22088_v23  ;;  %v22095_v25 = vld [vmem:[#allocation65_spill] sm:$0xff] }
 0x296   : > { %17152 = vmatpush3.msra.mxu0 %v6045_v33  ;;  %17142 = vmatprep.mubr.f32.mxu0 %v517_v61  ;;  %v22098_v61 = vld [vmem:[#allocation68_spill] sm:$0xff] }
 0x297   : > { %17165 = vmatprep.subr.mxu0 %v20317_v12 }
 0x298   : > { %16572 = vmatmul.mubr.f32.gmra.mrb[4].mxu1 %v22089_v63 }
 0x299   : > { %17143 = vmatmul.mubr.f32.gmra.mrb[2].mxu0 %v527_v17  ;;  %16574 = vmatprep.mubr.f32.mxu1 %v22090_v37  ;;  %v22102_v17 = vld [vmem:[#allocation46_spill] sm:$0xff] }
 0x29a   : > { %17145 = vmatprep.mubr.f32.mxu0 %v537_v62  ;;  %v22107_v62 = vld [vmem:[#allocation45_spill] sm:$0xff] }
 0x29c   : > { %16575 = vmatmul.mubr.f32.gmra.mrb[6].mxu1 %v22091_v1 }
 0x29d   : > { %17146 = vmatmul.mubr.f32.gmra.mrb[4].mxu0 %v547_v48  ;;  %16579 = vmatprep.mubr.f32.mxu1 %v22070_v32  ;;  %v6651_v32 = vrot.slane %v348_v52, 1  ;;  %v22112_v48 = vld [vmem:[#allocation60_spill] sm:$0xff] }
 0x29e   : > { %17148 = vmatprep.mubr.f32.mxu0 %v557_v30  ;;  %v22114_v30 = vld [vmem:[#allocation50_spill] sm:$0xff] }
 0x2a0   : > { %16580 = vmatmul.mubr.f32.vlgmr.msra.gmra.mrb[0].mxu1 %v22067_v3 }
 0x2a1   : > { %17149 = vmatmul.mubr.f32.gmra.mrb[6].mxu0 %v6034_v0  ;;  %16582 = vmatprep.mubr.f32.mxu1 %v22069_v58  ;;  %v19148_v0 = vmov 0.0  }
 0x2a2   : > { %17153 = vmatprep.mubr.f32.mxu0 %v22085_v31  ;;  %7459 = vst.msk [vmem:[#allocation2 + $0x20] sm:$0xff] %vm7453_vm3, %v19148_v0  ;;  %7454 = vst.msk [vmem:[#allocation2] sm:$0xff] %vm7453_vm3, %v19148_v0 }
 0x2a3   : > { %7460 = vst.msk [vmem:[#allocation2 + $0x28] sm:$0x3] %vm7455_vm4, %v19148_v0  ;;  %7456 = vst.msk [vmem:[#allocation2 + $0x8] sm:$0x3] %vm7455_vm4, %v19148_v0 }
 0x2a4   : > { %16583 = vmatmul.mubr.f32.gmra.mrb[2].mxu1 %v22073_v38  ;;  %7457 = vst.msk [vmem:[#allocation2 + $0x10] sm:$0xff] %vm7453_vm3, %v19148_v0  ;;  %7461 = vst.msk [vmem:[#allocation2 + $0x30] sm:$0xff] %vm7453_vm3, %v19148_v0 }
 0x2a5   : > { %17154 = vmatmul.mubr.f32.vlgmr.msra.gmra.mrb[0].mxu0 %v22086_v9  ;;  %16585 = vmatprep.mubr.f32.mxu1 %v22075_v43  ;;  %7458 = vst.msk [vmem:[#allocation2 + $0x18] sm:$0x3] %vm7455_vm4, %v19148_v0  ;;  %7462 = vst.msk [vmem:[#allocation2 + $0x38] sm:$0x3] %vm7455_vm4, %v19148_v0 }
 0x2a6   : > { %17166 = vmatpush3.msra.mxu0 %v20317_v12  ;;  %17156 = vmatprep.mubr.f32.mxu0 %v22087_v36  ;;  %v15503_v12 = vld [vmem:[%s21764_s1 + $0x20] sm:$0xf]  ;;  %7463 = vst.msk [vmem:[#allocation2 + $0x40] sm:$0xff] %vm7453_vm3, %v19148_v0  ;;  %7465 = vst.msk [vmem:[#allocation2 + $0x50] sm:$0xff] %vm7453_vm3, %v19148_v0 }
 0x2a7   : > { %17179 = vmatprep.subr.mxu0 %v20310_v14  ;;  %7464 = vst.msk [vmem:[#allocation2 + $0x48] sm:$0x3] %vm7455_vm4, %v19148_v0  ;;  %7466 = vst.msk [vmem:[#allocation2 + $0x58] sm:$0x3] %vm7455_vm4, %v19148_v0 }
 0x2a8   : > { %16586 = vmatmul.mubr.f32.gmra.mrb[4].mxu1 %v22077_v29  ;;  %7467 = vst.msk [vmem:[#allocation2 + $0x60] sm:$0xff] %vm7453_vm3, %v19148_v0  ;;  %7469 = vst.msk [vmem:[#allocation2 + $0x70] sm:$0xff] %vm7453_vm3, %v19148_v0 }
 0x2a9   : > { %17157 = vmatmul.mubr.f32.gmra.mrb[2].mxu0 %v22088_v23  ;;  %16588 = vmatprep.mubr.f32.mxu1 %v22079_v13  ;;  %7468 = vst.msk [vmem:[#allocation2 + $0x68] sm:$0x3] %vm7455_vm4, %v19148_v0  ;;  %7470 = vst.msk [vmem:[#allocation2 + $0x78] sm:$0x3] %vm7455_vm4, %v19148_v0 }
 0x2aa   : > { %17159 = vmatprep.mubr.f32.mxu0 %v22089_v63  ;;  %7471 = vst.msk [vmem:[#allocation2 + $0x80] sm:$0xff] %vm7453_vm3, %v19148_v0  ;;  %7473 = vst.msk [vmem:[#allocation2 + $0x90] sm:$0xff] %vm7453_vm3, %v19148_v0 }
 0x2ab   : > { %7472 = vst.msk [vmem:[#allocation2 + $0x88] sm:$0x3] %vm7455_vm4, %v19148_v0  ;;  %7474 = vst.msk [vmem:[#allocation2 + $0x98] sm:$0x3] %vm7455_vm4, %v19148_v0 }
 0x2ac   : > { %16589 = vmatmul.mubr.f32.gmra.mrb[6].mxu1 %v22081_v18 }
 0x2ad   : > { %17160 = vmatmul.mubr.f32.gmra.mrb[4].mxu0 %v22090_v37 }
 0x2ae   : > { %17162 = vmatprep.mubr.f32.mxu0 %v22091_v1 }
 0x2b1   : > { %17163 = vmatmul.mubr.f32.gmra.mrb[6].mxu0 %v20355_v16 }
 0x2b2   : > { %17167 = vmatprep.mubr.f32.mxu0 %v22067_v3 }
 0x2b5   : > { %17168 = vmatmul.mubr.f32.vlgmr.msra.gmra.mrb[0].mxu0 %v22069_v58 }
 0x2b6   : > { %17180 = vmatpush3.msra.mxu0 %v20310_v14  ;;  %17170 = vmatprep.mubr.f32.mxu0 %v22073_v38 }
 0x2b7   : > { %17193 = vmatprep.subr.mxu0 %v20322_v55 }
 0x2b9   : > { %17171 = vmatmul.mubr.f32.gmra.mrb[2].mxu0 %v22075_v43  ;;  %v22097_v43 = vld [vmem:[#allocation67_spill] sm:$0xff] }
 0x2ba   : > { %17173 = vmatprep.mubr.f32.mxu0 %v22077_v29  ;;  %v22100_v29 = vld [vmem:[#allocation42_spill] sm:$0xff] }
 0x2bd   : > { %17174 = vmatmul.mubr.f32.gmra.mrb[4].mxu0 %v22079_v13  ;;  %v22104_v13 = vld [vmem:[#allocation52_spill] sm:$0xff] }
 0x2be   : > { %17176 = vmatprep.mubr.f32.mxu0 %v22081_v18  ;;  %v22109_v18 = vld [vmem:[#allocation51_spill] sm:$0xff] }
 0x2c1   : > { %17177 = vmatmul.mubr.f32.gmra.mrb[6].mxu0 %v20362_v45  ;;  %v22119_v45 = vld [vmem:[#allocation64_spill] sm:$0xff] }
 0x2c2   : > { %17181 = vmatprep.mubr.f32.mxu0 %v22066_v22  ;;  %v6658_v22 = vsel %vm413_vm0, %v15503_v12, 0 }
 0x2c5   : > { %17182 = vmatmul.mubr.f32.vlgmr.msra.gmra.mrb[0].mxu0 %v22068_v53 }
 0x2c6   : > { %17194 = vmatpush3.msra.mxu0 %v20322_v55  ;;  %17184 = vmatprep.mubr.f32.mxu0 %v22072_v11  ;;  %v20419_v55 = vand.u32 4294901760, %v6658_v22  ;;  %v22093_v11 = vld [vmem:[#allocation61_spill] sm:$0xff] }
 0x2c7   : > { %17207 = vmatprep.subr.mxu0 %v20310_v14 }
 0x2c8   : > { %v6808_v3 = vsub.f32 %v6658_v22, %v20419_v55  ;;  %v15506_v22 = vld [vmem:[%s21767_s4 + $0x8] sm:$0xff] }
 0x2c9   : > { %17185 = vmatmul.mubr.f32.gmra.mrb[2].mxu0 %v22074_v57  ;;  %v22096_v57 = vld [vmem:[#allocation66_spill] sm:$0xff] }
 0x2ca   : > { %17187 = vmatprep.mubr.f32.mxu0 %v22076_v28  ;;  %v6809_v53 = vand.u32 4294901760, %v6808_v3  ;;  %v22099_v28 = vld [vmem:[#allocation41_spill] sm:$0xff] }
 0x2cc   : > { %v6810_v58 = vsub.f32 %v6808_v3, %v6809_v53 }
 0x2cd   : > { %17188 = vmatmul.mubr.f32.gmra.mrb[4].mxu0 %v22078_v34  ;;  %v22103_v34 = vld [vmem:[#allocation49_spill] sm:$0xff] }
 0x2ce   : > { %17190 = vmatprep.mubr.f32.mxu0 %v22080_v59  ;;  %v6811_v20 = vand.u32 4294901760, %v6810_v58  ;;  %v22108_v59 = vld [vmem:[#allocation48_spill] sm:$0xff] }
 0x2d1   : > { %17191 = vmatmul.mubr.f32.gmra.mrb[6].mxu0 %v6032_v56 }
 0x2d2   : > { %17195 = vmatprep.mubr.f32.mxu0 %v22085_v31 }
 0x2d5   : > { %17196 = vmatmul.mubr.f32.vlgmr.msra.gmra.mrb[0].mxu0 %v22086_v9 }
 0x2d6   : > { %17208 = vmatpush3.msra.mxu0 %v20310_v14  ;;  %17198 = vmatprep.mubr.f32.mxu0 %v22087_v36  ;;  %v6650_v14 = vrot.slane %v20261_v42, 1 }
 0x2d7   : > { %17221 = vmatprep.subr.mxu0 %v20419_v55 }
 0x2d8   : > { %v6652_v35 = vsel %vm1946_vm2, %v6650_v14, %v6651_v32 }
 0x2d9   : > { %17199 = vmatmul.mubr.f32.gmra.mrb[2].mxu0 %v22088_v23  ;;  %v6655_v26 = vsel %vm388_vm1, %v6652_v35, 0 }
 0x2da   : > { %17201 = vmatprep.mubr.f32.mxu0 %v22089_v63  ;;  %v6796_v42 = vand.u32 4294901760, %v6655_v26 }
 0x2dc   : > { %v6797_v27 = vsub.f32 %v6655_v26, %v6796_v42  ;;  %v15504_v26 = vld [vmem:[%s21765_s2] ss:$0 sm:$0xff] }
 0x2dd   : > { %17202 = vmatmul.mubr.f32.gmra.mrb[4].mxu0 %v22090_v37 }
 0x2de   : > { %17204 = vmatprep.mubr.f32.mxu0 %v22091_v1  ;;  %v6798_v38 = vand.u32 4294901760, %v6797_v27 }
 0x2e0   : > { %v6799_v33 = vsub.f32 %v6797_v27, %v6798_v38 }
 0x2e1   : > { %17205 = vmatmul.mubr.f32.gmra.mrb[6].mxu0 %v20355_v16 }
 0x2e2   : > { %17209 = vmatprep.mubr.f32.mxu0 %v22085_v31  ;;  %v6800_v54 = vand.u32 4294901760, %v6799_v33 }
 0x2e5   : > { %17210 = vmatmul.mubr.f32.vlgmr.msra.gmra.mrb[0].mxu0 %v22086_v9 }
 0x2e6   : > { %17222 = vmatpush3.msra.mxu0 %v20419_v55  ;;  %17212 = vmatprep.mubr.f32.mxu0 %v22087_v36 }
 0x2e7   : > { %17235 = vmatprep.subr.mxu0 %v6811_v20 }
 0x2e9   : > { %17213 = vmatmul.mubr.f32.gmra.mrb[2].mxu0 %v22088_v23 }
 0x2ea   : > { %17215 = vmatprep.mubr.f32.mxu0 %v22089_v63 }
 0x2ed   : > { %17216 = vmatmul.mubr.f32.gmra.mrb[4].mxu0 %v22090_v37 }
 0x2ee   : > { %17218 = vmatprep.mubr.f32.mxu0 %v22091_v1 }
 0x2f1   : > { %17219 = vmatmul.mubr.f32.gmra.mrb[6].mxu0 %v20355_v16  ;;  %v22113_v16 = vld [vmem:[#allocation47_spill] sm:$0xff] }
 0x2f2   : > { %17223 = vmatprep.mubr.f32.mxu0 %v22092_v44  ;;  %v15505_v44 = vld [vmem:[%s21766_s3] ss:$0 sm:$0xff] }
 0x2f5   : > { %17224 = vmatmul.mubr.f32.vlgmr.msra.gmra.mrb[0].mxu0 %v22093_v11 }
 0x2f6   : > { %17236 = vmatpush3.msra.mxu0 %v6811_v20  ;;  %17226 = vmatprep.mubr.f32.mxu0 %v22094_v41 }
 0x2f7   : > { %17249 = vmatprep.subr.mxu0 %v6808_v3 }
 0x2f9   : > { %17227 = vmatmul.mubr.f32.gmra.mrb[2].mxu0 %v22095_v25 }
 0x2fa   : > { %17229 = vmatprep.mubr.f32.mxu0 %v22096_v57 }
 0x2fd   : > { %17230 = vmatmul.mubr.f32.gmra.mrb[4].mxu0 %v22097_v43 }
 0x2fe   : > { %17232 = vmatprep.mubr.f32.mxu0 %v22098_v61 }
 0x301   : > { %17233 = vmatmul.mubr.f32.gmra.mrb[6].mxu0 %v6800_v54 }
 0x302   : > { %17237 = vmatprep.mubr.f32.mxu0 %v22099_v28 }
 0x305   : > { %17238 = vmatmul.mubr.f32.vlgmr.msra.gmra.mrb[0].mxu0 %v22100_v29 }
 0x306   : > { %17250 = vmatpush3.msra.mxu0 %v6808_v3  ;;  %17240 = vmatprep.mubr.f32.mxu0 %v22101_v40 }
 0x307   : > { %17263 = vmatprep.subr.mxu0 %v20419_v55 }
 0x309   : > { %17241 = vmatmul.mubr.f32.gmra.mrb[2].mxu0 %v22102_v17 }
 0x30a   : > { %17243 = vmatprep.mubr.f32.mxu0 %v22103_v34 }
 0x30d   : > { %17244 = vmatmul.mubr.f32.gmra.mrb[4].mxu0 %v22104_v13 }
 0x30e   : > { %17246 = vmatprep.mubr.f32.mxu0 %v22105_v60 }
 0x311   : > { %17247 = vmatmul.mubr.f32.gmra.mrb[6].mxu0 %v6796_v42 }
 0x312   : > { %17251 = vmatprep.mubr.f32.mxu0 %v22106_v50 }
 0x315   : > { %17252 = vmatmul.mubr.f32.vlgmr.msra.gmra.mrb[0].mxu0 %v22107_v62 }
 0x316   : > { %17264 = vmatpush3.msra.mxu0 %v20419_v55  ;;  %17254 = vmatprep.mubr.f32.mxu0 %v22108_v59 }
 0x317   : > { %17277 = vmatprep.subr.mxu0 %v6809_v53 }
 0x319   : > { %17255 = vmatmul.mubr.f32.gmra.mrb[2].mxu0 %v22109_v18 }
 0x31a   : > { %17257 = vmatprep.mubr.f32.mxu0 %v22110_v8 }
 0x31d   : > { %17258 = vmatmul.mubr.f32.gmra.mrb[4].mxu0 %v22111_v39 }
 0x31e   : > { %17260 = vmatprep.mubr.f32.mxu0 %v22112_v48 }
 0x321   : > { %17261 = vmatmul.mubr.f32.gmra.mrb[6].mxu0 %v6797_v27 }
 0x322   : > { %17265 = vmatprep.mubr.f32.mxu0 %v22113_v16 }
 0x325   : > { %17266 = vmatmul.mubr.f32.vlgmr.msra.gmra.mrb[0].mxu0 %v22114_v30 }
 0x326   : > { %17278 = vmatpush3.msra.mxu0 %v6809_v53  ;;  %17268 = vmatprep.mubr.f32.mxu0 %v22115_v10 }
 0x327   : > { %17291 = vmatprep.subr.mxu0 %v20419_v55 }
 0x329   : > { %17269 = vmatmul.mubr.f32.gmra.mrb[2].mxu0 %v22116_v6 }
 0x32a   : > { %17271 = vmatprep.mubr.f32.mxu0 %v22117_v46 }
 0x32d   : > { %17272 = vmatmul.mubr.f32.gmra.mrb[4].mxu0 %v22118_v21 }
 0x32e   : > { %17274 = vmatprep.mubr.f32.mxu0 %v22119_v45 }
 0x331   : > { %17275 = vmatmul.mubr.f32.gmra.mrb[6].mxu0 %v6798_v38 }
 0x332   : > { %17279 = vmatprep.mubr.f32.mxu0 %v22099_v28 }
 0x335   : > { %17280 = vmatmul.mubr.f32.vlgmr.msra.gmra.mrb[0].mxu0 %v22100_v29 }
 0x336   : > { %17292 = vmatpush3.msra.mxu0 %v20419_v55  ;;  %17282 = vmatprep.mubr.f32.mxu0 %v22101_v40  ;;  %v20528_v55 = vand.u32 4294901760, %v15506_v22 }
 0x338   : > { %17305 = vmatprep.subr.mxu1 %v20528_v55  ;;  %v20536_v58 = vsub.f32 %v15506_v22, %v20528_v55 }
 0x339   : > { %17283 = vmatmul.mubr.f32.gmra.mrb[2].mxu0 %v22102_v17  ;;  %17306 = vmatpush3.msra.mxu1 %v20528_v55 }
 0x33a   : > { %17285 = vmatprep.mubr.f32.mxu0 %v22103_v34  ;;  %v20540_v14 = vand.u32 4294901760, %v20536_v58 }
 0x33c   : > { %v7677_v20 = vsub.f32 %v20536_v58, %v20540_v14 }
 0x33d   : > { %17286 = vmatmul.mubr.f32.gmra.mrb[4].mxu0 %v22104_v13 }
 0x33e   : > { %17288 = vmatprep.mubr.f32.mxu0 %v22105_v60  ;;  %v20544_v32 = vand.u32 4294901760, %v7677_v20 }
 0x340   : > { %17319 = vmatprep.subr.mxu1 %v20544_v32 }
 0x341   : > { %17289 = vmatmul.mubr.f32.gmra.mrb[6].mxu0 %v6796_v42 }
 0x342   : > { %17293 = vmatprep.mubr.f32.mxu0 %v22099_v28 }
 0x345   : > { %17294 = vmatmul.mubr.f32.vlgmr.msra.gmra.mrb[0].mxu0 %v22100_v29 }
 0x346   : > { %17296 = vmatprep.mubr.f32.mxu0 %v22101_v40 }
 0x349   : > { %17297 = vmatmul.mubr.f32.gmra.mrb[2].mxu0 %v22102_v17 }
 0x34a   : > { %17299 = vmatprep.mubr.f32.mxu0 %v22103_v34 }
 0x34d   : > { %17300 = vmatmul.mubr.f32.gmra.mrb[4].mxu0 %v22104_v13 }
 0x34e   : > { %17302 = vmatprep.mubr.f32.mxu0 %v22105_v60 }
 0x351   : > { %17303 = vmatmul.mubr.f32.gmra.mrb[6].mxu0 %v6796_v42 }
 0x352   : > { %18063 = vmatprep.mubr.f32.mxu0 %v20012_v5  ;;  %v7493_v5 = vld [vmem:[#allocation2 + $0x1] sm:$0xff] }
 0x353   : > { %v7504_v37 = vsel %vm7453_vm3, %v7493_v5, 0 }
 0x354   : > { %v20520_v1 = vand.u32 4294901760, %v7504_v37 }
 0x356   : > { %v20523_v12 = vsub.f32 %v7504_v37, %v20520_v1 }
 0x358   : > { %v7595_v3 = vand.u32 4294901760, %v20523_v12 }
 0x35a   : > { %v7596_v53 = vsub.f32 %v20523_v12, %v7595_v3 }
 0x35c   : > { %v7597_v52 = vand.u32 4294901760, %v7596_v53 }
 0x35e   : > { %17307 = vmatprep.mubr.f32.mxu1 %v7597_v52 }
 0x373   : > { %v16581_v7 = vpop.f32.mrb[0].mxu1 }
 0x374   : > { %v751_v31 = vpop.f32.mrb[1].mxu1 }
 0x377   : > { %v16584_v56 = vpop.f32.mrb[2].mxu1 }
 0x378   : > { %v765_v9 = vpop.f32.mrb[3].mxu1 }
 0x37b   : > { %v20491_v36 = vpop.f32.mrb[4].mxu1 }
 0x37c   : > { %v20493_v19 = vpop.f32.mrb[5].mxu1 }
 0x37f   : > { %v20495_v23 = vpop.f32.mrb[6].mxu1 }
 0x380   : > { %v20497_v63 = vpop.f32.mrb[7].mxu1 }
 0x418   : > { %v17295_v35 = vpop.f32.mrb[0].mxu0 }
 0x419   : > { %v18145_v42 = vadd.f32 %v17295_v35, %v16581_v7  ;;  %v7361_v27 = vpop.f32.mrb[1].mxu0 }
 0x41a   : > { %v18146_v11 = vadd.f32 %v7361_v27, %v751_v31 }
 0x41b   : > { %v7423_v38 = vmul.f32 %v18145_v42, %v15504_v26 }
 0x41c   : > { %v7422_v41 = vmul.f32 %v18146_v11, %v15504_v26  ;;  %v17298_v25 = vpop.f32.mrb[2].mxu0 }
 0x41d   : > { %v7438_v33 = vadd.f32 %v15505_v44, %v7423_v38  ;;  %v18147_v57 = vadd.f32 %v17298_v25, %v16584_v56  ;;  %v7373_v43 = vpop.f32.mrb[3].mxu0 }
 0x41e   : > { %v7437_v54 = vadd.f32 %v15505_v44, %v7422_v41  ;;  %v18148_v61 = vadd.f32 %v7373_v43, %v765_v9 }
 0x41f   : > { %v7446_v28 = vmax.f32 %v7438_v33, 0.0  ;;  %v7425_v29 = vmul.f32 %v18147_v57, %v15504_v26 }
 0x420   : > { %v7445_v40 = vmax.f32 %v7437_v54, 0.0  ;;  %v7424_v17 = vmul.f32 %v18148_v61, %v15504_v26  ;;  %v17301_v34 = vpop.f32.mrb[4].mxu0 }
 0x421   : > { %7477 = vst.msk [vmem:[#allocation2 + $0x21] sm:$0xff] %vm7453_vm3, %v7446_v28  ;;  %v7440_v13 = vadd.f32 %v15505_v44, %v7425_v29  ;;  %v18149_v60 = vadd.f32 %v17301_v34, %v20491_v36  ;;  %v7385_v50 = vpop.f32.mrb[5].mxu0 }
 0x422   : > { %7476 = vst.msk [vmem:[#allocation2 + $0x11] sm:$0xff] %vm7453_vm3, %v7445_v40  ;;  %v7439_v62 = vadd.f32 %v15505_v44, %v7424_v17  ;;  %v18150_v59 = vadd.f32 %v7385_v50, %v20493_v19 }
 0x423   : > { %v7448_v18 = vmax.f32 %v7440_v13, 0.0  ;;  %v7427_v8 = vmul.f32 %v18149_v60, %v15504_v26 }
 0x424   : > { %v7447_v39 = vmax.f32 %v7439_v62, 0.0  ;;  %v7426_v48 = vmul.f32 %v18150_v59, %v15504_v26  ;;  %v17304_v16 = vpop.f32.mrb[6].mxu0 }
 0x425   : > { %7479 = vst.msk [vmem:[#allocation2 + $0x41] sm:$0xff] %vm7453_vm3, %v7448_v18  ;;  %v7442_v30 = vadd.f32 %v15505_v44, %v7427_v8  ;;  %v18151_v10 = vadd.f32 %v17304_v16, %v20495_v23  ;;  %v7397_v6 = vpop.f32.mrb[7].mxu0 }
 0x426   : > { %7478 = vst.msk [vmem:[#allocation2 + $0x31] sm:$0xff] %vm7453_vm3, %v7447_v39  ;;  %v7441_v46 = vadd.f32 %v15505_v44, %v7426_v48  ;;  %v18152_v21 = vadd.f32 %v7397_v6, %v20497_v63 }
 0x427   : > { %v7450_v45 = vmax.f32 %v7442_v30, 0.0  ;;  %v7429_v7 = vmul.f32 %v18151_v10, %v15504_v26 }
 0x428   : > { %v7449_v31 = vmax.f32 %v7441_v46, 0.0  ;;  %v7428_v56 = vmul.f32 %v18152_v21, %v15504_v26  ;;  %v7495_v9 = vld [vmem:[#allocation2 + $0x21] sm:$0xff] }
 0x429   : > { %7481 = vst.msk [vmem:[#allocation2 + $0x61] sm:$0xff] %vm7453_vm3, %v7450_v45  ;;  %v7444_v36 = vadd.f32 %v15505_v44, %v7429_v7  ;;  %v7494_v19 = vld [vmem:[#allocation2 + $0x11] sm:$0xff]  ;;  %v7510_v0 = vsel %vm7453_vm3, %v7495_v9, 0 }
 0x42a   : > { %7480 = vst.msk [vmem:[#allocation2 + $0x51] sm:$0xff] %vm7453_vm3, %v7449_v31  ;;  %v7443_v23 = vadd.f32 %v15505_v44, %v7428_v56  ;;  %v7507_v5 = vsel %vm7453_vm3, %v7494_v19, 0  ;;  %v20565_v37 = vand.u32 4294901760, %v7510_v0 }
 0x42b   : > { %v7452_v22 = vmax.f32 %v7444_v36, 0.0  ;;  %v20567_v63 = vand.u32 4294901760, %v7507_v5 }
 0x42c   : > { %22120 = vst [vmem:[#allocation34_spill] sm:$0xff] %v20565_v37  ;;  %v7451_v53 = vmax.f32 %v7443_v23, 0.0  ;;  %v20570_v52 = vsub.f32 %v7510_v0, %v20565_v37  ;;  %v7497_v20 = vld [vmem:[#allocation2 + $0x41] sm:$0xff] }
 0x42d   : > { %22121 = vst [vmem:[#allocation36_spill] sm:$0xff] %v20567_v63  ;;  %7483 = vst.msk [vmem:[#allocation2 + $0x81] sm:$0xff] %vm7453_vm3, %v7452_v22  ;;  %v20574_v35 = vsub.f32 %v7507_v5, %v20567_v63  ;;  %v7496_v26 = vld [vmem:[#allocation2 + $0x31] sm:$0xff]  ;;  %v7516_v42 = vsel %vm7453_vm3, %v7497_v20, 0  ;;  %v7486_v5 = vld [vmem:[#allocation2 + $0x20] sm:$0xff] }
 0x42e   : > { %22122 = vst [vmem:[#allocation38_spill] sm:$0xff] %v20570_v52  ;;  %7482 = vst.msk [vmem:[#allocation2 + $0x71] sm:$0xff] %vm7453_vm3, %v7451_v53  ;;  %v20579_v27 = vand.u32 4294901760, %v20570_v52  ;;  %v7513_v44 = vsel %vm7453_vm3, %v7496_v26, 0  ;;  %v20582_v11 = vand.u32 4294901760, %v7516_v42  ;;  %v8281_v20 = vsel %vm7453_vm3, %v7486_v5, 0 }
 0x42f   : > { %22123 = vst [vmem:[#allocation31_spill] sm:$0xff] %v20574_v35  ;;  %v20585_v38 = vand.u32 4294901760, %v20574_v35  ;;  %v20587_v41 = vand.u32 4294901760, %v7513_v44  ;;  %v7487_v26 = vld [vmem:[#allocation2 + $0x30] sm:$0xff] }
 0x430   : > { %22124 = vst [vmem:[#allocation32_spill] sm:$0xff] %v20579_v27  ;;  %22125 = vst [vmem:[#allocation33_spill] sm:$0xff] %v20582_v11  ;;  %v7616_v25 = vsub.f32 %v20570_v52, %v20579_v27  ;;  %v20592_v33 = vsub.f32 %v7516_v42, %v20582_v11  ;;  %v7499_v57 = vld [vmem:[#allocation2 + $0x61] sm:$0xff] }
 0x431   : > { %22126 = vst [vmem:[#allocation35_spill] sm:$0xff] %v20585_v38  ;;  %22127 = vst [vmem:[#allocation37_spill] sm:$0xff] %v20587_v41  ;;  %v7606_v43 = vsub.f32 %v20574_v35, %v20585_v38  ;;  %v20597_v54 = vsub.f32 %v7513_v44, %v20587_v41  ;;  %v7498_v61 = vld [vmem:[#allocation2 + $0x51] sm:$0xff]  ;;  %v7522_v28 = vsel %vm7453_vm3, %v7499_v57, 0  ;;  %v7488_v44 = vld [vmem:[#allocation2 + $0x40] sm:$0xff] }
 0x432   : > { %22128 = vst [vmem:[#allocation39_spill] sm:$0xff] %v20592_v33  ;;  %v20601_v29 = vand.u32 4294901760, %v20592_v33  ;;  %v7519_v40 = vsel %vm7453_vm3, %v7498_v61, 0  ;;  %v20604_v17 = vand.u32 4294901760, %v7522_v28  ;;  %v20613_v50 = vand.u32 4294901760, %v7616_v25 }
 0x433   : > { %22129 = vst [vmem:[#allocation40_spill] sm:$0xff] %v20597_v54  ;;  %v20606_v34 = vand.u32 4294901760, %v7606_v43  ;;  %v20609_v13 = vand.u32 4294901760, %v20597_v54  ;;  %v20611_v60 = vand.u32 4294901760, %v7519_v40  ;;  %v20730_v43 = vand.u32 4294901760, %v8281_v20 }
 0x434   : > { %22130 = vst [vmem:[#allocation19_spill] sm:$0xff] %v20601_v29  ;;  %22131 = vst [vmem:[#allocation13_spill] sm:$0xff] %v20604_v17  ;;  %v7636_v62 = vsub.f32 %v20592_v33, %v20601_v29  ;;  %v20618_v59 = vsub.f32 %v7522_v28, %v20604_v17  ;;  %v8284_v61 = vsel %vm7453_vm3, %v7487_v26, 0  ;;  %v8287_v28 = vsel %vm7453_vm3, %v7488_v44, 0 }
 0x435   : > { %22132 = vst [vmem:[#allocation20_spill] sm:$0xff] %v20609_v13  ;;  %22133 = vst [vmem:[#allocation14_spill] sm:$0xff] %v20611_v60  ;;  %17308 = vmatmul.mubr.f32.vlgmr.msra.gmra.mrb[8].mxu1 %v20606_v34  ;;  %v7626_v18 = vsub.f32 %v20597_v54, %v20609_v13  ;;  %v20624_v8 = vsub.f32 %v7519_v40, %v20611_v60  ;;  %v7500_v39 = vld [vmem:[#allocation2 + $0x71] sm:$0xff] }
 0x436   : > { %22134 = vst [vmem:[#allocation12_spill] sm:$0xff] %v20613_v50  ;;  %22135 = vst [vmem:[#allocation22_spill] sm:$0xff] %v20618_v59  ;;  %17320 = vmatpush3.msra.mxu1 %v20544_v32  ;;  %17310 = vmatprep.mubr.f32.mxu1 %v20613_v50  ;;  %v20629_v48 = vand.u32 4294901760, %v20618_v59  ;;  %v7525_v16 = vsel %vm7453_vm3, %v7500_v39, 0  ;;  %v20640_v46 = vand.u32 4294901760, %v7636_v62  ;;  %v7489_v40 = vld [vmem:[#allocation2 + $0x50] sm:$0xff] }
 0x437   : > { %22136 = vst [vmem:[#allocation16_spill] sm:$0xff] %v20624_v8  ;;  %v20632_v30 = vand.u32 4294901760, %v7626_v18  ;;  %v20635_v10 = vand.u32 4294901760, %v20624_v8  ;;  %v20637_v6 = vand.u32 4294901760, %v7525_v16  ;;  %17333 = vmatprep.subr.mxu1 %v20536_v58  ;;  %v7490_v62 = vld [vmem:[#allocation2 + $0x60] sm:$0xff]  ;;  %v20741_v39 = vand.u32 4294901760, %v8284_v61 }
 0x438   : > { %22137 = vst [vmem:[#allocation25_spill] sm:$0xff] %v20629_v48  ;;  %22141 = vst [vmem:[#allocation29_spill] sm:$0xff] %v20640_v46  ;;  %v7656_v32 = vsub.f32 %v20618_v59, %v20629_v48 }
 0x439   : > { %22138 = vst [vmem:[#allocation21_spill] sm:$0xff] %v20632_v30  ;;  %22139 = vst [vmem:[#allocation27_spill] sm:$0xff] %v20635_v10  ;;  %17311 = vmatmul.mubr.f32.gmra.mrb[10].mxu1 %v20632_v30  ;;  %v7646_v21 = vsub.f32 %v20624_v8, %v20635_v10  ;;  %v20648_v45 = vsub.f32 %v7525_v16, %v20637_v6  ;;  %v20744_v16 = vsub.f32 %v8281_v20, %v20730_v43 }
 0x43a   : > { %22140 = vst [vmem:[#allocation23_spill] sm:$0xff] %v20637_v6  ;;  %17313 = vmatprep.mubr.f32.mxu1 %v20640_v46  ;;  %v20656_v56 = vand.u32 4294901760, %v7656_v32  ;;  %v20746_v32 = vand.u32 4294901760, %v8287_v28 }
 0x43b   : > { %22142 = vst [vmem:[#allocation26_spill] sm:$0xff] %v20648_v45  ;;  %v20651_v7 = vand.u32 4294901760, %v7646_v21  ;;  %v20654_v31 = vand.u32 4294901760, %v20648_v45  ;;  %v8290_v21 = vsel %vm7453_vm3, %v7489_v40, 0 }
 0x43c   : > { %22145 = vst [vmem:[#allocation7_spill] sm:$0xff] %v20656_v56  ;;  %v20761_v5 = vand.u32 4294901760, %v8290_v21 }
 0x43d   : > { %22143 = vst [vmem:[#allocation30_spill] sm:$0xff] %v20651_v7  ;;  %22144 = vst [vmem:[#allocation28_spill] sm:$0xff] %v20654_v31  ;;  %17314 = vmatmul.mubr.f32.gmra.mrb[12].mxu1 %v20651_v7  ;;  %v7666_v9 = vsub.f32 %v20648_v45, %v20654_v31 }
 0x43e   : > { %17316 = vmatprep.mubr.f32.mxu1 %v20656_v56 }
 0x43f   : > { %v20662_v36 = vand.u32 4294901760, %v7666_v9  ;;  %v8293_v9 = vsel %vm7453_vm3, %v7490_v62, 0  ;;  %v20780_v62 = vsub.f32 %v8290_v21, %v20761_v5 }
 0x440   : > { %v20769_v20 = vand.u32 4294901760, %v8293_v9 }
 0x441   : > { %22146 = vst [vmem:[#allocation6_spill] sm:$0xff] %v20662_v36  ;;  %17317 = vmatmul.mubr.f32.gmra.mrb[14].mxu1 %v20662_v36  ;;  %v20798_v51 = vand.u32 4294901760, %v20780_v62 }
 0x442   : > { %17321 = vmatprep.mubr.f32.mxu1 %v20520_v1  ;;  %v20790_v47 = vsub.f32 %v8293_v9, %v20769_v20 }
 0x444   : > { %v20808_v49 = vand.u32 4294901760, %v20790_v47 }
 0x445   : > { %17322 = vmatmul.mubr.f32.vlgmr.msra.gmra.mrb[8].mxu1 %v20567_v63 }
 0x446   : > { %17334 = vmatpush3.msra.mxu1 %v20536_v58  ;;  %17324 = vmatprep.mubr.f32.mxu1 %v20565_v37  ;;  %v8427_v4 = vsub.f32 %v20790_v47, %v20808_v49 }
 0x447   : > { %17347 = vmatprep.subr.mxu1 %v20528_v55 }
 0x448   : > { %v20830_v15 = vand.u32 4294901760, %v8427_v4 }
 0x449   : > { %17325 = vmatmul.mubr.f32.gmra.mrb[10].mxu1 %v20587_v41 }
 0x44a   : > { %17327 = vmatprep.mubr.f32.mxu1 %v20582_v11 }
 0x44d   : > { %17328 = vmatmul.mubr.f32.gmra.mrb[12].mxu1 %v20611_v60 }
 0x44e   : > { %17330 = vmatprep.mubr.f32.mxu1 %v20604_v17 }
 0x451   : > { %17331 = vmatmul.mubr.f32.gmra.mrb[14].mxu1 %v20637_v6 }
 0x452   : > { %17335 = vmatprep.mubr.f32.mxu1 %v20523_v12  ;;  %v7492_v12 = vld [vmem:[%s21767_s4] sm:$0xff] }
 0x455   : > { %17336 = vmatmul.mubr.f32.vlgmr.msra.gmra.mrb[8].mxu1 %v20574_v35  ;;  %v9052_v35 = vld [vmem:[#allocation2 + $0x72] sm:$0xff] }
 0x456   : > { %17348 = vmatpush3.msra.mxu1 %v20528_v55  ;;  %17338 = vmatprep.mubr.f32.mxu1 %v20570_v52 }
 0x457   : > { %17361 = vmatprep.subr.mxu1 %v20540_v14 }
 0x459   : > { %17339 = vmatmul.mubr.f32.gmra.mrb[10].mxu1 %v20597_v54 }
 0x45a   : > { %17341 = vmatprep.mubr.f32.mxu1 %v20592_v33  ;;  %v9050_v33 = vld [vmem:[#allocation2 + $0x52] sm:$0xff] }
 0x45d   : > { %17342 = vmatmul.mubr.f32.gmra.mrb[12].mxu1 %v20624_v8 }
 0x45e   : > { %17344 = vmatprep.mubr.f32.mxu1 %v20618_v59 }
 0x461   : > { %17345 = vmatmul.mubr.f32.gmra.mrb[14].mxu1 %v20648_v45 }
 0x462   : > { %17349 = vmatprep.mubr.f32.mxu1 %v7595_v3  ;;  %v20700_v3 = vand.u32 4294901760, %v7492_v12 }
 0x464   : > { %v20707_v58 = vsub.f32 %v7492_v12, %v20700_v3  ;;  %v7491_v12 = vld [vmem:[#allocation2 + $0x70] sm:$0xff] }
 0x465   : > { %17350 = vmatmul.mubr.f32.vlgmr.msra.gmra.mrb[8].mxu1 %v20585_v38  ;;  %v8296_v26 = vsel %vm7453_vm3, %v7491_v12, 0 }
 0x466   : > { %17362 = vmatpush3.msra.mxu1 %v20540_v14  ;;  %17352 = vmatprep.mubr.f32.mxu1 %v20579_v27  ;;  %v7484_v14 = vld [vmem:[#allocation2] sm:$0xff]  ;;  %v20713_v0 = vand.u32 4294901760, %v20707_v58 }
 0x467   : > { %17375 = vmatprep.subr.mxu1 %v20528_v55  ;;  %v8275_v19 = vsel %vm7453_vm3, %v7484_v14, 0  ;;  %v9049_v27 = vld [vmem:[#allocation2 + $0x42] sm:$0xff] }
 0x468   : > { %v20717_v23 = vand.u32 4294901760, %v8275_v19  ;;  %v8448_v22 = vsub.f32 %v20707_v58, %v20713_v0 }
 0x469   : > { %17353 = vmatmul.mubr.f32.gmra.mrb[10].mxu1 %v20609_v13 }
 0x46a   : > { %17355 = vmatprep.mubr.f32.mxu1 %v20601_v29  ;;  %v20726_v42 = vsub.f32 %v8275_v19, %v20717_v23  ;;  %v8449_v25 = vand.u32 4294901760, %v8448_v22  ;;  %v20764_v22 = vand.u32 4294901760, %v20744_v16  ;;  %v9048_v29 = vld [vmem:[#allocation2 + $0x32] sm:$0xff] }
 0x46b   : > { %v9065_v8 = vsel %vm7453_vm3, %v9048_v29, 0 }
 0x46c   : > { %v22147_v4 = vand.u32 4294901760, %v20726_v42 }
 0x46d   : > { %17356 = vmatmul.mubr.f32.gmra.mrb[12].mxu1 %v20635_v10 }
 0x46e   : > { %17358 = vmatprep.mubr.f32.mxu1 %v20629_v48  ;;  %v9047_v48 = vld [vmem:[#allocation2 + $0x22] sm:$0xff] }
 0x471   : > { %17359 = vmatmul.mubr.f32.gmra.mrb[14].mxu1 %v20654_v31 }
 0x472   : > { %17363 = vmatprep.mubr.f32.mxu1 %v20520_v1 }
 0x475   : > { %17364 = vmatmul.mubr.f32.vlgmr.msra.gmra.mrb[8].mxu1 %v20567_v63 }
 0x476   : > { %17376 = vmatpush3.msra.mxu1 %v20528_v55  ;;  %17366 = vmatprep.mubr.f32.mxu1 %v20565_v37  ;;  %v7485_v55 = vld [vmem:[#allocation2 + $0x10] sm:$0xff] }
 0x477   : > { %17389 = vmatprep.subr.mxu1 %v20700_v3  ;;  %v8278_v53 = vsel %vm7453_vm3, %v7485_v55, 0  ;;  %v20759_v55 = vsub.f32 %v8284_v61, %v20741_v39 }
 0x478   : > { %v20728_v57 = vand.u32 4294901760, %v8278_v53 }
 0x479   : > { %17367 = vmatmul.mubr.f32.gmra.mrb[10].mxu1 %v20587_v41  ;;  %v20777_v40 = vand.u32 4294901760, %v20759_v55 }
 0x47a   : > { %17369 = vmatprep.mubr.f32.mxu1 %v20582_v11  ;;  %v20739_v18 = vsub.f32 %v8278_v53, %v20728_v57  ;;  %v20767_v53 = vsub.f32 %v8287_v28, %v20746_v32  ;;  %v20782_v28 = vand.u32 4294901760, %v8296_v26 }
 0x47b   : > { %v8397_v21 = vsub.f32 %v20759_v55, %v20777_v40 }
 0x47c   : > { %v20756_v19 = vand.u32 4294901760, %v20739_v18  ;;  %v20787_v12 = vand.u32 4294901760, %v20767_v53  ;;  %v20801_v24 = vsub.f32 %v8296_v26, %v20782_v28 }
 0x47d   : > { %17370 = vmatmul.mubr.f32.gmra.mrb[12].mxu1 %v20611_v60 }
 0x47e   : > { %17372 = vmatprep.mubr.f32.mxu1 %v20604_v17  ;;  %v8377_v61 = vsub.f32 %v20739_v18, %v20756_v19  ;;  %v8407_v9 = vsub.f32 %v20767_v53, %v20787_v12  ;;  %v20817_v26 = vand.u32 4294901760, %v20801_v24 }
 0x481   : > { %17373 = vmatmul.mubr.f32.gmra.mrb[14].mxu1 %v20637_v6 }
 0x482   : > { %17377 = vmatprep.mubr.f32.mxu1 %v20520_v1  ;;  %v21905_v1 = vand.u32 4294901760, %v20726_v42 }
 0x484   : > { %v8367_v14 = vsub.f32 %v20726_v42, %v21905_v1  ;;  %v8387_v1 = vsub.f32 %v20744_v16, %v20764_v22 }
 0x485   : > { %17378 = vmatmul.mubr.f32.vlgmr.msra.gmra.mrb[8].mxu1 %v20567_v63 }
 0x486   : > { %17390 = vmatpush3.msra.mxu1 %v20700_v3  ;;  %17380 = vmatprep.mubr.f32.mxu1 %v20565_v37  ;;  %v8368_v44 = vand.u32 4294901760, %v8367_v14  ;;  %v20793_v14 = vand.u32 4294901760, %v8377_v61  ;;  %v20803_v2 = vand.u32 4294901760, %v8387_v1  ;;  %v8417_v61 = vsub.f32 %v20780_v62, %v20798_v51 }
 0x487   : > { %17403 = vmatprep.subr.mxu1 %v8449_v25  ;;  %v20820_v1 = vand.u32 4294901760, %v8407_v9 }
 0x489   : > { %17381 = vmatmul.mubr.f32.gmra.mrb[10].mxu1 %v20587_v41 }
 0x48a   : > { %17383 = vmatprep.mubr.f32.mxu1 %v20582_v11  ;;  %v9077_v11 = vsel %vm7453_vm3, %v9052_v35, 0 }
 0x48d   : > { %17384 = vmatmul.mubr.f32.gmra.mrb[12].mxu1 %v20611_v60 }
 0x48e   : > { %17386 = vmatprep.mubr.f32.mxu1 %v20604_v17 }
 0x491   : > { %17387 = vmatmul.mubr.f32.gmra.mrb[14].mxu1 %v20637_v6 }
 0x492   : > { %17391 = vmatprep.mubr.f32.mxu1 %v8368_v44  ;;  %v20812_v44 = vand.u32 4294901760, %v8397_v21  ;;  %v8437_v21 = vsub.f32 %v20801_v24, %v20817_v26 }
 0x494   : > { %v20834_v9 = vand.u32 4294901760, %v8437_v21 }
 0x495   : > { %17392 = vmatmul.mubr.f32.vlgmr.msra.gmra.mrb[8].mxu1 %v20793_v14 }
 0x496   : > { %17404 = vmatpush3.msra.mxu1 %v8449_v25  ;;  %17394 = vmatprep.mubr.f32.mxu1 %v20803_v2  ;;  %v20826_v25 = vand.u32 4294901760, %v8417_v61  ;;  %v9045_v61 = vld [vmem:[#allocation2 + $0x2] sm:$0xff] }
 0x497   : > { %17417 = vmatprep.subr.mxu1 %v20707_v58  ;;  %v9056_v21 = vsel %vm7453_vm3, %v9045_v61, 0  ;;  %v9062_v61 = vsel %vm7453_vm3, %v9047_v48, 0 }
 0x498   : > { %v20889_v31 = vand.u32 4294901760, %v9056_v21  ;;  %v20902_v59 = vand.u32 4294901760, %v9062_v61 }
 0x499   : > { %17395 = vmatmul.mubr.f32.gmra.mrb[10].mxu1 %v20812_v44 }
 0x49a   : > { %17397 = vmatprep.mubr.f32.mxu1 %v20820_v1  ;;  %v20898_v13 = vsub.f32 %v9056_v21, %v20889_v31  ;;  %v20916_v29 = vsub.f32 %v9062_v61, %v20902_v59 }
 0x49c   : > { %v21936_v48 = vand.u32 4294901760, %v20898_v13 }
 0x49d   : > { %17398 = vmatmul.mubr.f32.gmra.mrb[12].mxu1 %v20826_v25 }
 0x49e   : > { %17400 = vmatprep.mubr.f32.mxu1 %v20830_v15 }
 0x4a1   : > { %17401 = vmatmul.mubr.f32.gmra.mrb[14].mxu1 %v20834_v9 }
 0x4a2   : > { %17405 = vmatprep.mubr.f32.mxu1 %v20717_v23 }
 0x4a5   : > { %17406 = vmatmul.mubr.f32.vlgmr.msra.gmra.mrb[8].mxu1 %v20728_v57 }
 0x4a6   : > { %17418 = vmatpush3.msra.mxu1 %v20707_v58  ;;  %17408 = vmatprep.mubr.f32.mxu1 %v20730_v43  ;;  %v15507_v58 = vld [vmem:[%s21767_s4 + $0x10] sm:$0xff] }
 0x4a7   : > { %17431 = vmatprep.subr.mxu1 %v20700_v3 }
 0x4a9   : > { %17409 = vmatmul.mubr.f32.gmra.mrb[10].mxu1 %v20741_v39 }
 0x4aa   : > { %17411 = vmatprep.mubr.f32.mxu1 %v20746_v32 }
 0x4ad   : > { %17412 = vmatmul.mubr.f32.gmra.mrb[12].mxu1 %v20761_v5 }
 0x4ae   : > { %17414 = vmatprep.mubr.f32.mxu1 %v20769_v20 }
 0x4b1   : > { %17415 = vmatmul.mubr.f32.gmra.mrb[14].mxu1 %v20782_v28 }
 0x4b2   : > { %17419 = vmatprep.mubr.f32.mxu1 %v20726_v42 }
 0x4b5   : > { %17420 = vmatmul.mubr.f32.vlgmr.msra.gmra.mrb[8].mxu1 %v20739_v18 }
 0x4b6   : > { %17432 = vmatpush3.msra.mxu1 %v20700_v3  ;;  %17422 = vmatprep.mubr.f32.mxu1 %v20744_v16 }
 0x4b7   : > { %17445 = vmatprep.subr.mxu1 %v20713_v0 }
 0x4b9   : > { %17423 = vmatmul.mubr.f32.gmra.mrb[10].mxu1 %v20759_v55 }
 0x4ba   : > { %17425 = vmatprep.mubr.f32.mxu1 %v20767_v53 }
 0x4bd   : > { %17426 = vmatmul.mubr.f32.gmra.mrb[12].mxu1 %v20780_v62 }
 0x4be   : > { %17428 = vmatprep.mubr.f32.mxu1 %v20790_v47 }
 0x4c1   : > { %17429 = vmatmul.mubr.f32.gmra.mrb[14].mxu1 %v20801_v24 }
 0x4c2   : > { %17433 = vmatprep.mubr.f32.mxu1 %v22147_v4 }
 0x4c5   : > { %17434 = vmatmul.mubr.f32.vlgmr.msra.gmra.mrb[8].mxu1 %v20756_v19 }
 0x4c6   : > { %17446 = vmatpush3.msra.mxu1 %v20713_v0  ;;  %17436 = vmatprep.mubr.f32.mxu1 %v20764_v22  ;;  %v20872_v0 = vand.u32 4294901760, %v15507_v58 }
 0x4c7   : > { %17459 = vmatprep.subr.mxu1 %v20700_v3 }
 0x4c8   : > { %v20879_v42 = vsub.f32 %v15507_v58, %v20872_v0 }
 0x4c9   : > { %17437 = vmatmul.mubr.f32.gmra.mrb[10].mxu1 %v20777_v40 }
 0x4ca   : > { %17439 = vmatprep.mubr.f32.mxu1 %v20787_v12  ;;  %v20885_v4 = vand.u32 4294901760, %v20879_v42 }
 0x4cc   : > { %v9229_v58 = vsub.f32 %v20879_v42, %v20885_v4 }
 0x4cd   : > { %17440 = vmatmul.mubr.f32.gmra.mrb[12].mxu1 %v20798_v51 }
 0x4ce   : > { %17442 = vmatprep.mubr.f32.mxu1 %v20808_v49  ;;  %v9230_v38 = vand.u32 4294901760, %v9229_v58  ;;  %v20913_v58 = vand.u32 4294901760, %v9065_v8 }
 0x4d0   : > { %v20931_v61 = vsub.f32 %v9065_v8, %v20913_v58 }
 0x4d1   : > { %17443 = vmatmul.mubr.f32.gmra.mrb[14].mxu1 %v20817_v26 }
 0x4d2   : > { %17447 = vmatprep.mubr.f32.mxu1 %v20717_v23  ;;  %v20949_v41 = vand.u32 4294901760, %v20931_v61 }
 0x4d5   : > { %17448 = vmatmul.mubr.f32.vlgmr.msra.gmra.mrb[8].mxu1 %v20728_v57 }
 0x4d6   : > { %17460 = vmatpush3.msra.mxu1 %v20700_v3  ;;  %17450 = vmatprep.mubr.f32.mxu1 %v20730_v43  ;;  %v9046_v3 = vld [vmem:[#allocation2 + $0x12] sm:$0xff] }
 0x4d7   : > { %17473 = vmatprep.subr.mxu1 %v20872_v0  ;;  %v9059_v10 = vsel %vm7453_vm3, %v9046_v3, 0  ;;  %v9068_v3 = vsel %vm7453_vm3, %v9049_v27, 0  ;;  %v9071_v27 = vsel %vm7453_vm3, %v9050_v33, 0  ;;  %v20936_v33 = vand.u32 4294901760, %v20916_v29 }
 0x4d8   : > { %v20900_v45 = vand.u32 4294901760, %v9059_v10  ;;  %v20918_v54 = vand.u32 4294901760, %v9068_v3  ;;  %v20933_v17 = vand.u32 4294901760, %v9071_v27 }
 0x4d9   : > { %17451 = vmatmul.mubr.f32.gmra.mrb[10].mxu1 %v20741_v39  ;;  %v9168_v63 = vsub.f32 %v20916_v29, %v20936_v33 }
 0x4da   : > { %17453 = vmatprep.mubr.f32.mxu1 %v20746_v32  ;;  %v20911_v21 = vsub.f32 %v9059_v10, %v20900_v45  ;;  %v9148_v10 = vsub.f32 %v20898_v13, %v21936_v48  ;;  %v20952_v37 = vsub.f32 %v9071_v27, %v20933_v17  ;;  %v9178_v27 = vsub.f32 %v20931_v61, %v20949_v41 }
 0x4db   : > { %v20975_v46 = vand.u32 4294901760, %v9168_v63 }
 0x4dc   : > { %v20928_v6 = vand.u32 4294901760, %v20911_v21  ;;  %v9149_v48 = vand.u32 4294901760, %v9148_v10  ;;  %v20970_v56 = vand.u32 4294901760, %v20952_v37 }
 0x4dd   : > { %17454 = vmatmul.mubr.f32.gmra.mrb[12].mxu1 %v20761_v5  ;;  %22148 = vst [vmem:[#allocation8_spill] sm:$0xff] %v20975_v46 }
 0x4de   : > { %17456 = vmatprep.mubr.f32.mxu1 %v20769_v20  ;;  %v9158_v8 = vsub.f32 %v20911_v21, %v20928_v6 }
 0x4e0   : > { %v20965_v10 = vand.u32 4294901760, %v9158_v8  ;;  %v9198_v8 = vsub.f32 %v20952_v37, %v20970_v56 }
 0x4e1   : > { %17457 = vmatmul.mubr.f32.gmra.mrb[14].mxu1 %v20782_v28 }
 0x4e2   : > { %17461 = vmatprep.mubr.f32.mxu1 %v20717_v23  ;;  %v9051_v23 = vld [vmem:[#allocation2 + $0x62] sm:$0xff] }
 0x4e3   : > { %v9074_v52 = vsel %vm7453_vm3, %v9051_v23, 0  ;;  %v20939_v23 = vsub.f32 %v9068_v3, %v20918_v54  ;;  %v20954_v3 = vand.u32 4294901760, %v9077_v11 }
 0x4e4   : > { %v20941_v60 = vand.u32 4294901760, %v9074_v52 }
 0x4e5   : > { %17462 = vmatmul.mubr.f32.vlgmr.msra.gmra.mrb[8].mxu1 %v20728_v57  ;;  %v20959_v35 = vand.u32 4294901760, %v20939_v23  ;;  %v20973_v7 = vsub.f32 %v9077_v11, %v20954_v3 }
 0x4e6   : > { %17474 = vmatpush3.msra.mxu1 %v20872_v0  ;;  %17464 = vmatprep.mubr.f32.mxu1 %v20730_v43  ;;  %v20962_v36 = vsub.f32 %v9074_v52, %v20941_v60 }
 0x4e7   : > { %17487 = vmatprep.subr.mxu1 %v9230_v38  ;;  %v9188_v52 = vsub.f32 %v20939_v23, %v20959_v35  ;;  %v20989_v11 = vand.u32 4294901760, %v20973_v7 }
 0x4e8   : > { %v20980_v30 = vand.u32 4294901760, %v20962_v36 }
 0x4e9   : > { %17465 = vmatmul.mubr.f32.gmra.mrb[10].mxu1 %v20741_v39  ;;  %22149 = vst [vmem:[#allocation9_spill] sm:$0xff] %v20989_v11  ;;  %v20992_v63 = vand.u32 4294901760, %v9188_v52 }
 0x4ea   : > { %17467 = vmatprep.mubr.f32.mxu1 %v20746_v32  ;;  %v9208_v50 = vsub.f32 %v20962_v36, %v20980_v30 }
 0x4ed   : > { %17468 = vmatmul.mubr.f32.gmra.mrb[12].mxu1 %v20761_v5 }
 0x4ee   : > { %17470 = vmatprep.mubr.f32.mxu1 %v20769_v20 }
 0x4f1   : > { %17471 = vmatmul.mubr.f32.gmra.mrb[14].mxu1 %v20782_v28 }
 0x4f2   : > { %17475 = vmatprep.mubr.f32.mxu1 %v9149_v48  ;;  %v20984_v48 = vand.u32 4294901760, %v9178_v27  ;;  %v9218_v27 = vsub.f32 %v20973_v7, %v20989_v11 }
 0x4f4   : > { %v21006_v52 = vand.u32 4294901760, %v9218_v27 }
 0x4f5   : > { %17476 = vmatmul.mubr.f32.vlgmr.msra.gmra.mrb[8].mxu1 %v20965_v10 }
 0x4f6   : > { %17488 = vmatpush3.msra.mxu1 %v9230_v38  ;;  %17478 = vmatprep.mubr.f32.mxu1 %v20975_v46  ;;  %v20998_v38 = vand.u32 4294901760, %v9198_v8  ;;  %v21002_v46 = vand.u32 4294901760, %v9208_v50  ;;  %v22150_v50 = vand.u32 4294901760, %v20898_v13 }
 0x4f7   : > { %17501 = vmatprep.subr.mxu1 %v20879_v42 }
 0x4f9   : > { %17479 = vmatmul.mubr.f32.gmra.mrb[10].mxu1 %v20984_v48 }
 0x4fa   : > { %17481 = vmatprep.mubr.f32.mxu1 %v20992_v63 }
 0x4fd   : > { %17482 = vmatmul.mubr.f32.gmra.mrb[12].mxu1 %v20998_v38 }
 0x4fe   : > { %17484 = vmatprep.mubr.f32.mxu1 %v21002_v46 }
 0x501   : > { %17485 = vmatmul.mubr.f32.gmra.mrb[14].mxu1 %v21006_v52 }
 0x502   : > { %17489 = vmatprep.mubr.f32.mxu1 %v20889_v31 }
 0x505   : > { %17490 = vmatmul.mubr.f32.vlgmr.msra.gmra.mrb[8].mxu1 %v20900_v45 }
 0x506   : > { %17502 = vmatpush3.msra.mxu1 %v20879_v42  ;;  %17492 = vmatprep.mubr.f32.mxu1 %v20902_v59 }
 0x507   : > { %17515 = vmatprep.subr.mxu1 %v20872_v0 }
 0x509   : > { %17493 = vmatmul.mubr.f32.gmra.mrb[10].mxu1 %v20913_v58 }
 0x50a   : > { %17495 = vmatprep.mubr.f32.mxu1 %v20918_v54 }
 0x50d   : > { %17496 = vmatmul.mubr.f32.gmra.mrb[12].mxu1 %v20933_v17 }
 0x50e   : > { %17498 = vmatprep.mubr.f32.mxu1 %v20941_v60 }
 0x511   : > { %17499 = vmatmul.mubr.f32.gmra.mrb[14].mxu1 %v20954_v3 }
 0x512   : > { %17503 = vmatprep.mubr.f32.mxu1 %v20898_v13  ;;  %v15508_v13 = vld [vmem:[%s21767_s4 + $0x18] sm:$0xff] }
 0x513   : > { %v21044_v42 = vand.u32 4294901760, %v15508_v13 }
 0x515   : > { %17504 = vmatmul.mubr.f32.vlgmr.msra.gmra.mrb[8].mxu1 %v20911_v21 }
 0x516   : > { %17516 = vmatpush3.msra.mxu1 %v20872_v0  ;;  %17506 = vmatprep.mubr.f32.mxu1 %v20916_v29 }
 0x517   : > { %17529 = vmatprep.subr.mxu1 %v20885_v4 }
 0x519   : > { %17507 = vmatmul.mubr.f32.gmra.mrb[10].mxu1 %v20931_v61 }
 0x51a   : > { %17509 = vmatprep.mubr.f32.mxu1 %v20939_v23 }
 0x51d   : > { %17510 = vmatmul.mubr.f32.gmra.mrb[12].mxu1 %v20952_v37 }
 0x51e   : > { %17512 = vmatprep.mubr.f32.mxu1 %v20962_v36 }
 0x521   : > { %17513 = vmatmul.mubr.f32.gmra.mrb[14].mxu1 %v20973_v7 }
 0x522   : > { %17517 = vmatprep.mubr.f32.mxu1 %v22150_v50  ;;  %v9841_v50 = vld [vmem:[#allocation2 + $0x80] sm:$0xff] }
 0x525   : > { %17518 = vmatmul.mubr.f32.vlgmr.msra.gmra.mrb[8].mxu1 %v20928_v6 }
 0x526   : > { %17530 = vmatpush3.msra.mxu1 %v20885_v4  ;;  %17520 = vmatprep.mubr.f32.mxu1 %v20936_v33  ;;  %v10016_v4 = vsub.f32 %v15508_v13, %v21044_v42  ;;  %v9866_v13 = vsel %vm7453_vm3, %v9841_v50, 0 }
 0x527   : > { %17543 = vmatprep.subr.mxu1 %v20872_v0 }
 0x528   : > { %v10017_v8 = vand.u32 4294901760, %v10016_v4 }
 0x529   : > { %17521 = vmatmul.mubr.f32.gmra.mrb[10].mxu1 %v20949_v41 }
 0x52a   : > { %17523 = vmatprep.mubr.f32.mxu1 %v20959_v35  ;;  %v10018_v27 = vsub.f32 %v10016_v4, %v10017_v8 }
 0x52d   : > { %17524 = vmatmul.mubr.f32.gmra.mrb[12].mxu1 %v20970_v56 }
 0x52e   : > { %17526 = vmatprep.mubr.f32.mxu1 %v20980_v30 }
 0x531   : > { %17527 = vmatmul.mubr.f32.gmra.mrb[14].mxu1 %v20989_v11 }
 0x532   : > { %17531 = vmatprep.mubr.f32.mxu1 %v20889_v31 }
 0x535   : > { %17532 = vmatmul.mubr.f32.vlgmr.msra.gmra.mrb[8].mxu1 %v20900_v45 }
 0x536   : > { %17544 = vmatpush3.msra.mxu1 %v20872_v0  ;;  %17534 = vmatprep.mubr.f32.mxu1 %v20902_v59  ;;  %v10019_v0 = vand.u32 4294901760, %v10018_v27 }
 0x537   : > { %17557 = vmatprep.subr.mxu1 %v21044_v42 }
 0x539   : > { %17535 = vmatmul.mubr.f32.gmra.mrb[10].mxu1 %v20913_v58 }
 0x53a   : > { %17537 = vmatprep.mubr.f32.mxu1 %v20918_v54 }
 0x53d   : > { %17538 = vmatmul.mubr.f32.gmra.mrb[12].mxu1 %v20933_v17 }
 0x53e   : > { %17540 = vmatprep.mubr.f32.mxu1 %v20941_v60 }
 0x541   : > { %17541 = vmatmul.mubr.f32.gmra.mrb[14].mxu1 %v20954_v3 }
 0x542   : > { %17545 = vmatprep.mubr.f32.mxu1 %v20889_v31  ;;  %v21065_v31 = vand.u32 4294901760, %v9866_v13 }
 0x544   : > { %v21070_v27 = vsub.f32 %v9866_v13, %v21065_v31  ;;  %v22171_v13 = vld [vmem:[#allocation35_spill] sm:$0xff] }
 0x545   : > { %17546 = vmatmul.mubr.f32.vlgmr.msra.gmra.mrb[8].mxu1 %v20900_v45 }
 0x546   : > { %17558 = vmatpush3.msra.mxu1 %v21044_v42  ;;  %17548 = vmatprep.mubr.f32.mxu1 %v20902_v59  ;;  %v21075_v50 = vand.u32 4294901760, %v21070_v27 }
 0x547   : > { %17571 = vmatprep.subr.mxu1 %v10019_v0 }
 0x548   : > { %v10007_v11 = vsub.f32 %v21070_v27, %v21075_v50 }
 0x549   : > { %17549 = vmatmul.mubr.f32.gmra.mrb[10].mxu1 %v20913_v58 }
 0x54a   : > { %17551 = vmatprep.mubr.f32.mxu1 %v20918_v54 }
 0x54d   : > { %17552 = vmatmul.mubr.f32.gmra.mrb[12].mxu1 %v20933_v17 }
 0x54e   : > { %17554 = vmatprep.mubr.f32.mxu1 %v20941_v60 }
 0x551   : > { %17555 = vmatmul.mubr.f32.gmra.mrb[14].mxu1 %v20954_v3 }
 0x552   : > { %17559 = vmatprep.mubr.f32.mxu1 %v20793_v14  ;;  %v21083_v14 = vand.u32 4294901760, %v10007_v11  ;;  %v22166_v11 = vld [vmem:[#allocation40_spill] sm:$0xff] }
 0x555   : > { %17560 = vmatmul.mubr.f32.vlgmr.msra.gmra.mrb[8].mxu1 %v20803_v2 }
 0x556   : > { %17572 = vmatpush3.msra.mxu1 %v10019_v0  ;;  %17562 = vmatprep.mubr.f32.mxu1 %v20812_v44  ;;  %v22161_v44 = vld [vmem:[#allocation14_spill] sm:$0xff] }
 0x557   : > { %17585 = vmatprep.subr.mxu1 %v10016_v4  ;;  %v22170_v0 = vld [vmem:[#allocation26_spill] sm:$0xff] }
 0x559   : > { %17563 = vmatmul.mubr.f32.gmra.mrb[10].mxu1 %v20820_v1  ;;  %v22163_v1 = vld [vmem:[#allocation23_spill] sm:$0xff] }
 0x55a   : > { %17565 = vmatprep.mubr.f32.mxu1 %v20826_v25  ;;  %v22164_v25 = vld [vmem:[#allocation31_spill] sm:$0xff] }
 0x55d   : > { %17566 = vmatmul.mubr.f32.gmra.mrb[12].mxu1 %v20830_v15 }
 0x55e   : > { %17568 = vmatprep.mubr.f32.mxu1 %v20834_v9  ;;  %v22165_v9 = vld [vmem:[#allocation38_spill] sm:$0xff] }
 0x561   : > { %17569 = vmatmul.mubr.f32.gmra.mrb[14].mxu1 %v21083_v14 }
 0x562   : > { %17573 = vmatprep.mubr.f32.mxu1 %v20728_v57 }
 0x565   : > { %17574 = vmatmul.mubr.f32.vlgmr.msra.gmra.mrb[8].mxu1 %v20730_v43 }
 0x566   : > { %17586 = vmatpush3.msra.mxu1 %v10016_v4  ;;  %17576 = vmatprep.mubr.f32.mxu1 %v20741_v39  ;;  %v22168_v4 = vld [vmem:[#allocation16_spill] sm:$0xff] }
 0x567   : > { %17599 = vmatprep.subr.mxu1 %v21044_v42 }
 0x569   : > { %17577 = vmatmul.mubr.f32.gmra.mrb[10].mxu1 %v20746_v32 }
 0x56a   : > { %17579 = vmatprep.mubr.f32.mxu1 %v20761_v5 }
 0x56d   : > { %17580 = vmatmul.mubr.f32.gmra.mrb[12].mxu1 %v20769_v20 }
 0x56e   : > { %17582 = vmatprep.mubr.f32.mxu1 %v20782_v28 }
 0x571   : > { %17583 = vmatmul.mubr.f32.gmra.mrb[14].mxu1 %v21065_v31 }
 0x572   : > { %17587 = vmatprep.mubr.f32.mxu1 %v20739_v18  ;;  %v10630_v18 = vld [vmem:[#allocation2 + $0x81] sm:$0xff] }
 0x575   : > { %17588 = vmatmul.mubr.f32.vlgmr.msra.gmra.mrb[8].mxu1 %v20744_v16  ;;  %v10655_v16 = vsel %vm7453_vm3, %v10630_v18, 0  ;;  %v22176_v18 = vld [vmem:[#allocation25_spill] sm:$0xff] }
 0x576   : > { %17600 = vmatpush3.msra.mxu1 %v21044_v42  ;;  %17590 = vmatprep.mubr.f32.mxu1 %v20759_v55  ;;  %v22153_v55 = vld [vmem:[#allocation29_spill] sm:$0xff] }
 0x577   : > { %17613 = vmatprep.subr.mxu1 %v10017_v8 }
 0x579   : > { %17591 = vmatmul.mubr.f32.gmra.mrb[10].mxu1 %v20767_v53  ;;  %v22156_v53 = vld [vmem:[#allocation6_spill] sm:$0xff] }
 0x57a   : > { %17593 = vmatprep.mubr.f32.mxu1 %v20780_v62  ;;  %v22158_v62 = vld [vmem:[#allocation34_spill] sm:$0xff] }
 0x57d   : > { %17594 = vmatmul.mubr.f32.gmra.mrb[12].mxu1 %v20790_v47  ;;  %v15509_v47 = vld [vmem:[%s21767_s4 + $0x20] sm:$0xff] }
 0x57e   : > { %17596 = vmatprep.mubr.f32.mxu1 %v20801_v24  ;;  %v21117_v24 = vand.u32 4294901760, %v15509_v47 }
 0x580   : > { %v10805_v15 = vsub.f32 %v15509_v47, %v21117_v24  ;;  %v22172_v47 = vld [vmem:[#allocation32_spill] sm:$0xff] }
 0x581   : > { %17597 = vmatmul.mubr.f32.gmra.mrb[14].mxu1 %v21070_v27 }
 0x582   : > { %17601 = vmatprep.mubr.f32.mxu1 %v20756_v19 }
 0x585   : > { %17602 = vmatmul.mubr.f32.vlgmr.msra.gmra.mrb[8].mxu1 %v20764_v22 }
 0x586   : > { %17614 = vmatpush3.msra.mxu1 %v10017_v8  ;;  %17604 = vmatprep.mubr.f32.mxu1 %v20777_v40  ;;  %v22157_v40 = vld [vmem:[#allocation36_spill] sm:$0xff]  ;;  %v22169_v8 = vld [vmem:[#allocation22_spill] sm:$0xff] }
 0x587   : > { %17627 = vmatprep.subr.mxu1 %v21044_v42 }
 0x589   : > { %17605 = vmatmul.mubr.f32.gmra.mrb[10].mxu1 %v20787_v12  ;;  %v22160_v12 = vld [vmem:[#allocation33_spill] sm:$0xff] }
 0x58a   : > { %17607 = vmatprep.mubr.f32.mxu1 %v20798_v51 }
 0x58d   : > { %17608 = vmatmul.mubr.f32.gmra.mrb[12].mxu1 %v20808_v49  ;;  %v10806_v49 = vand.u32 4294901760, %v10805_v15 }
 0x58e   : > { %17610 = vmatprep.mubr.f32.mxu1 %v20817_v26  ;;  %v22162_v26 = vld [vmem:[#allocation13_spill] sm:$0xff] }
 0x58f   : > { %v10807_v2 = vsub.f32 %v10805_v15, %v10806_v49 }
 0x591   : > { %17611 = vmatmul.mubr.f32.gmra.mrb[14].mxu1 %v21075_v50  ;;  %v10808_v51 = vand.u32 4294901760, %v10807_v2  ;;  %v22174_v2 = vld [vmem:[#allocation19_spill] sm:$0xff] }
 0x592   : > { %17615 = vmatprep.mubr.f32.mxu1 %v20728_v57 }
 0x595   : > { %17616 = vmatmul.mubr.f32.vlgmr.msra.gmra.mrb[8].mxu1 %v20730_v43 }
 0x596   : > { %17628 = vmatpush3.msra.mxu1 %v21044_v42  ;;  %17618 = vmatprep.mubr.f32.mxu1 %v20741_v39  ;;  %v22167_v42 = vld [vmem:[#allocation39_spill] sm:$0xff] }
 0x597   : > { %17641 = vmatprep.subr.mxu1 %v21117_v24 }
 0x599   : > { %17619 = vmatmul.mubr.f32.gmra.mrb[10].mxu1 %v20746_v32 }
 0x59a   : > { %17621 = vmatprep.mubr.f32.mxu1 %v20761_v5 }
 0x59d   : > { %17622 = vmatmul.mubr.f32.gmra.mrb[12].mxu1 %v20769_v20 }
 0x59e   : > { %17624 = vmatprep.mubr.f32.mxu1 %v20782_v28 }
 0x5a1   : > { %17625 = vmatmul.mubr.f32.gmra.mrb[14].mxu1 %v21065_v31 }
 0x5a2   : > { %17629 = vmatprep.mubr.f32.mxu1 %v20728_v57  ;;  %v21138_v57 = vand.u32 4294901760, %v10655_v16 }
 0x5a5   : > { %17630 = vmatmul.mubr.f32.vlgmr.msra.gmra.mrb[8].mxu1 %v20730_v43  ;;  %v21143_v43 = vsub.f32 %v10655_v16, %v21138_v57  ;;  %v22177_v16 = vld [vmem:[#allocation28_spill] sm:$0xff] }
 0x5a6   : > { %17642 = vmatpush3.msra.mxu1 %v21117_v24  ;;  %17632 = vmatprep.mubr.f32.mxu1 %v20741_v39  ;;  %v22151_v39 = vld [vmem:[#allocation12_spill] sm:$0xff] }
 0x5a7   : > { %17655 = vmatprep.subr.mxu1 %v10808_v51  ;;  %v21148_v19 = vand.u32 4294901760, %v21143_v43 }
 0x5a9   : > { %17633 = vmatmul.mubr.f32.gmra.mrb[10].mxu1 %v20746_v32  ;;  %v22152_v32 = vld [vmem:[#allocation21_spill] sm:$0xff]  ;;  %v10796_v22 = vsub.f32 %v21143_v43, %v21148_v19 }
 0x5aa   : > { %17635 = vmatprep.mubr.f32.mxu1 %v20761_v5  ;;  %v22154_v5 = vld [vmem:[#allocation30_spill] sm:$0xff] }
 0x5ad   : > { %17636 = vmatmul.mubr.f32.gmra.mrb[12].mxu1 %v20769_v20  ;;  %v21156_v20 = vand.u32 4294901760, %v10796_v22  ;;  %v11419_v22 = vld [vmem:[#allocation2 + $0x82] sm:$0xff] }
 0x5ae   : > { %17638 = vmatprep.mubr.f32.mxu1 %v20782_v28  ;;  %v22159_v28 = vld [vmem:[#allocation37_spill] sm:$0xff] }
 0x5b1   : > { %17639 = vmatmul.mubr.f32.gmra.mrb[14].mxu1 %v21065_v31 }
 0x5b2   : > { %17643 = vmatprep.mubr.f32.mxu1 %v20606_v34  ;;  %v22155_v34 = vld [vmem:[#allocation7_spill] sm:$0xff] }
 0x5b5   : > { %17644 = vmatmul.mubr.f32.vlgmr.msra.gmra.mrb[8].mxu1 %v22151_v39  ;;  %v15510_v39 = vld [vmem:[%s21767_s4 + $0x28] sm:$0xff] }
 0x5b6   : > { %17656 = vmatpush3.msra.mxu1 %v10808_v51  ;;  %17646 = vmatprep.mubr.f32.mxu1 %v22152_v32  ;;  %v22175_v51 = vld [vmem:[#allocation27_spill] sm:$0xff] }
 0x5b7   : > { %17669 = vmatprep.subr.mxu1 %v10805_v15 }
 0x5b9   : > { %17647 = vmatmul.mubr.f32.gmra.mrb[10].mxu1 %v22153_v55 }
 0x5ba   : > { %17649 = vmatprep.mubr.f32.mxu1 %v22154_v5 }
 0x5bd   : > { %17650 = vmatmul.mubr.f32.gmra.mrb[12].mxu1 %v22155_v34  ;;  %v11444_v34 = vsel %vm7453_vm3, %v11419_v22, 0 }
 0x5be   : > { %17652 = vmatprep.mubr.f32.mxu1 %v22156_v53  ;;  %v21211_v53 = vand.u32 4294901760, %v11444_v34 }
 0x5c1   : > { %17653 = vmatmul.mubr.f32.gmra.mrb[14].mxu1 %v21156_v20 }
 0x5c2   : > { %17657 = vmatprep.mubr.f32.mxu1 %v22157_v40 }
 0x5c5   : > { %17658 = vmatmul.mubr.f32.vlgmr.msra.gmra.mrb[8].mxu1 %v22158_v62 }
 0x5c6   : > { %17670 = vmatpush3.msra.mxu1 %v10805_v15  ;;  %17660 = vmatprep.mubr.f32.mxu1 %v22159_v28  ;;  %v22173_v15 = vld [vmem:[#allocation20_spill] sm:$0xff] }
 0x5c7   : > { %17683 = vmatprep.subr.mxu1 %v21117_v24 }
 0x5c9   : > { %17661 = vmatmul.mubr.f32.gmra.mrb[10].mxu1 %v22160_v12 }
 0x5ca   : > { %17663 = vmatprep.mubr.f32.mxu1 %v22161_v44 }
 0x5cd   : > { %17664 = vmatmul.mubr.f32.gmra.mrb[12].mxu1 %v22162_v26 }
 0x5ce   : > { %17666 = vmatprep.mubr.f32.mxu1 %v22163_v1 }
 0x5d1   : > { %17667 = vmatmul.mubr.f32.gmra.mrb[14].mxu1 %v21138_v57 }
 0x5d2   : > { %17671 = vmatprep.mubr.f32.mxu1 %v22164_v25  ;;  %v12207_v25 = vld [vmem:[#allocation2 + $0x70] sm:$0xff] }
 0x5d5   : > { %17672 = vmatmul.mubr.f32.vlgmr.msra.gmra.mrb[8].mxu1 %v22165_v9 }
 0x5d6   : > { %17684 = vmatpush3.msra.mxu1 %v21117_v24  ;;  %17674 = vmatprep.mubr.f32.mxu1 %v22166_v11 }
 0x5d7   : > { %17697 = vmatprep.subr.mxu1 %v10806_v49 }
 0x5d9   : > { %17675 = vmatmul.mubr.f32.gmra.mrb[10].mxu1 %v22167_v42 }
 0x5da   : > { %17677 = vmatprep.mubr.f32.mxu1 %v22168_v4 }
 0x5dd   : > { %17678 = vmatmul.mubr.f32.gmra.mrb[12].mxu1 %v22169_v8 }
 0x5de   : > { %17680 = vmatprep.mubr.f32.mxu1 %v22170_v0 }
 0x5e1   : > { %17681 = vmatmul.mubr.f32.gmra.mrb[14].mxu1 %v21143_v43 }
 0x5e2   : > { %17685 = vmatprep.mubr.f32.mxu1 %v22171_v13 }
 0x5e5   : > { %17686 = vmatmul.mubr.f32.vlgmr.msra.gmra.mrb[8].mxu1 %v22172_v47 }
 0x5e6   : > { %17698 = vmatpush3.msra.mxu1 %v10806_v49  ;;  %17688 = vmatprep.mubr.f32.mxu1 %v22173_v15  ;;  %v21190_v49 = vand.u32 4294901760, %v15510_v39 }
 0x5e7   : > { %17711 = vmatprep.subr.mxu1 %v21117_v24 }
 0x5e8   : > { %v11594_v32 = vsub.f32 %v15510_v39, %v21190_v49 }
 0x5e9   : > { %17689 = vmatmul.mubr.f32.gmra.mrb[10].mxu1 %v22174_v2 }
 0x5ea   : > { %17691 = vmatprep.mubr.f32.mxu1 %v22175_v51  ;;  %v11595_v55 = vand.u32 4294901760, %v11594_v32 }
 0x5ec   : > { %v11596_v5 = vsub.f32 %v11594_v32, %v11595_v55 }
 0x5ed   : > { %17692 = vmatmul.mubr.f32.gmra.mrb[12].mxu1 %v22176_v18 }
 0x5ee   : > { %17694 = vmatprep.mubr.f32.mxu1 %v22177_v16  ;;  %v22180_v16 = vld [vmem:[#allocation89_spill] sm:$0xff] }
 0x5f1   : > { %17695 = vmatmul.mubr.f32.gmra.mrb[14].mxu1 %v21148_v19 }
 0x5f2   : > { %17699 = vmatprep.mubr.f32.mxu1 %v22157_v40 }
 0x5f5   : > { %17700 = vmatmul.mubr.f32.vlgmr.msra.gmra.mrb[8].mxu1 %v22158_v62 }
 0x5f6   : > { %17712 = vmatpush3.msra.mxu1 %v21117_v24  ;;  %17702 = vmatprep.mubr.f32.mxu1 %v22159_v28  ;;  %v11597_v24 = vand.u32 4294901760, %v11596_v5 }
 0x5f7   : > { %17725 = vmatprep.subr.mxu1 %v21190_v49 }
 0x5f9   : > { %17703 = vmatmul.mubr.f32.gmra.mrb[10].mxu1 %v22160_v12 }
 0x5fa   : > { %17705 = vmatprep.mubr.f32.mxu1 %v22161_v44 }
 0x5fd   : > { %17706 = vmatmul.mubr.f32.gmra.mrb[12].mxu1 %v22162_v26 }
 0x5fe   : > { %17708 = vmatprep.mubr.f32.mxu1 %v22163_v1 }
 0x601   : > { %17709 = vmatmul.mubr.f32.gmra.mrb[14].mxu1 %v21138_v57 }
 0x602   : > { %17713 = vmatprep.mubr.f32.mxu1 %v22157_v40  ;;  %v21216_v40 = vsub.f32 %v11444_v34, %v21211_v53  ;;  %v22182_v34 = vld [vmem:[#allocation94_spill] sm:$0xff] }
 0x605   : > { %17714 = vmatmul.mubr.f32.vlgmr.msra.gmra.mrb[8].mxu1 %v22158_v62  ;;  %v22178_v62 = vld [vmem:[#allocation8_spill] sm:$0xff] }
 0x606   : > { %17726 = vmatpush3.msra.mxu1 %v21190_v49  ;;  %17716 = vmatprep.mubr.f32.mxu1 %v22159_v28  ;;  %v21221_v28 = vand.u32 4294901760, %v21216_v40 }
 0x607   : > { %17739 = vmatprep.subr.mxu1 %v11597_v24 }
 0x609   : > { %17717 = vmatmul.mubr.f32.gmra.mrb[10].mxu1 %v22160_v12  ;;  %v11585_v12 = vsub.f32 %v21216_v40, %v21221_v28 }
 0x60a   : > { %17719 = vmatprep.mubr.f32.mxu1 %v22161_v44 }
 0x60d   : > { %17720 = vmatmul.mubr.f32.gmra.mrb[12].mxu1 %v22162_v26 }
 0x60e   : > { %17722 = vmatprep.mubr.f32.mxu1 %v22163_v1 }
 0x611   : > { %17723 = vmatmul.mubr.f32.gmra.mrb[14].mxu1 %v21138_v57 }
 0x612   : > { %17727 = vmatprep.mubr.f32.mxu1 %v20965_v10  ;;  %v21229_v10 = vand.u32 4294901760, %v11585_v12 }
 0x615   : > { %17728 = vmatmul.mubr.f32.vlgmr.msra.gmra.mrb[8].mxu1 %v22178_v62  ;;  %v22183_v62 = vld [vmem:[#allocation96_spill] sm:$0xff] }
 0x616   : > { %17740 = vmatpush3.msra.mxu1 %v11597_v24  ;;  %17730 = vmatprep.mubr.f32.mxu1 %v20984_v48  ;;  %v12206_v48 = vld [vmem:[#allocation2 + $0x60] sm:$0xff] }
 0x617   : > { %17753 = vmatprep.subr.mxu1 %v11594_v32  ;;  %v12225_v1 = vsel %vm7453_vm3, %v12206_v48, 0 }
 0x618   : > { %v21313_v0 = vand.u32 4294901760, %v12225_v1 }
 0x619   : > { %17731 = vmatmul.mubr.f32.gmra.mrb[10].mxu1 %v20992_v63 }
 0x61a   : > { %17733 = vmatprep.mubr.f32.mxu1 %v20998_v38 }
 0x61d   : > { %17734 = vmatmul.mubr.f32.gmra.mrb[12].mxu1 %v21002_v46  ;;  %v15511_v46 = vld [vmem:[%s21767_s4 + $0x30] sm:$0xff] }
 0x61e   : > { %17736 = vmatprep.mubr.f32.mxu1 %v21006_v52 }
 0x621   : > { %17737 = vmatmul.mubr.f32.gmra.mrb[14].mxu1 %v21229_v10 }
 0x622   : > { %17741 = vmatprep.mubr.f32.mxu1 %v20900_v45 }
 0x625   : > { %17742 = vmatmul.mubr.f32.vlgmr.msra.gmra.mrb[8].mxu1 %v20902_v59 }
 0x626   : > { %17754 = vmatpush3.msra.mxu1 %v11594_v32  ;;  %17744 = vmatprep.mubr.f32.mxu1 %v20913_v58 }
 0x627   : > { %17767 = vmatprep.subr.mxu1 %v21190_v49 }
 0x629   : > { %17745 = vmatmul.mubr.f32.gmra.mrb[10].mxu1 %v20918_v54 }
 0x62a   : > { %17747 = vmatprep.mubr.f32.mxu1 %v20933_v17 }
 0x62d   : > { %17748 = vmatmul.mubr.f32.gmra.mrb[12].mxu1 %v20941_v60 }
 0x62e   : > { %17750 = vmatprep.mubr.f32.mxu1 %v20954_v3 }
 0x631   : > { %17751 = vmatmul.mubr.f32.gmra.mrb[14].mxu1 %v21211_v53 }
 0x632   : > { %17755 = vmatprep.mubr.f32.mxu1 %v20911_v21  ;;  %v12204_v21 = vld [vmem:[#allocation2 + $0x40] sm:$0xff] }
 0x635   : > { %17756 = vmatmul.mubr.f32.vlgmr.msra.gmra.mrb[8].mxu1 %v20916_v29 }
 0x636   : > { %17768 = vmatpush3.msra.mxu1 %v21190_v49  ;;  %17758 = vmatprep.mubr.f32.mxu1 %v20931_v61 }
 0x637   : > { %17781 = vmatprep.subr.mxu1 %v11595_v55 }
 0x639   : > { %17759 = vmatmul.mubr.f32.gmra.mrb[10].mxu1 %v20939_v23  ;;  %v12219_v23 = vsel %vm7453_vm3, %v12204_v21, 0 }
 0x63a   : > { %17761 = vmatprep.mubr.f32.mxu1 %v20952_v37  ;;  %v22179_v37 = vld [vmem:[#allocation9_spill] sm:$0xff]  ;;  %v21293_v44 = vand.u32 4294901760, %v12219_v23 }
 0x63c   : > { %v21311_v8 = vsub.f32 %v12219_v23, %v21293_v44 }
 0x63d   : > { %17762 = vmatmul.mubr.f32.gmra.mrb[12].mxu1 %v20962_v36  ;;  %v12203_v36 = vld [vmem:[#allocation2 + $0x30] sm:$0xff] }
 0x63e   : > { %17764 = vmatprep.mubr.f32.mxu1 %v20973_v7 }
 0x641   : > { %17765 = vmatmul.mubr.f32.gmra.mrb[14].mxu1 %v21216_v40 }
 0x642   : > { %17769 = vmatprep.mubr.f32.mxu1 %v20928_v6  ;;  %v21263_v6 = vand.u32 4294901760, %v15511_v46 }
 0x645   : > { %17770 = vmatmul.mubr.f32.vlgmr.msra.gmra.mrb[8].mxu1 %v20936_v33  ;;  %v12216_v33 = vsel %vm7453_vm3, %v12203_v36, 0  ;;  %v22184_v36 = vld [vmem:[#allocation97_spill] sm:$0xff] }
 0x646   : > { %17782 = vmatpush3.msra.mxu1 %v11595_v55  ;;  %17772 = vmatprep.mubr.f32.mxu1 %v20949_v41  ;;  %v21270_v41 = vsub.f32 %v15511_v46, %v21263_v6  ;;  %v21291_v52 = vand.u32 4294901760, %v12216_v33 }
 0x647   : > { %17795 = vmatprep.subr.mxu1 %v21190_v49 }
 0x648   : > { %v21275_v7 = vand.u32 4294901760, %v21270_v41  ;;  %v21305_v11 = vsub.f32 %v12216_v33, %v21291_v52 }
 0x649   : > { %17773 = vmatmul.mubr.f32.gmra.mrb[10].mxu1 %v20959_v35  ;;  %v12205_v35 = vld [vmem:[#allocation2 + $0x50] sm:$0xff] }
 0x64a   : > { %17775 = vmatprep.mubr.f32.mxu1 %v20970_v56  ;;  %v12386_v61 = vsub.f32 %v21270_v41, %v21275_v7  ;;  %v12222_v26 = vsel %vm7453_vm3, %v12205_v35, 0  ;;  %v12314_v15 = vand.u32 4294901760, %v21305_v11 }
 0x64b   : > { %v21307_v42 = vand.u32 4294901760, %v12222_v26 }
 0x64c   : > { %v12387_v38 = vand.u32 4294901760, %v12386_v61  ;;  %v12315_v32 = vsub.f32 %v21305_v11, %v12314_v15  ;;  %v22185_v61 = vld [vmem:[#allocation98_spill] sm:$0xff] }
 0x64d   : > { %17776 = vmatmul.mubr.f32.gmra.mrb[12].mxu1 %v20980_v30  ;;  %v12202_v30 = vld [vmem:[#allocation2 + $0x20] sm:$0xff]  ;;  %v21324_v2 = vsub.f32 %v12222_v26, %v21307_v42  ;;  %v22186_v26 = vld [vmem:[#allocation99_spill] sm:$0xff] }
 0x64e   : > { %17778 = vmatprep.mubr.f32.mxu1 %v22179_v37  ;;  %v12213_v56 = vsel %vm7453_vm3, %v12202_v30, 0  ;;  %v12316_v12 = vand.u32 4294901760, %v12315_v32  ;;  %v22193_v32 = vld [vmem:[#allocation83_spill] sm:$0xff] }
 0x64f   : > { %v21280_v29 = vand.u32 4294901760, %v12213_v56  ;;  %v12334_v55 = vand.u32 4294901760, %v21324_v2 }
 0x651   : > { %17779 = vmatmul.mubr.f32.gmra.mrb[14].mxu1 %v21221_v28  ;;  %v21289_v63 = vsub.f32 %v12213_v56, %v21280_v29  ;;  %v12335_v37 = vsub.f32 %v21324_v2, %v12334_v55 }
 0x652   : > { %17783 = vmatprep.mubr.f32.mxu1 %v20900_v45 }
 0x653   : > { %v12304_v9 = vand.u32 4294901760, %v21289_v63  ;;  %v12336_v23 = vand.u32 4294901760, %v12335_v37  ;;  %v22200_v37 = vld [vmem:[#allocation85_spill] sm:$0xff] }
 0x655   : > { %17784 = vmatmul.mubr.f32.vlgmr.msra.gmra.mrb[8].mxu1 %v20902_v59  ;;  %v12305_v18 = vsub.f32 %v21289_v63, %v12304_v9 }
 0x656   : > { %17796 = vmatpush3.msra.mxu1 %v21190_v49  ;;  %17786 = vmatprep.mubr.f32.mxu1 %v20913_v58  ;;  %v22181_v49 = vld [vmem:[#allocation92_spill] sm:$0xff] }
 0x657   : > { %17809 = vmatprep.subr.mxu1 %v21263_v6  ;;  %v12306_v24 = vand.u32 4294901760, %v12305_v18  ;;  %v22189_v18 = vld [vmem:[#allocation72_spill] sm:$0xff] }
 0x659   : > { %17787 = vmatmul.mubr.f32.gmra.mrb[10].mxu1 %v20918_v54 }
 0x65a   : > { %17789 = vmatprep.mubr.f32.mxu1 %v20933_v17 }
 0x65d   : > { %17790 = vmatmul.mubr.f32.gmra.mrb[12].mxu1 %v20941_v60 }
 0x65e   : > { %17792 = vmatprep.mubr.f32.mxu1 %v20954_v3 }
 0x661   : > { %17793 = vmatmul.mubr.f32.gmra.mrb[14].mxu1 %v21211_v53 }
 0x662   : > { %17797 = vmatprep.mubr.f32.mxu1 %v20900_v45  ;;  %v14607_v45 = vld [vmem:[%s21770_s7] sm:$0xf] }
 0x663   : > { %v14616_v4 = vsel %vm413_vm0, %v14607_v45, 0 }
 0x664   : > { %v21316_v13 = vand.u32 4294901760, %v14616_v4 }
 0x665   : > { %17798 = vmatmul.mubr.f32.vlgmr.msra.gmra.mrb[8].mxu1 %v20902_v59  ;;  %v12209_v59 = vld [vmem:[#allocation2 + $0x90] sm:$0xff] }
 0x666   : > { %17810 = vmatpush3.msra.mxu1 %v21263_v6  ;;  %17800 = vmatprep.mubr.f32.mxu1 %v20913_v58  ;;  %v12228_v58 = vsel %vm7453_vm3, %v12207_v25, 0  ;;  %v12234_v47 = vsel %vm7453_vm3, %v12209_v59, 0  ;;  %v14766_v33 = vsub.f32 %v14616_v4, %v21316_v13 }
 0x667   : > { %17823 = vmatprep.subr.mxu1 %v12387_v38  ;;  %18061 = vmatprep.subr.mxu0 %v21316_v13  ;;  %v21326_v51 = vand.u32 4294901760, %v12228_v58  ;;  %v21338_v39 = vand.u32 4294901760, %v12234_v47 }
 0x668   : > { %18062 = vmatpush3.msra.mxu0 %v21316_v13 }
 0x669   : > { %17801 = vmatmul.mubr.f32.gmra.mrb[10].mxu1 %v20918_v54  ;;  %v12324_v54 = vand.u32 4294901760, %v21311_v8  ;;  %18064 = vmatmul.mubr.f32.vlgmr.msra.gmra.mrb[8].mxu0 %v22180_v16  ;;  %v21347_v5 = vsub.f32 %v12228_v58, %v21326_v51  ;;  %v22190_v16 = vld [vmem:[#allocation75_spill] sm:$0xff] }
 0x66a   : > { %17803 = vmatprep.mubr.f32.mxu1 %v20933_v17  ;;  %v21334_v17 = vsub.f32 %v12225_v1, %v21313_v0  ;;  %18066 = vmatprep.mubr.f32.mxu0 %v22181_v49  ;;  %v14767_v1 = vand.u32 4294901760, %v14766_v33  ;;  %v22191_v49 = vld [vmem:[#allocation77_spill] sm:$0xff] }
 0x66b   : > { %v12354_v46 = vand.u32 4294901760, %v21347_v5 }
 0x66c   : > { %v12344_v22 = vand.u32 4294901760, %v21334_v17  ;;  %v14768_v45 = vsub.f32 %v14766_v33, %v14767_v1 }
 0x66d   : > { %17804 = vmatmul.mubr.f32.gmra.mrb[12].mxu1 %v20941_v60  ;;  %v12325_v60 = vsub.f32 %v21311_v8, %v12324_v54  ;;  %18067 = vmatmul.mubr.f32.gmra.mrb[10].mxu0 %v22182_v34  ;;  %v12355_v35 = vsub.f32 %v21347_v5, %v12354_v46  ;;  %v22197_v34 = vld [vmem:[#allocation76_spill] sm:$0xff] }
 0x66e   : > { %17806 = vmatprep.mubr.f32.mxu1 %v20954_v3  ;;  %v21356_v3 = vsub.f32 %v12234_v47, %v21338_v39  ;;  %18069 = vmatprep.mubr.f32.mxu0 %v22183_v62  ;;  %v12345_v56 = vsub.f32 %v21334_v17, %v12344_v22  ;;  %v14769_v4 = vand.u32 4294901760, %v14768_v45  ;;  %v22188_v47 = vld [vmem:[#allocation71_spill] sm:$0xff] }
 0x66f   : > { %v12326_v30 = vand.u32 4294901760, %v12325_v60  ;;  %v12356_v59 = vand.u32 4294901760, %v12355_v35  ;;  %v22195_v60 = vld [vmem:[#allocation70_spill] sm:$0xff]  ;;  %v22198_v62 = vld [vmem:[#allocation79_spill] sm:$0xff] }
 0x670   : > { %v12374_v21 = vand.u32 4294901760, %v21356_v3  ;;  %v12346_v48 = vand.u32 4294901760, %v12345_v56  ;;  %18075 = vmatprep.subr.mxu0 %v14769_v4  ;;  %v22202_v56 = vld [vmem:[#allocation91_spill] sm:$0xff] }
 0x671   : > { %17807 = vmatmul.mubr.f32.gmra.mrb[14].mxu1 %v21211_v53  ;;  %18070 = vmatmul.mubr.f32.gmra.mrb[12].mxu0 %v22184_v36  ;;  %v22203_v36 = vld [vmem:[#allocation73_spill] sm:$0xff]  ;;  %v22207_v35 = vld [vmem:[#allocation87_spill] sm:$0xff] }
 0x672   : > { %17811 = vmatprep.mubr.f32.mxu1 %v12306_v24  ;;  %18072 = vmatprep.mubr.f32.mxu0 %v22185_v61  ;;  %v12375_v25 = vsub.f32 %v21356_v3, %v12374_v21  ;;  %v22194_v24 = vld [vmem:[#allocation86_spill] sm:$0xff] }
 0x673   : > { %18076 = vmatpush3.msra.mxu0 %v14769_v4  ;;  %v22204_v61 = vld [vmem:[#allocation78_spill] sm:$0xff] }
 0x674   : > { %v12376_v58 = vand.u32 4294901760, %v12375_v25  ;;  %18089 = vmatprep.subr.mxu0 %v14766_v33 }
 0x675   : > { %17812 = vmatmul.mubr.f32.vlgmr.msra.gmra.mrb[8].mxu1 %v12316_v12  ;;  %18073 = vmatmul.mubr.f32.gmra.mrb[14].mxu0 %v22186_v26  ;;  %v22199_v12 = vld [vmem:[#allocation82_spill] sm:$0xff] }
 0x676   : > { %17824 = vmatpush3.msra.mxu1 %v12387_v38  ;;  %17814 = vmatprep.mubr.f32.mxu1 %v12326_v30  ;;  %v22187_v38 = vld [vmem:[#allocation69_spill] sm:$0xff]  ;;  %v22201_v30 = vld [vmem:[#allocation88_spill] sm:$0xff] }
 0x677   : > { %17837 = vmatprep.subr.mxu1 %v21270_v41  ;;  %18077 = vmatprep.mubr.f32.mxu0 %v22187_v38 }
 0x679   : > { %17815 = vmatmul.mubr.f32.gmra.mrb[10].mxu1 %v12336_v23  ;;  %18078 = vmatmul.mubr.f32.vlgmr.msra.gmra.mrb[8].mxu0 %v22188_v47  ;;  %v22206_v23 = vld [vmem:[#allocation84_spill] sm:$0xff] }
 0x67a   : > { %17817 = vmatprep.mubr.f32.mxu1 %v12346_v48  ;;  %18080 = vmatprep.mubr.f32.mxu0 %v22189_v18 }
 0x67b   : > { %18090 = vmatpush3.msra.mxu0 %v14766_v33  ;;  %v22205_v33 = vld [vmem:[#allocation81_spill] sm:$0xff] }
 0x67c   : > { %18103 = vmatprep.subr.mxu0 %v21316_v13 }
 0x67d   : > { %17818 = vmatmul.mubr.f32.gmra.mrb[12].mxu1 %v12356_v59  ;;  %18081 = vmatmul.mubr.f32.gmra.mrb[10].mxu0 %v22190_v16  ;;  %v12998_v59 = vld [vmem:[#allocation2 + $0x91] sm:$0xff] }
 0x67e   : > { %17820 = vmatprep.mubr.f32.mxu1 %v21083_v14  ;;  %18083 = vmatprep.mubr.f32.mxu0 %v22191_v49  ;;  %v22192_v14 = vld [vmem:[#allocation80_spill] sm:$0xff] }
 0x681   : > { %17821 = vmatmul.mubr.f32.gmra.mrb[14].mxu1 %v12376_v58  ;;  %18084 = vmatmul.mubr.f32.gmra.mrb[12].mxu0 %v22192_v14 }
 0x682   : > { %17825 = vmatprep.mubr.f32.mxu1 %v21280_v29  ;;  %18086 = vmatprep.mubr.f32.mxu0 %v22193_v32 }
 0x685   : > { %17826 = vmatmul.mubr.f32.vlgmr.msra.gmra.mrb[8].mxu1 %v21291_v52  ;;  %18087 = vmatmul.mubr.f32.gmra.mrb[14].mxu0 %v22194_v24 }
 0x686   : > { %17838 = vmatpush3.msra.mxu1 %v21270_v41  ;;  %17828 = vmatprep.mubr.f32.mxu1 %v21293_v44  ;;  %v22196_v41 = vld [vmem:[#allocation74_spill] sm:$0xff] }
 0x687   : > { %17851 = vmatprep.subr.mxu1 %v21263_v6  ;;  %18091 = vmatprep.mubr.f32.mxu0 %v22195_v60 }
 0x689   : > { %17829 = vmatmul.mubr.f32.gmra.mrb[10].mxu1 %v21307_v42  ;;  %18092 = vmatmul.mubr.f32.vlgmr.msra.gmra.mrb[8].mxu0 %v22196_v41 }
 0x68a   : > { %17831 = vmatprep.mubr.f32.mxu1 %v21313_v0  ;;  %18094 = vmatprep.mubr.f32.mxu0 %v22197_v34 }
 0x68b   : > { %18104 = vmatpush3.msra.mxu0 %v21316_v13 }
 0x68c   : > { %18117 = vmatprep.subr.mxu0 %v14767_v1 }
 0x68d   : > { %17832 = vmatmul.mubr.f32.gmra.mrb[12].mxu1 %v21326_v51  ;;  %18095 = vmatmul.mubr.f32.gmra.mrb[10].mxu0 %v22198_v62 }
 0x68e   : > { %17834 = vmatprep.mubr.f32.mxu1 %v21065_v31  ;;  %18097 = vmatprep.mubr.f32.mxu0 %v22199_v12 }
 0x691   : > { %17835 = vmatmul.mubr.f32.gmra.mrb[14].mxu1 %v21338_v39  ;;  %18098 = vmatmul.mubr.f32.gmra.mrb[12].mxu0 %v22200_v37 }
 0x692   : > { %17839 = vmatprep.mubr.f32.mxu1 %v21289_v63  ;;  %18100 = vmatprep.mubr.f32.mxu0 %v22201_v30  ;;  %v22209_v63 = vld [vmem:[#allocation93_spill] sm:$0xff] }
 0x695   : > { %17840 = vmatmul.mubr.f32.vlgmr.msra.gmra.mrb[8].mxu1 %v21305_v11  ;;  %18101 = vmatmul.mubr.f32.gmra.mrb[14].mxu0 %v22202_v56 }
 0x696   : > { %17852 = vmatpush3.msra.mxu1 %v21263_v6  ;;  %17842 = vmatprep.mubr.f32.mxu1 %v21311_v8  ;;  %v12991_v8 = vld [vmem:[#allocation2 + $0x21] sm:$0xff] }
 0x697   : > { %17865 = vmatprep.subr.mxu1 %v21275_v7  ;;  %18105 = vmatprep.mubr.f32.mxu0 %v22203_v36 }
 0x699   : > { %17843 = vmatmul.mubr.f32.gmra.mrb[10].mxu1 %v21324_v2  ;;  %18106 = vmatmul.mubr.f32.vlgmr.msra.gmra.mrb[8].mxu0 %v22204_v61  ;;  %v12993_v2 = vld [vmem:[#allocation2 + $0x41] sm:$0xff] }
 0x69a   : > { %17845 = vmatprep.mubr.f32.mxu1 %v21334_v17  ;;  %18108 = vmatprep.mubr.f32.mxu0 %v22205_v33 }
 0x69b   : > { %18118 = vmatpush3.msra.mxu0 %v14767_v1 }
 0x69c   : > { %18131 = vmatprep.subr.mxu0 %v21316_v13 }
 0x69d   : > { %17846 = vmatmul.mubr.f32.gmra.mrb[12].mxu1 %v21347_v5  ;;  %18109 = vmatmul.mubr.f32.gmra.mrb[10].mxu0 %v22206_v23  ;;  %v13008_v5 = vsel %vm7453_vm3, %v12993_v2, 0 }
 0x69e   : > { %17848 = vmatprep.mubr.f32.mxu1 %v21070_v27  ;;  %18111 = vmatprep.mubr.f32.mxu0 %v22207_v35  ;;  %v22208_v27 = vld [vmem:[#allocation90_spill] sm:$0xff]  ;;  %v21489_v26 = vand.u32 4294901760, %v13008_v5 }
 0x6a1   : > { %17849 = vmatmul.mubr.f32.gmra.mrb[14].mxu1 %v21356_v3  ;;  %18112 = vmatmul.mubr.f32.gmra.mrb[12].mxu0 %v22208_v27  ;;  %v12995_v3 = vld [vmem:[#allocation2 + $0x61] sm:$0xff] }
 0x6a2   : > { %17853 = vmatprep.mubr.f32.mxu1 %v12304_v9  ;;  %18114 = vmatprep.mubr.f32.mxu0 %v22209_v63  ;;  %v22210_v9 = vld [vmem:[#allocation95_spill] sm:$0xff]  ;;  %v13014_v25 = vsel %vm7453_vm3, %v12995_v3, 0 }
 0x6a3   : > { %v21507_v58 = vand.u32 4294901760, %v13014_v25 }
 0x6a5   : > { %17854 = vmatmul.mubr.f32.vlgmr.msra.gmra.mrb[8].mxu1 %v12314_v15  ;;  %18115 = vmatmul.mubr.f32.gmra.mrb[14].mxu0 %v22210_v9  ;;  %v12992_v15 = vld [vmem:[#allocation2 + $0x31] sm:$0xff] }
 0x6a6   : > { %17866 = vmatpush3.msra.mxu1 %v21275_v7  ;;  %17856 = vmatprep.mubr.f32.mxu1 %v12324_v54  ;;  %v15512_v7 = vld [vmem:[%s21767_s4 + $0x38] sm:$0xff] }
 0x6a7   : > { %17879 = vmatprep.subr.mxu1 %v21263_v6  ;;  %18119 = vmatprep.mubr.f32.mxu0 %v22187_v38  ;;  %v21451_v11 = vand.u32 4294901760, %v15512_v7 }
 0x6a9   : > { %17857 = vmatmul.mubr.f32.gmra.mrb[10].mxu1 %v12334_v55  ;;  %18120 = vmatmul.mubr.f32.vlgmr.msra.gmra.mrb[8].mxu0 %v22188_v47  ;;  %v13005_v55 = vsel %vm7453_vm3, %v12992_v15, 0 }
 0x6aa   : > { %17859 = vmatprep.mubr.f32.mxu1 %v12344_v22  ;;  %18122 = vmatprep.mubr.f32.mxu0 %v22189_v18  ;;  %v12994_v22 = vld [vmem:[#allocation2 + $0x51] sm:$0xff] }
 0x6ab   : > { %18132 = vmatpush3.msra.mxu0 %v21316_v13  ;;  %v13011_v1 = vsel %vm7453_vm3, %v12994_v22, 0 }
 0x6ac   : > { %v21501_v45 = vand.u32 4294901760, %v13011_v1 }
 0x6ad   : > { %17860 = vmatmul.mubr.f32.gmra.mrb[12].mxu1 %v12354_v46  ;;  %18123 = vmatmul.mubr.f32.gmra.mrb[10].mxu0 %v22190_v16 }
 0x6ae   : > { %17862 = vmatprep.mubr.f32.mxu1 %v21075_v50  ;;  %18125 = vmatprep.mubr.f32.mxu0 %v22191_v49  ;;  %v21460_v50 = vsub.f32 %v15512_v7, %v21451_v11 }
 0x6b0   : > { %v21467_v13 = vand.u32 4294901760, %v21460_v50 }
 0x6b1   : > { %17863 = vmatmul.mubr.f32.gmra.mrb[14].mxu1 %v12374_v21  ;;  %18126 = vmatmul.mubr.f32.gmra.mrb[12].mxu0 %v22192_v14  ;;  %v21484_v21 = vand.u32 4294901760, %v13005_v55 }
 0x6b2   : > { %17867 = vmatprep.mubr.f32.mxu1 %v21280_v29  ;;  %18128 = vmatprep.mubr.f32.mxu0 %v22193_v32  ;;  %v13175_v54 = vsub.f32 %v21460_v50, %v21467_v13 }
 0x6b4   : > { %v13176_v46 = vand.u32 4294901760, %v13175_v54  ;;  %v13783_v54 = vld [vmem:[#allocation2 + $0x52] sm:$0xff] }
 0x6b5   : > { %17868 = vmatmul.mubr.f32.vlgmr.msra.gmra.mrb[8].mxu1 %v21291_v52  ;;  %18129 = vmatmul.mubr.f32.gmra.mrb[14].mxu0 %v22194_v24 }
 0x6b6   : > { %17880 = vmatpush3.msra.mxu1 %v21263_v6  ;;  %17870 = vmatprep.mubr.f32.mxu1 %v21293_v44  ;;  %v13002_v6 = vsel %vm7453_vm3, %v12991_v8, 0  ;;  %v13782_v8 = vld [vmem:[#allocation2 + $0x42] sm:$0xff] }
 0x6b7   : > { %17893 = vmatprep.subr.mxu1 %v21451_v11  ;;  %18133 = vmatprep.mubr.f32.mxu0 %v22187_v38  ;;  %v21476_v17 = vand.u32 4294901760, %v13002_v6  ;;  %v12996_v38 = vld [vmem:[#allocation2 + $0x71] sm:$0xff]  ;;  %v13797_v2 = vsel %vm7453_vm3, %v13782_v8, 0 }
 0x6b9   : > { %17871 = vmatmul.mubr.f32.gmra.mrb[10].mxu1 %v21307_v42  ;;  %18134 = vmatmul.mubr.f32.vlgmr.msra.gmra.mrb[8].mxu0 %v22188_v47  ;;  %v21487_v48 = vsub.f32 %v13002_v6, %v21476_v17  ;;  %v13017_v47 = vsel %vm7453_vm3, %v12996_v38, 0 }
 0x6ba   : > { %17873 = vmatprep.mubr.f32.mxu1 %v21313_v0  ;;  %18136 = vmatprep.mubr.f32.mxu0 %v22189_v18 }
 0x6bb   : > { %v13093_v4 = vand.u32 4294901760, %v21487_v48 }
 0x6bd   : > { %17874 = vmatmul.mubr.f32.gmra.mrb[12].mxu1 %v21326_v51  ;;  %18137 = vmatmul.mubr.f32.gmra.mrb[10].mxu0 %v22190_v16  ;;  %v21517_v16 = vsub.f32 %v13011_v1, %v21501_v45  ;;  %v13094_v60 = vsub.f32 %v21487_v48, %v13093_v4 }
 0x6be   : > { %17876 = vmatprep.mubr.f32.mxu1 %v21065_v31  ;;  %18139 = vmatprep.mubr.f32.mxu0 %v22191_v49  ;;  %v21519_v49 = vand.u32 4294901760, %v13017_v47 }
 0x6bf   : > { %v13123_v41 = vand.u32 4294901760, %v21517_v16  ;;  %v13095_v62 = vand.u32 4294901760, %v13094_v60 }
 0x6c0   : > { %v13142_v34 = vsub.f32 %v13017_v47, %v21519_v49 }
 0x6c1   : > { %17877 = vmatmul.mubr.f32.gmra.mrb[14].mxu1 %v21338_v39  ;;  %18140 = vmatmul.mubr.f32.gmra.mrb[12].mxu0 %v22192_v14  ;;  %v13124_v30 = vsub.f32 %v21517_v16, %v13123_v41 }
 0x6c2   : > { %17881 = vmatprep.mubr.f32.mxu1 %v21280_v29  ;;  %v21499_v29 = vsub.f32 %v13005_v55, %v21484_v21  ;;  %18142 = vmatprep.mubr.f32.mxu0 %v22193_v32  ;;  %v13143_v56 = vand.u32 4294901760, %v13142_v34  ;;  %v13784_v55 = vld [vmem:[#allocation2 + $0x62] sm:$0xff] }
 0x6c3   : > { %v13125_v33 = vand.u32 4294901760, %v13124_v30  ;;  %v13803_v1 = vsel %vm7453_vm3, %v13784_v55, 0 }
 0x6c4   : > { %v13103_v18 = vand.u32 4294901760, %v21499_v29  ;;  %v13144_v23 = vsub.f32 %v13142_v34, %v13143_v56 }
 0x6c5   : > { %17882 = vmatmul.mubr.f32.vlgmr.msra.gmra.mrb[8].mxu1 %v21291_v52  ;;  %v21505_v52 = vsub.f32 %v13008_v5, %v21489_v26  ;;  %18143 = vmatmul.mubr.f32.gmra.mrb[14].mxu0 %v22194_v24 }
 0x6c6   : > { %17894 = vmatpush3.msra.mxu1 %v21451_v11  ;;  %17884 = vmatprep.mubr.f32.mxu1 %v21293_v44  ;;  %v13023_v44 = vsel %vm7453_vm3, %v12998_v59, 0  ;;  %v13104_v32 = vsub.f32 %v21499_v29, %v13103_v18  ;;  %v13145_v27 = vand.u32 4294901760, %v13144_v23 }
 0x6c7   : > { %17907 = vmatprep.subr.mxu1 %v13176_v46  ;;  %v13113_v14 = vand.u32 4294901760, %v21505_v52 }
 0x6c9   : > { %17885 = vmatmul.mubr.f32.gmra.mrb[10].mxu1 %v21307_v42  ;;  %v13132_v42 = vsub.f32 %v13014_v25, %v21507_v58  ;;  %v13114_v12 = vsub.f32 %v21505_v52, %v13113_v14  ;;  %v13785_v25 = vld [vmem:[#allocation2 + $0x72] sm:$0xff] }
 0x6ca   : > { %17887 = vmatprep.mubr.f32.mxu1 %v21313_v0  ;;  %v21528_v0 = vand.u32 4294901760, %v13023_v44 }
 0x6cb   : > { %v13133_v37 = vand.u32 4294901760, %v13132_v42 }
 0x6cc   : > { %v13162_v24 = vsub.f32 %v13023_v44, %v21528_v0 }
 0x6cd   : > { %17888 = vmatmul.mubr.f32.gmra.mrb[12].mxu1 %v21326_v51  ;;  %v13105_v51 = vand.u32 4294901760, %v13104_v32  ;;  %v13134_v36 = vsub.f32 %v13132_v42, %v13133_v37 }
 0x6ce   : > { %17890 = vmatprep.mubr.f32.mxu1 %v21065_v31  ;;  %v13115_v31 = vand.u32 4294901760, %v13114_v12  ;;  %v13163_v61 = vand.u32 4294901760, %v13162_v24 }
 0x6cf   : > { %v13135_v35 = vand.u32 4294901760, %v13134_v36 }
 0x6d1   : > { %17891 = vmatmul.mubr.f32.gmra.mrb[14].mxu1 %v21338_v39  ;;  %v13164_v39 = vsub.f32 %v13162_v24, %v13163_v61 }
 0x6d2   : > { %17895 = vmatprep.mubr.f32.mxu1 %v13095_v62 }
 0x6d3   : > { %v13165_v63 = vand.u32 4294901760, %v13164_v39 }
 0x6d5   : > { %17896 = vmatmul.mubr.f32.vlgmr.msra.gmra.mrb[8].mxu1 %v13105_v51 }
 0x6d6   : > { %17908 = vmatpush3.msra.mxu1 %v13176_v46  ;;  %17898 = vmatprep.mubr.f32.mxu1 %v13115_v31  ;;  %v21596_v46 = vand.u32 4294901760, %v13797_v2 }
 0x6d7   : > { %17921 = vmatprep.subr.mxu1 %v21460_v50 }
 0x6d9   : > { %17899 = vmatmul.mubr.f32.gmra.mrb[10].mxu1 %v13125_v33 }
 0x6da   : > { %17901 = vmatprep.mubr.f32.mxu1 %v13135_v35 }
 0x6dd   : > { %17902 = vmatmul.mubr.f32.gmra.mrb[12].mxu1 %v13145_v27 }
 0x6de   : > { %17904 = vmatprep.mubr.f32.mxu1 %v21156_v20  ;;  %v15513_v20 = vld [vmem:[%s21767_s4 + $0x40] sm:$0xff] }
 0x6e1   : > { %17905 = vmatmul.mubr.f32.gmra.mrb[14].mxu1 %v13165_v63 }
 0x6e2   : > { %17909 = vmatprep.mubr.f32.mxu1 %v21476_v17 }
 0x6e5   : > { %17910 = vmatmul.mubr.f32.vlgmr.msra.gmra.mrb[8].mxu1 %v21484_v21 }
 0x6e6   : > { %17922 = vmatpush3.msra.mxu1 %v21460_v50  ;;  %17912 = vmatprep.mubr.f32.mxu1 %v21489_v26 }
 0x6e7   : > { %17935 = vmatprep.subr.mxu1 %v21451_v11 }
 0x6e9   : > { %17913 = vmatmul.mubr.f32.gmra.mrb[10].mxu1 %v21501_v45 }
 0x6ea   : > { %17915 = vmatprep.mubr.f32.mxu1 %v21507_v58 }
 0x6ed   : > { %17916 = vmatmul.mubr.f32.gmra.mrb[12].mxu1 %v21519_v49 }
 0x6ee   : > { %17918 = vmatprep.mubr.f32.mxu1 %v21138_v57 }
 0x6f1   : > { %17919 = vmatmul.mubr.f32.gmra.mrb[14].mxu1 %v21528_v0 }
 0x6f2   : > { %17923 = vmatprep.mubr.f32.mxu1 %v21487_v48  ;;  %v13800_v48 = vsel %vm7453_vm3, %v13783_v54, 0 }
 0x6f3   : > { %v21606_v38 = vand.u32 4294901760, %v13800_v48 }
 0x6f5   : > { %17924 = vmatmul.mubr.f32.vlgmr.msra.gmra.mrb[8].mxu1 %v21499_v29  ;;  %v13787_v29 = vld [vmem:[#allocation2 + $0x92] sm:$0xff]  ;;  %v21620_v44 = vsub.f32 %v13800_v48, %v21606_v38 }
 0x6f6   : > { %17936 = vmatpush3.msra.mxu1 %v21451_v11  ;;  %17926 = vmatprep.mubr.f32.mxu1 %v21505_v52  ;;  %v13806_v52 = vsel %vm7453_vm3, %v13785_v25, 0 }
 0x6f7   : > { %17949 = vmatprep.subr.mxu1 %v21467_v13 }
 0x6f9   : > { %17927 = vmatmul.mubr.f32.gmra.mrb[10].mxu1 %v21517_v16 }
 0x6fa   : > { %17929 = vmatprep.mubr.f32.mxu1 %v13132_v42  ;;  %v13912_v42 = vand.u32 4294901760, %v21620_v44 }
 0x6fd   : > { %17930 = vmatmul.mubr.f32.gmra.mrb[12].mxu1 %v13142_v34 }
 0x6fe   : > { %17932 = vmatprep.mubr.f32.mxu1 %v21143_v43  ;;  %v21566_v43 = vand.u32 4294901760, %v15513_v20 }
 0x700   : > { %v21573_v9 = vsub.f32 %v15513_v20, %v21566_v43  ;;  %v15514_v20 = vld [vmem:[%s21768_s5] ss:$0 sm:$0xff] }
 0x701   : > { %17933 = vmatmul.mubr.f32.gmra.mrb[14].mxu1 %v13162_v24 }
 0x702   : > { %17937 = vmatprep.mubr.f32.mxu1 %v13093_v4  ;;  %v21578_v7 = vand.u32 4294901760, %v21573_v9  ;;  %v21610_v4 = vsub.f32 %v13797_v2, %v21596_v46 }
 0x704   : > { %v13902_v60 = vand.u32 4294901760, %v21610_v4 }
 0x705   : > { %17938 = vmatmul.mubr.f32.vlgmr.msra.gmra.mrb[8].mxu1 %v13103_v18  ;;  %v21622_v18 = vand.u32 4294901760, %v13806_v52 }
 0x706   : > { %17950 = vmatpush3.msra.mxu1 %v21467_v13  ;;  %17940 = vmatprep.mubr.f32.mxu1 %v13113_v14  ;;  %v13964_v13 = vsub.f32 %v21573_v9, %v21578_v7  ;;  %v13903_v34 = vsub.f32 %v21610_v4, %v13902_v60 }
 0x707   : > { %17963 = vmatprep.subr.mxu1 %v21451_v11  ;;  %v13931_v32 = vsub.f32 %v13806_v52, %v21622_v18 }
 0x708   : > { %v13965_v5 = vand.u32 4294901760, %v13964_v13 }
 0x709   : > { %17941 = vmatmul.mubr.f32.gmra.mrb[10].mxu1 %v13123_v41  ;;  %v13932_v24 = vand.u32 4294901760, %v13931_v32 }
 0x70a   : > { %17943 = vmatprep.mubr.f32.mxu1 %v13133_v37  ;;  %v13913_v37 = vsub.f32 %v21620_v44, %v13912_v42 }
 0x70b   : > { %v13933_v31 = vsub.f32 %v13931_v32, %v13932_v24 }
 0x70d   : > { %17944 = vmatmul.mubr.f32.gmra.mrb[12].mxu1 %v13143_v56  ;;  %v13914_v56 = vand.u32 4294901760, %v13913_v37 }
 0x70e   : > { %17946 = vmatprep.mubr.f32.mxu1 %v21148_v19  ;;  %v13780_v19 = vld [vmem:[#allocation2 + $0x22] sm:$0xff] }
 0x70f   : > { %v13791_v50 = vsel %vm7453_vm3, %v13780_v19, 0 }
 0x710   : > { %v21585_v6 = vand.u32 4294901760, %v13791_v50 }
 0x711   : > { %17947 = vmatmul.mubr.f32.gmra.mrb[14].mxu1 %v13163_v61  ;;  %v13934_v61 = vand.u32 4294901760, %v13933_v31 }
 0x712   : > { %17951 = vmatprep.mubr.f32.mxu1 %v21476_v17  ;;  %v21594_v3 = vsub.f32 %v13791_v50, %v21585_v6 }
 0x714   : > { %v13882_v59 = vand.u32 4294901760, %v21594_v3 }
 0x715   : > { %17952 = vmatmul.mubr.f32.vlgmr.msra.gmra.mrb[8].mxu1 %v21484_v21 }
 0x716   : > { %17964 = vmatpush3.msra.mxu1 %v21451_v11  ;;  %17954 = vmatprep.mubr.f32.mxu1 %v21489_v26  ;;  %v13781_v11 = vld [vmem:[#allocation2 + $0x32] sm:$0xff]  ;;  %v13883_v16 = vsub.f32 %v21594_v3, %v13882_v59 }
 0x717   : > { %17977 = vmatprep.subr.mxu1 %v21566_v43  ;;  %v13794_v15 = vsel %vm7453_vm3, %v13781_v11, 0 }
 0x718   : > { %v21591_v22 = vand.u32 4294901760, %v13794_v15  ;;  %v13884_v41 = vand.u32 4294901760, %v13883_v16 }
 0x719   : > { %17955 = vmatmul.mubr.f32.gmra.mrb[10].mxu1 %v21501_v45 }
 0x71a   : > { %17957 = vmatprep.mubr.f32.mxu1 %v21507_v58 }
 0x71d   : > { %17958 = vmatmul.mubr.f32.gmra.mrb[12].mxu1 %v21519_v49 }
 0x71e   : > { %17960 = vmatprep.mubr.f32.mxu1 %v21138_v57 }
 0x721   : > { %17961 = vmatmul.mubr.f32.gmra.mrb[14].mxu1 %v21528_v0 }
 0x722   : > { %17965 = vmatprep.mubr.f32.mxu1 %v21476_v17  ;;  %v21604_v17 = vsub.f32 %v13794_v15, %v21591_v22 }
 0x724   : > { %v13892_v47 = vand.u32 4294901760, %v21604_v17 }
 0x725   : > { %17966 = vmatmul.mubr.f32.vlgmr.msra.gmra.mrb[8].mxu1 %v21484_v21  ;;  %v21612_v21 = vand.u32 4294901760, %v13803_v1 }
 0x726   : > { %17978 = vmatpush3.msra.mxu1 %v21566_v43  ;;  %17968 = vmatprep.mubr.f32.mxu1 %v21489_v26  ;;  %v13812_v26 = vsel %vm7453_vm3, %v13787_v29, 0 }
 0x727   : > { %17991 = vmatprep.subr.mxu1 %v13965_v5  ;;  %v13921_v14 = vsub.f32 %v13803_v1, %v21612_v21 }
 0x729   : > { %17969 = vmatmul.mubr.f32.gmra.mrb[10].mxu1 %v21501_v45  ;;  %v21630_v45 = vand.u32 4294901760, %v13812_v26  ;;  %v13922_v62 = vand.u32 4294901760, %v13921_v14 }
 0x72a   : > { %17971 = vmatprep.mubr.f32.mxu1 %v21507_v58  ;;  %v13893_v58 = vsub.f32 %v21604_v17, %v13892_v47 }
 0x72b   : > { %v13951_v12 = vsub.f32 %v13812_v26, %v21630_v45  ;;  %v13923_v51 = vsub.f32 %v13921_v14, %v13922_v62 }
 0x72d   : > { %17972 = vmatmul.mubr.f32.gmra.mrb[12].mxu1 %v21519_v49  ;;  %v13894_v49 = vand.u32 4294901760, %v13893_v58  ;;  %v13952_v30 = vand.u32 4294901760, %v13951_v12  ;;  %v13924_v36 = vand.u32 4294901760, %v13923_v51 }
 0x72e   : > { %17974 = vmatprep.mubr.f32.mxu1 %v21138_v57  ;;  %v13904_v57 = vand.u32 4294901760, %v13903_v34 }
 0x731   : > { %17975 = vmatmul.mubr.f32.gmra.mrb[14].mxu1 %v21528_v0  ;;  %v13953_v0 = vsub.f32 %v13951_v12, %v13952_v30 }
 0x732   : > { %17979 = vmatprep.mubr.f32.mxu1 %v13884_v41 }
 0x733   : > { %v13954_v33 = vand.u32 4294901760, %v13953_v0 }
 0x735   : > { %17980 = vmatmul.mubr.f32.vlgmr.msra.gmra.mrb[8].mxu1 %v13894_v49 }
 0x736   : > { %17992 = vmatpush3.msra.mxu1 %v13965_v5  ;;  %17982 = vmatprep.mubr.f32.mxu1 %v13904_v57 }
 0x737   : > { %18005 = vmatprep.subr.mxu1 %v21573_v9 }
 0x739   : > { %17983 = vmatmul.mubr.f32.gmra.mrb[10].mxu1 %v13914_v56 }
 0x73a   : > { %17985 = vmatprep.mubr.f32.mxu1 %v13924_v36 }
 0x73d   : > { %17986 = vmatmul.mubr.f32.gmra.mrb[12].mxu1 %v13934_v61 }
 0x73e   : > { %17988 = vmatprep.mubr.f32.mxu1 %v21229_v10 }
 0x741   : > { %17989 = vmatmul.mubr.f32.gmra.mrb[14].mxu1 %v13954_v33 }
 0x742   : > { %17993 = vmatprep.mubr.f32.mxu1 %v21585_v6 }
 0x745   : > { %17994 = vmatmul.mubr.f32.vlgmr.msra.gmra.mrb[8].mxu1 %v21591_v22 }
 0x746   : > { %18006 = vmatpush3.msra.mxu1 %v21573_v9  ;;  %17996 = vmatprep.mubr.f32.mxu1 %v21596_v46 }
 0x747   : > { %18019 = vmatprep.subr.mxu1 %v21566_v43 }
 0x749   : > { %17997 = vmatmul.mubr.f32.gmra.mrb[10].mxu1 %v21606_v38 }
 0x74a   : > { %17999 = vmatprep.mubr.f32.mxu1 %v21612_v21 }
 0x74d   : > { %18000 = vmatmul.mubr.f32.gmra.mrb[12].mxu1 %v21622_v18 }
 0x74e   : > { %18002 = vmatprep.mubr.f32.mxu1 %v21211_v53 }
 0x751   : > { %18003 = vmatmul.mubr.f32.gmra.mrb[14].mxu1 %v21630_v45 }
 0x752   : > { %18007 = vmatprep.mubr.f32.mxu1 %v21594_v3 }
 0x755   : > { %18008 = vmatmul.mubr.f32.vlgmr.msra.gmra.mrb[8].mxu1 %v21604_v17 }
 0x756   : > { %18020 = vmatpush3.msra.mxu1 %v21566_v43  ;;  %18010 = vmatprep.mubr.f32.mxu1 %v21610_v4 }
 0x757   : > { %18033 = vmatprep.subr.mxu1 %v21578_v7 }
 0x759   : > { %18011 = vmatmul.mubr.f32.gmra.mrb[10].mxu1 %v21620_v44 }
 0x75a   : > { %18013 = vmatprep.mubr.f32.mxu1 %v13921_v14 }
 0x75d   : > { %18014 = vmatmul.mubr.f32.gmra.mrb[12].mxu1 %v13931_v32 }
 0x75e   : > { %18016 = vmatprep.mubr.f32.mxu1 %v21216_v40 }
 0x761   : > { %18017 = vmatmul.mubr.f32.gmra.mrb[14].mxu1 %v13951_v12 }
 0x762   : > { %18021 = vmatprep.mubr.f32.mxu1 %v13882_v59 }
 0x765   : > { %18022 = vmatmul.mubr.f32.vlgmr.msra.gmra.mrb[8].mxu1 %v13892_v47 }
 0x766   : > { %18034 = vmatpush3.msra.mxu1 %v21578_v7  ;;  %18024 = vmatprep.mubr.f32.mxu1 %v13902_v60  ;;  %v15516_v7 = vld [vmem:[%s21771_s8] ss:$0 sm:$0xff] }
 0x767   : > { %18047 = vmatprep.subr.mxu1 %v21566_v43 }
 0x769   : > { %18025 = vmatmul.mubr.f32.gmra.mrb[10].mxu1 %v13912_v42 }
 0x76a   : > { %18027 = vmatprep.mubr.f32.mxu1 %v13922_v62 }
 0x76d   : > { %18028 = vmatmul.mubr.f32.gmra.mrb[12].mxu1 %v13932_v24 }
 0x76e   : > { %18030 = vmatprep.mubr.f32.mxu1 %v21221_v28 }
 0x771   : > { %18031 = vmatmul.mubr.f32.gmra.mrb[14].mxu1 %v13952_v30 }
 0x772   : > { %18035 = vmatprep.mubr.f32.mxu1 %v21585_v6 }
 0x775   : > { %18036 = vmatmul.mubr.f32.vlgmr.msra.gmra.mrb[8].mxu1 %v21591_v22 }
 0x776   : > { %18048 = vmatpush3.msra.mxu1 %v21566_v43  ;;  %18038 = vmatprep.mubr.f32.mxu1 %v21596_v46 }
 0x779   : > { %18039 = vmatmul.mubr.f32.gmra.mrb[10].mxu1 %v21606_v38 }
 0x77a   : > { %18041 = vmatprep.mubr.f32.mxu1 %v21612_v21 }
 0x77d   : > { %18042 = vmatmul.mubr.f32.gmra.mrb[12].mxu1 %v21622_v18 }
 0x77e   : > { %18044 = vmatprep.mubr.f32.mxu1 %v21211_v53 }
 0x781   : > { %18045 = vmatmul.mubr.f32.gmra.mrb[14].mxu1 %v21630_v45 }
 0x782   : > { %18049 = vmatprep.mubr.f32.mxu1 %v21585_v6 }
 0x785   : > { %18050 = vmatmul.mubr.f32.vlgmr.msra.gmra.mrb[8].mxu1 %v21591_v22 }
 0x786   : > { %18052 = vmatprep.mubr.f32.mxu1 %v21596_v46 }
 0x789   : > { %18053 = vmatmul.mubr.f32.gmra.mrb[10].mxu1 %v21606_v38 }
 0x78a   : > { %18055 = vmatprep.mubr.f32.mxu1 %v21612_v21 }
 0x78c   : > { %v18135_v40 = vpop.f32.mrb[8].mxu0 }
 0x78d   : > { %18056 = vmatmul.mubr.f32.gmra.mrb[12].mxu1 %v21622_v18  ;;  %v15319_v28 = vpop.f32.mrb[9].mxu0  ;;  %v18153_v6 = vadd.f32 %v18135_v40, %v15516_v7 }
 0x78e   : > { %18058 = vmatprep.mubr.f32.mxu1 %v21211_v53  ;;  %v15515_v53 = vld [vmem:[%s21769_s6] ss:$0 sm:$0xff]  ;;  %v18154_v55 = vadd.f32 %v15516_v7, %v15319_v28 }
 0x790   : > { %v18138_v10 = vpop.f32.mrb[10].mxu0 }
 0x791   : > { %18059 = vmatmul.mubr.f32.gmra.mrb[14].mxu1 %v21630_v45  ;;  %v15331_v23 = vpop.f32.mrb[11].mxu0  ;;  %v18155_v17 = vadd.f32 %v18138_v10, %v15516_v7 }
 0x792   : > { %v18156_v4 = vadd.f32 %v15516_v7, %v15331_v23 }
 0x794   : > { %v18141_v35 = vpop.f32.mrb[12].mxu0 }
 0x795   : > { %v15343_v39 = vpop.f32.mrb[13].mxu0  ;;  %v18157_v60 = vadd.f32 %v18141_v35, %v15516_v7 }
 0x796   : > { %v18158_v42 = vadd.f32 %v15516_v7, %v15343_v39 }
 0x798   : > { %v18144_v27 = vpop.f32.mrb[14].mxu0 }
 0x799   : > { %v15355_v63 = vpop.f32.mrb[15].mxu0  ;;  %v18159_v37 = vadd.f32 %v18144_v27, %v15516_v7 }
 0x79a   : > { %v18160_v57 = vadd.f32 %v15516_v7, %v15355_v63 }
 0x858   : > { %v18051_v43 = vpop.f32.mrb[8].mxu1 }
 0x859   : > { %v14577_v9 = vmul.f32 %v18051_v43, %v15514_v20  ;;  %v14515_v19 = vpop.f32.mrb[9].mxu1 }
 0x85a   : > { %v14576_v50 = vmul.f32 %v15514_v20, %v14515_v19 }
 0x85b   : > { %v14592_v11 = vadd.f32 %v15515_v53, %v14577_v9 }
 0x85c   : > { %v14591_v8 = vadd.f32 %v15515_v53, %v14576_v50  ;;  %v18054_v13 = vpop.f32.mrb[10].mxu1 }
 0x85d   : > { %v14600_v15 = vmax.f32 %v14592_v11, 0.0  ;;  %v14579_v2 = vmul.f32 %v18054_v13, %v15514_v20  ;;  %v14527_v54 = vpop.f32.mrb[11].mxu1 }
 0x85e   : > { %v14599_v5 = vmax.f32 %v14591_v8, 0.0  ;;  %v14578_v22 = vmul.f32 %v15514_v20, %v14527_v54 }
 0x85f   : > { %v15366_v3 = vadd.f32 %v18153_v6, %v14600_v15  ;;  %v14594_v46 = vadd.f32 %v15515_v53, %v14579_v2 }
 0x860   : > { %v15365_v48 = vadd.f32 %v18154_v55, %v14599_v5  ;;  %v14593_v1 = vadd.f32 %v15515_v53, %v14578_v22  ;;  %v18057_v25 = vpop.f32.mrb[12].mxu1 }
 0x861   : > { %15374 = vst.msk [vmem:[%s21693_s29 + $0x8] sm:$0xff] %vm7453_vm3, %v15366_v3  ;;  %v14602_v38 = vmax.f32 %v14594_v46, 0.0  ;;  %v14581_v29 = vmul.f32 %v18057_v25, %v15514_v20  ;;  %v14539_v59 = vpop.f32.mrb[13].mxu1 }
 0x862   : > { %15373 = vst.msk [vmem:[%s21693_s29] sm:$0xff] %vm7453_vm3, %v15365_v48  ;;  %v14601_v21 = vmax.f32 %v14593_v1, 0.0  ;;  %v14580_v52 = vmul.f32 %v15514_v20, %v14539_v59 }
 0x863   : > { %v15368_v26 = vadd.f32 %v18155_v17, %v14602_v38  ;;  %v14596_v47 = vadd.f32 %v15515_v53, %v14581_v29 }
 0x864   : > { %v15367_v44 = vadd.f32 %v18156_v4, %v14601_v21  ;;  %v14595_v18 = vadd.f32 %v15515_v53, %v14580_v52  ;;  %v18060_v16 = vpop.f32.mrb[14].mxu1 }
 0x865   : > { %15376 = vst.msk [vmem:[%s21693_s29 + $0x18] sm:$0xff] %vm7453_vm3, %v15368_v26  ;;  %v14604_v14 = vmax.f32 %v14596_v47, 0.0  ;;  %v14583_v45 = vmul.f32 %v18060_v16, %v15514_v20  ;;  %v14551_v58 = vpop.f32.mrb[15].mxu1 }
 0x866   : > { %15375 = vst.msk [vmem:[%s21693_s29 + $0x10] sm:$0xff] %vm7453_vm3, %v15367_v44  ;;  %v14603_v32 = vmax.f32 %v14595_v18, 0.0  ;;  %v14582_v41 = vmul.f32 %v15514_v20, %v14551_v58 }
 0x867   : > { %v15370_v34 = vadd.f32 %v18157_v60, %v14604_v14  ;;  %v14598_v62 = vadd.f32 %v15515_v53, %v14583_v45 }
 0x868   : > { %v15369_v12 = vadd.f32 %v18158_v42, %v14603_v32  ;;  %v14597_v49 = vadd.f32 %v15515_v53, %v14582_v41 }
 0x869   : > { %15378 = vst.msk [vmem:[%s21693_s29 + $0x28] sm:$0xff] %vm7453_vm3, %v15370_v34  ;;  %v14606_v24 = vmax.f32 %v14598_v62, 0.0 }
 0x86a   : > { %15377 = vst.msk [vmem:[%s21693_s29 + $0x20] sm:$0xff] %vm7453_vm3, %v15369_v12  ;;  %v14605_v51 = vmax.f32 %v14597_v49, 0.0 }
 0x86b   : > { %v15372_v30 = vadd.f32 %v18159_v37, %v14606_v24 }
 0x86c   : > { %v15371_v56 = vadd.f32 %v18160_v57, %v14605_v51 }
 0x86d   : > { %15380 = vst.msk [vmem:[%s21693_s29 + $0x38] sm:$0xff] %vm7453_vm3, %v15372_v30 }
 0x86e   : > { %15379 = vst.msk [vmem:[%s21693_s29 + $0x30] sm:$0xff] %vm7453_vm3, %v15371_v56 }
 0x86f   : > { %19097 = shalt.err (!%p19094_p3)
}
 0x870   : > { %s19098_s22 = scalar_lea.hbm %s21712_s21, 1024  ;;  %s19102_s14 = scalar_lea.hbm %s21772_s9, 2048 }
 0x871   : > { %p19099_p4 = scmp.ne.s32.totalorder %s21712_s21, %s19098_s22  ;;  %p19103_p9 = scmp.lt.u32.totalorder %s21712_s21, %s21772_s9 }
 0x872   : > { %p19104_p10 = scmp.lt.u32.totalorder %s19102_s14, %s19098_s22  ;;  %p19106_p12 = scmp.lt.u32.totalorder %s19098_s22, %s21712_s21 }
 0x873   : > { %p19100_p7 = pnand %p19099_p4, %p19240_p5 }
 0x874   : > { %p19105_p11 = por %p19104_p10, %p19103_p9 }
 0x875   : > { %p19101_p8 = pneg %p19100_p7 }
 0x876   : > { %p19107_p13 = por %p19106_p12, %p19105_p11 }
 0x878   : > { %p19108_p0 = pnand %p19107_p13, %p19101_p8 }
 0x87a   : > { %19111 = shalt.err (!%p19108_p0)
}
 0x87b   : > { %s19150_s23 = smov 128   ;;  %s19151_s24 = smov 8  }
 0x87c   : > { %19042 = dma.vmem_to_hbm [thread:$0]  (%p19240_p5), %s21714_s16, 1024, %s21712_s21, %s21722_s13, %s19150_s23, %s19150_s23, %s19151_s24  }
 0x87d PF: > { %p19048_p1 = scmp.ge.s32.totalorder %s19146_s12, 2  ;;  %s15410_s25 = sand.u32 1, %s19134_s30  }
 0x87e   : > { %s15411_s26 = scalar_lea.sflag [#allocation4], %s15410_s25 }
 0x87f   : > { %p19045_p2 = pnand %p19048_p1, %p19244_p6 }
 0x881   : > { %19129 = dma.done.wait (!%p19045_p2), %s15411_s26, 1024  }
 0x882   : > { %19131 = vsyncadd (!%p19045_p2), %s15411_s26, 4294966272  ;;  %p19_p3 = scmp.ge.s32.totalorder %s19227_s15, 4   ;;  %s22211_s30 = smov %s19138_s10 }
 0x883   : > { %s22212_s10 = smov %s19142_s11  ;;  %s22213_s11 = smov %s19238_s18 }
 0x884   : > { %s22214_s12 = smov %s19227_s15  ;;  %21 = sbr.rel (!%p19_p3) target bundleno = 3 (0x3), region = 112 }
 0x88b   :  { %15416 = vsyncpa [#allocation4], 1 }
 0x88c   :  { %15418 = vsyncpa [#allocation4 + $0x1], 1 }

</bundles_post_ra>
